<compile_context>
chip_gen: v7x
topology: tpu7x:2x2x1
jax: 0.10.0
libtpu: 0.0.40
codegen_flags: <defaults>
</compile_context>

<pallas_src>
import functools

import numpy as np
import jax
import jax.numpy as jnp
from jax.experimental import pallas as pl
from jax.experimental.pallas import tpu as pltpu

SEQ_LEN = 400
KERNEL_SIZE = 8
CONV_OUT = SEQ_LEN - KERNEL_SIZE + 1          # 393 (module hardcodes 400 - 8 + 1)


def _round_up(x, m):
    return ((x + m - 1) // m) * m


CONV_PAD = _round_up(CONV_OUT, 128)           # 512: MXU-aligned K for Linear #1


# --------------------------------------------------------------------------
# Kernel
# --------------------------------------------------------------------------
def _vae_kernel(*refs, n_layers, latent_dim, layer_widths, out_width):
    # refs = (x, W_conv, W_0 .. W_{n-1}, packed_biases, eps, out)
    x_ref = refs[0]
    wconv_ref = refs[1]
    w_refs = refs[2:2 + n_layers]
    p_ref = refs[2 + n_layers]
    eps_ref = refs[3 + n_layers]
    out_ref = refs[4 + n_layers]

    p = p_ref[...]                                                 # (n_layers, PCOL)

    # Conv1d(out=1, k=8) as a single MXU matmul against the Toeplitz-expanded
    # kernel.  Columns >= 393 of W_conv are all-zero, so conv lanes >= 393 are
    # exactly zero; the matching rows of W_0 are zero-padded, so they add
    # nothing downstream.  The conv bias is folded into layer 0's bias.
    h = jnp.dot(x_ref[...], wconv_ref[...],
                preferred_element_type=jnp.float32)                # (B_tile, 512)

    # Encoder MLP: (Linear -> ReLU)* -> Linear -> Tanh, all MXU f32-accumulate.
    for i in range(n_layers):
        h = jnp.dot(h, w_refs[i][...], preferred_element_type=jnp.float32)
        h = h + p[i:i + 1, :layer_widths[i]]
        h = jnp.maximum(h, 0.0) if i < n_layers - 1 else jnp.tanh(h)

    mu = h[:, :latent_dim]
    std = jnp.exp(h[:, latent_dim:2 * latent_dim])
    z = mu + eps_ref[...] * std                                    # reparameterize

    # Single lane-dense output slab: [ z | mu | std | zero padding ].
    parts = [z, mu, std]
    if out_width > 3 * latent_dim:
        parts.append(jnp.zeros((z.shape[0], out_width - 3 * latent_dim),
                               jnp.float32))
    out_ref[...] = jnp.concatenate(parts, axis=-1)


# --------------------------------------------------------------------------
# One-time parameter preparation (host side)
# --------------------------------------------------------------------------
def prepare_params(wc, bc, layer_ws, layer_bs):
    """wc: (C, 8) conv weight, bc: scalar conv bias.
    layer_ws[i]: (in_i, out_i) Linear weights stored (in, out); in_0 == 393.
    layer_bs[i]: (out_i,) biases."""
    wc_np = np.asarray(wc, np.float32)
    C = wc_np.shape[0]
    layer_ws = [np.asarray(w, np.float32) for w in layer_ws]
    layer_bs = [np.asarray(b, np.float32) for b in layer_bs]
    assert layer_ws[0].shape[0] == CONV_OUT

    # Toeplitz expansion of the conv kernel: conv512 = x.reshape(B, T*C) @ W_conv
    #   W_conv[t*C + c, l] = wc[c, t - l]  for 0 <= t - l < 8 and l < 393, else 0.
    w3 = np.zeros((SEQ_LEN, C, CONV_PAD), np.float32)
    ls = np.arange(CONV_OUT)
    for k in range(KERNEL_SIZE):
        for c in range(C):
            w3[ls + k, c, ls] = wc_np[c, k]
    wconv = w3.reshape(SEQ_LEN * C, CONV_PAD)

    # Zero-pad layer 0's K dim 393 -> 512; fold the conv bias into its bias
    # (conv bias adds a constant to every valid conv lane, so its contribution
    #  to pre-activation h0 is exactly bc * sum(w0[:393], axis=0)).
    w0p = np.zeros((CONV_PAD, layer_ws[0].shape[1]), np.float32)
    w0p[:CONV_OUT, :] = layer_ws[0]
    b0_eff = (layer_bs[0].astype(np.float64)
              + float(bc) * layer_ws[0].astype(np.float64).sum(0)).astype(np.float32)

    # Pack the tiny per-layer biases into one padded VMEM buffer.
    widths = [w.shape[1] for w in layer_ws]
    pcol = _round_up(max(widths), 128)
    pvec = np.zeros((len(layer_ws), pcol), np.float32)
    pvec[0, :widths[0]] = b0_eff
    for i in range(1, len(layer_ws)):
        pvec[i, :widths[i]] = layer_bs[i]

    weights = tuple([jnp.asarray(w0p)] + [jnp.asarray(w) for w in layer_ws[1:]])
    return jnp.asarray(wconv), weights, jnp.asarray(pvec)


# --------------------------------------------------------------------------
# Wrapper
# --------------------------------------------------------------------------
def vae_forward(obs_act_history, prepared, eps, *, b_tile=128):
    """obs_act_history: (B, 400, C) or (400, C); eps: (B, latent) or (latent,)."""
    wconv, weights, pvec = prepared
    n_layers = len(weights)
    latent_dim = int(weights[-1].shape[1]) // 2
    layer_widths = tuple(int(w.shape[1]) for w in weights)

    x = jnp.asarray(obs_act_history, jnp.float32)
    eps = jnp.asarray(eps, jnp.float32)
    squeeze = x.ndim == 2
    if squeeze:
        x = x[None]
        eps = eps[None]
    B, T, C = x.shape
    assert T == SEQ_LEN and wconv.shape[0] == SEQ_LEN * C

    # Free reshape (row-major merge of trailing dims) -- no transpose anywhere.
    x2 = x.reshape(B, SEQ_LEN * C)
    eps = eps.reshape(B, latent_dim)

    bt = _round_up(min(b_tile, _round_up(B, 8)), 8)
    b_pad = _round_up(B, bt)
    if b_pad != B:
        x2 = jnp.pad(x2, ((0, b_pad - B), (0, 0)))
        eps = jnp.pad(eps, ((0, b_pad - B), (0, 0)))

    out_w = _round_up(3 * latent_dim, 128)
    grid = (b_pad // bt,)

    kernel = functools.partial(_vae_kernel, n_layers=n_layers,
                               latent_dim=latent_dim,
                               layer_widths=layer_widths, out_width=out_w)

    in_specs = [
        pl.BlockSpec((bt, SEQ_LEN * C), lambda i: (i, 0)),        # x tile
        pl.BlockSpec(wconv.shape, lambda i: (0, 0)),              # W_conv (resident)
    ]
    in_specs += [pl.BlockSpec(w.shape, lambda i: (0, 0))          # MLP weights
                 for w in weights]
    in_specs += [
        pl.BlockSpec(pvec.shape, lambda i: (0, 0)),               # packed biases
        pl.BlockSpec((bt, latent_dim), lambda i: (i, 0)),         # eps tile
    ]

    out = pl.pallas_call(
        kernel,
        grid=grid,
        in_specs=in_specs,
        out_specs=pl.BlockSpec((bt, out_w), lambda i: (i, 0)),
        out_shape=jax.ShapeDtypeStruct((b_pad, out_w), jnp.float32),
        compiler_params=pltpu.CompilerParams(
            dimension_semantics=("parallel",)),                   # shard B across TCs (v7x)
    )(x2, wconv, *weights, pvec, eps)

    z = out[:B, 0:latent_dim]
    mu = out[:B, latent_dim:2 * latent_dim]
    std = out[:B, 2 * latent_dim:3 * latent_dim]
    if squeeze:
        z, mu, std = z[0], mu[0], std[0]
    return z, mu, std


# --------------------------------------------------------------------------
# Pure-JAX reference (faithful to the PyTorch module, independent of the
# Toeplitz / bias-folding tricks used inside the kernel)
# --------------------------------------------------------------------------
def _vae_reference(obs_act_batch, wc, bc, layer_ws, layer_bs, eps):
    latent_dim = layer_ws[-1].shape[1] // 2
    x = jnp.transpose(jnp.asarray(obs_act_batch, jnp.float32), (0, 2, 1))  # (B,C,T)
    conv = sum(jnp.einsum('c,bcl->bl', wc[:, k], x[:, :, k:k + CONV_OUT])
               for k in range(KERNEL_SIZE)) + bc                           # (B, 393)
    h = conv
    n = len(layer_ws)
    for i, (w, b) in enumerate(zip(layer_ws, layer_bs)):
        h = h @ w + b
        h = jnp.maximum(h, 0.0) if i < n - 1 else jnp.tanh(h)
    mu, log_std = h[:, :latent_dim], h[:, latent_dim:]
    std = jnp.exp(log_std)
    return mu + eps * std, mu, std


if __name__ == "__main__":
    obs_act_dim = 4
    hidden_sizes = (32,)
    latent_dim = 8
    batch = 16                       # small demo batch; kernel scales to B >= 128

    key = jax.random.PRNGKey(0)
    keys = jax.random.split(key, 10)

    # Deterministic synthetic parameters (shapes follow the module's __init__):
    #   Conv1d weight (out=1, in=C, k=8) stored as (C, 8); Linear weights stored
    #   pre-transposed as (in, out); biases as vectors.
    wc = 0.10 * jax.random.normal(keys[0], (obs_act_dim, KERNEL_SIZE), jnp.float32)
    bc = 0.10 * float(jax.random.normal(keys[1], (), jnp.float32))

    sizes = [CONV_OUT] + list(hidden_sizes) + [2 * latent_dim]
    layer_ws, layer_bs = [], []
    for j in range(len(sizes) - 1):
        layer_ws.append(0.05 * jax.random.normal(keys[2 + 2 * j],
                                                 (sizes[j], sizes[j + 1]), jnp.float32))
        layer_bs.append(0.05 * jax.random.normal(keys[3 + 2 * j],
                                                 (sizes[j + 1],), jnp.float32))

    prepared = prepare_params(wc, bc, layer_ws, layer_bs)

    # Batched input: (B, T=400, C) -- the module's natural (T, C) layout stacked.
    obs_act_history = jax.random.normal(keys[8], (batch, SEQ_LEN, obs_act_dim),
                                        jnp.float32)
    # torch.randn_like(std) equivalent, generated deterministically outside the kernel.
    eps = jax.random.normal(keys[9], (batch, latent_dim), jnp.float32)

    # b_tile=8 -> grid of 2 batch tiles, exercising the resident-weight BlockSpecs.
    z, mu, std = vae_forward(obs_act_history, prepared, eps, b_tile=8)
    jax.block_until_ready((z, mu, std))

    z_ref, mu_ref, std_ref = _vae_reference(obs_act_history, wc, bc,
                                            layer_ws, layer_bs, eps)
    assert jnp.allclose(mu, mu_ref, atol=5e-5), "mu mismatch"
    assert jnp.allclose(std, std_ref, atol=5e-5), "std mismatch"
    assert jnp.allclose(z, z_ref, atol=5e-5), "z mismatch"

    # Single-history call, matching the module's batch-of-1 forward() exactly.
    z1, mu1, std1 = vae_forward(obs_act_history[0], prepared, eps[0])
    jax.block_until_ready((z1, mu1, std1))
    assert jnp.allclose(z1, z_ref[0], atol=5e-5), "single-sample z mismatch"

    print("KERNEL_OK")
</pallas_src>

<mosaic_0001>
module attributes {stable_mosaic.version = 11 : i64} {
  func.func @_vae_kernel(%arg0: i32, %arg1: memref<8x1600xf32, #tpu.memory_space<vmem>>, %arg2: memref<1600x512xf32, #tpu.memory_space<vmem>>, %arg3: memref<512x32xf32, #tpu.memory_space<vmem>>, %arg4: memref<32x16xf32, #tpu.memory_space<vmem>>, %arg5: memref<2x128xf32, #tpu.memory_space<vmem>>, %arg6: memref<8x8xf32, #tpu.memory_space<vmem>>, %arg7: memref<8x128xf32, #tpu.memory_space<vmem>>) attributes {dimension_semantics = [#tpu.dimension_semantics<parallel>], iteration_bounds = array<i64: 2>, scalar_prefetch = 0 : i64, scratch_operands = 0 : i64, tpu.core_type = #tpu.core_type<tc>, window_params = [{transform_indices = @transform_0, window_bounds = array<i64: 8, 1600>}, {pipeline_mode = #tpu.pipeline_mode<synchronous>, transform_indices = @transform_1, window_bounds = array<i64: 1600, 512>}, {pipeline_mode = #tpu.pipeline_mode<synchronous>, transform_indices = @transform_2, window_bounds = array<i64: 512, 32>}, {pipeline_mode = #tpu.pipeline_mode<synchronous>, transform_indices = @transform_3, window_bounds = array<i64: 32, 16>}, {pipeline_mode = #tpu.pipeline_mode<synchronous>, transform_indices = @transform_4, window_bounds = array<i64: 2, 128>}, {transform_indices = @transform_5, window_bounds = array<i64: 8, 8>}, {transform_indices = @transform_6, window_bounds = array<i64: 8, 128>}]} {
    %c0 = arith.constant 0 : index
    %c0_0 = arith.constant 0 : index
    %0 = vector.load %arg5[%c0, %c0_0] : memref<2x128xf32, #tpu.memory_space<vmem>>, vector<2x128xf32>
    %c0_1 = arith.constant 0 : index
    %c0_2 = arith.constant 0 : index
    %1 = vector.load %arg1[%c0_1, %c0_2] : memref<8x1600xf32, #tpu.memory_space<vmem>>, vector<8x1600xf32>
    %c0_3 = arith.constant 0 : index
    %c0_4 = arith.constant 0 : index
    %2 = vector.load %arg2[%c0_3, %c0_4] : memref<1600x512xf32, #tpu.memory_space<vmem>>, vector<1600x512xf32>
    %cst = arith.constant dense<0.000000e+00> : vector<8x512xf32>
    %3 = tpu.matmul %1, %2, %cst {dimension_numbers = #tpu.dot_dimension_numbers<[1], [0], [0], [1], [0, 0, 1, 1], [], []>} : vector<8x1600xf32>, vector<1600x512xf32>, vector<8x512xf32> -> vector<8x512xf32>
    %c0_5 = arith.constant 0 : index
    %c0_6 = arith.constant 0 : index
    %4 = vector.load %arg3[%c0_5, %c0_6] : memref<512x32xf32, #tpu.memory_space<vmem>>, vector<512x32xf32>
    %cst_7 = arith.constant dense<0.000000e+00> : vector<8x32xf32>
    %5 = tpu.matmul %3, %4, %cst_7 {dimension_numbers = #tpu.dot_dimension_numbers<[1], [0], [0], [1], [0, 0, 1, 1], [], []>} : vector<8x512xf32>, vector<512x32xf32>, vector<8x32xf32> -> vector<8x32xf32>
    %6 = vector.extract_strided_slice %0 {offsets = [0, 0], sizes = [1, 32], strides = [1, 1]} : vector<2x128xf32> to vector<1x32xf32>
    %7 = vector.broadcast %6 : vector<1x32xf32> to vector<8x32xf32>
    %8 = arith.addf %5, %7 : vector<8x32xf32>
    %cst_8 = arith.constant 0.000000e+00 : f32
    %9 = vector.broadcast %cst_8 : f32 to vector<8x32xf32>
    %10 = arith.maximumf %8, %9 : vector<8x32xf32>
    %c0_9 = arith.constant 0 : index
    %c0_10 = arith.constant 0 : index
    %11 = vector.load %arg4[%c0_9, %c0_10] : memref<32x16xf32, #tpu.memory_space<vmem>>, vector<32x16xf32>
    %cst_11 = arith.constant dense<0.000000e+00> : vector<8x16xf32>
    %12 = tpu.matmul %10, %11, %cst_11 {dimension_numbers = #tpu.dot_dimension_numbers<[1], [0], [0], [1], [0, 0, 1, 1], [], []>} : vector<8x32xf32>, vector<32x16xf32>, vector<8x16xf32> -> vector<8x16xf32>
    %13 = vector.extract_strided_slice %0 {offsets = [1, 0], sizes = [1, 16], strides = [1, 1]} : vector<2x128xf32> to vector<1x16xf32>
    %14 = vector.broadcast %13 : vector<1x16xf32> to vector<8x16xf32>
    %15 = arith.addf %12, %14 : vector<8x16xf32>
    %16 = math.tanh %15 : vector<8x16xf32>
    %17 = vector.extract_strided_slice %16 {offsets = [0, 0], sizes = [8, 8], strides = [1, 1]} : vector<8x16xf32> to vector<8x8xf32>
    %18 = vector.extract_strided_slice %16 {offsets = [0, 8], sizes = [8, 8], strides = [1, 1]} : vector<8x16xf32> to vector<8x8xf32>
    %19 = math.exp %18 : vector<8x8xf32>
    %c0_12 = arith.constant 0 : index
    %c0_13 = arith.constant 0 : index
    %20 = vector.load %arg6[%c0_12, %c0_13] : memref<8x8xf32, #tpu.memory_space<vmem>>, vector<8x8xf32>
    %21 = arith.mulf %20, %19 : vector<8x8xf32>
    %22 = arith.addf %17, %21 : vector<8x8xf32>
    %cst_14 = arith.constant 0.000000e+00 : f32
    %23 = vector.broadcast %cst_14 : f32 to vector<8x104xf32>
    %24 = tpu.concatenate %22, %17, %19, %23 in 1 : vector<8x8xf32>, vector<8x8xf32>, vector<8x8xf32>, vector<8x104xf32> -> vector<8x128xf32>
    %c0_15 = arith.constant 0 : index
    %c0_16 = arith.constant 0 : index
    %25 = vector.load %arg7[%c0_15, %c0_16] : memref<8x128xf32, #tpu.memory_space<vmem>>, vector<8x128xf32>
    tpu.vector_store %arg7[%c0_15, %c0_16], %24 {strides = array<i32>} : memref<8x128xf32, #tpu.memory_space<vmem>>, vector<8x128xf32>,
    return
  }
  func.func @transform_0(%arg0: i32) -> (i32, i32) {
    %c0_i32 = arith.constant 0 : i32
    %c0_i32_0 = arith.constant 0 : i32
    return %arg0, %c0_i32 : i32, i32
  }
  func.func @transform_1(%arg0: i32) -> (i32, i32) {
    %c0_i32 = arith.constant 0 : i32
    %c0_i32_0 = arith.constant 0 : i32
    %c0_i32_1 = arith.constant 0 : i32
    return %c0_i32, %c0_i32_0 : i32, i32
  }
  func.func @transform_2(%arg0: i32) -> (i32, i32) {
    %c0_i32 = arith.constant 0 : i32
    %c0_i32_0 = arith.constant 0 : i32
    %c0_i32_1 = arith.constant 0 : i32
    return %c0_i32, %c0_i32_0 : i32, i32
  }
  func.func @transform_3(%arg0: i32) -> (i32, i32) {
    %c0_i32 = arith.constant 0 : i32
    %c0_i32_0 = arith.constant 0 : i32
    %c0_i32_1 = arith.constant 0 : i32
    return %c0_i32, %c0_i32_0 : i32, i32
  }
  func.func @transform_4(%arg0: i32) -> (i32, i32) {
    %c0_i32 = arith.constant 0 : i32
    %c0_i32_0 = arith.constant 0 : i32
    %c0_i32_1 = arith.constant 0 : i32
    return %c0_i32, %c0_i32_0 : i32, i32
  }
  func.func @transform_5(%arg0: i32) -> (i32, i32) {
    %c0_i32 = arith.constant 0 : i32
    %c0_i32_0 = arith.constant 0 : i32
    return %arg0, %c0_i32 : i32, i32
  }
  func.func @transform_6(%arg0: i32) -> (i32, i32) {
    %c0_i32 = arith.constant 0 : i32
    %c0_i32_0 = arith.constant 0 : i32
    return %arg0, %c0_i32 : i32, i32
  }
}

</mosaic_0001>

<bundles_post_ra>
// kernel: tpu_custom_call.1
= control target key start
LH: loop header
LB: loop body
LE: loop exit
PB: predicated region body
PF: predicated region fallthrough
CT: control target
= control target key end

     0   :  { %11 = vsyncpa [#allocation3], 0  ;;  %s4296_s0 = inlined_call_operand.hbm [shape: f32[16,1600], index: 0, kind: input, shape index: {}]   ;;  %s4297_s1 = inlined_call_operand.hbm [shape: f32[1600,512], index: 1, kind: input, shape index: {}]   ;;  %s4298_s2 = inlined_call_operand.vmem [shape: f32[512,32], index: 2, kind: input, shape index: {}]   ;;  %s4299_s3 = inlined_call_operand.vmem [shape: f32[32,16], index: 3, kind: input, shape index: {}]   ;;  %s4300_s4 = inlined_call_operand.hbm [shape: f32[2,128], index: 4, kind: input, shape index: {}]   ;;  %s4301_s5 = inlined_call_operand.vmem [shape: f32[16,8], index: 5, kind: input, shape index: {}]   ;;  %s4302_s6 = inlined_call_operand.hbm [shape: f32[16,128], index: 6, kind: output, shape index: {}]  }
   0x1   :  { %13 = vsyncpa [#allocation3 + $0x1], 0 }
   0x2   :  { %14 = vsyncpa [#allocation6], 0 }
   0x3   :  { %15 = vsyncpa [#allocation4], 0 }
   0x4   :  { %17 = vsyncpa [#allocation4 + $0x1], 0  ;;  %s3837_s21 = smov 0   ;;  %s3839_s22 = smov 0  }
   0x5   :  { %s3841_s23 = smov 0   ;;  %s3843_s24 = smov 0  }
   0x6 LB: > { %s3858_s25 = sadd.s32 4294967295, %s3789_s24   ;;  %s2554_s26 = sadd.s32 4294967294, %s3789_s24   ;;  %s3789_s24 = sphi %s3843_s24, %s4322_s24   ;;  %s3785_s23 = sphi %s3841_s23, %s4321_s23   ;;  %s3781_s22 = sphi %s3839_s22, %s4320_s22   ;;  %s3777_s21 = sphi %s3837_s21, %s4319_s21  }
   0x7   : > { %p43_p0 = scmp.ne.s32.totalorder %s3781_s22, %s3777_s21  ;;  %p4303_p1 = scmp.eq.s32.totalorder %s3858_s25, 0 }
   0x8   : > { %p183_p3 = scmp.eq.s32.totalorder %s2554_s26, 1  ;;  %p2555_p5 = scmp.ge.s32.totalorder %s3789_s24, 1 }
   0x9   : > { %p3867_p4 = por %p4303_p1, %p43_p0  ;;  %p190_p7 = scmp.lt.s32.totalorder %s3789_s24, 3 }
   0xa   : > { %p3872_p6 = por %p183_p3, %p43_p0  ;;  %s3791_s30 = smov [#allocation5]  }
   0xb   : > { %s4306_s27 = scalar_select %p3867_p4, 1, 0 }
   0xc   : > { %s4307_s28 = scalar_select %p3872_p6, 1, 0 }
   0xd   : > { %p3877_p8 = pnand %p2555_p5, %p190_p7  ;;  %s202_s7 = sshll.u32 %s3791_s30, 4  ;;  %s3881_s7 = int_to_ptr.vmem [resolvable:$true] %s202_s7 }
   0xe   : > { %s3792_s9 = smov [#allocation7]   ;;  %s3633_s13 = scalar_lea.hbm %s4297_s1, 102400 }
   0xf   : > { %p3567_p9 = pneg %p3877_p8  ;;  %s222_s10 = sshll.u32 %s3792_s9, 4  ;;  %s3892_s10 = int_to_ptr.vmem [resolvable:$true] %s222_s10 }
  0x10   : > { %p3634_p12 = scmp.ne.s32.totalorder %s4297_s1, %s3633_s13  ;;  %p3640_p5 = scmp.lt.u32.totalorder %s3633_s13, %s4297_s1 }
  0x11   : > { %p3888_p11 = pnand %p3567_p9, %p4303_p1 }
  0x13   : > { %p3635_p13 = pneg %p3888_p11 }
  0x15   : > { %p3636_p0 = pnand %p3635_p13, %p3634_p12 }
  0x17   : > { %p3637_p3 = pneg %p3636_p0 }
  0x19   : > { %p3642_p7 = pnand %p3640_p5, %p3637_p3 }
  0x1b   : > { %3645 = shalt.err (!%p3642_p7)
}
  0x1c   : > { %s3646_s18 = scalar_lea.vmem %s3881_s7, 102400  ;;  %p3654_p2 = scmp.lt.s32.totalorder %s3881_s7, %s3881_s7 }
  0x1d   : > { %p3647_p9 = scmp.ne.s32.totalorder %s3881_s7, %s3646_s18  ;;  %p3655_p12 = scmp.lt.s32.totalorder %s3646_s18, %s3646_s18 }
  0x1f   : > { %p3649_p10 = pnand %p3647_p9, %p3635_p13  ;;  %p3656_p0 = por %p3655_p12, %p3654_p2 }
  0x21   : > { %p3650_p1 = pneg %p3649_p10 }
  0x23   : > { %p3657_p6 = pnand %p3656_p0, %p3650_p1 }
  0x25   : > { %3660 = shalt.err (!%p3657_p6)
}
  0x26   : > { %s3793_s19 = smov 512   ;;  %s3794_s20 = smov 32  }
  0x27   : > { %3570 = dma.hbm_to_vmem [thread:$0]  (!%p3888_p11), %s4297_s1, 102400, %s3881_s7, [#allocation6], %s3793_s19, %s3793_s19, %s3794_s20  }
  0x28   : > { %s3661_s12 = scalar_lea.hbm %s4300_s4, 32 }
  0x29   : > { %p3662_p2 = scmp.ne.s32.totalorder %s4300_s4, %s3661_s12  ;;  %p3668_p10 = scmp.lt.u32.totalorder %s3661_s12, %s4300_s4 }
  0x2b   : > { %p3664_p1 = pnand %p3662_p2, %p3635_p13 }
  0x2d   : > { %p3665_p6 = pneg %p3664_p1 }
  0x2f   : > { %p3670_p3 = pnand %p3668_p10, %p3665_p6 }
  0x31   : > { %3673 = shalt.err (!%p3670_p3)
}
  0x32   : > { %s3674_s7 = scalar_lea.vmem %s3892_s10, 32  ;;  %p3682_p12 = scmp.lt.s32.totalorder %s3892_s10, %s3892_s10 }
  0x33   : > { %p3675_p5 = scmp.ne.s32.totalorder %s3892_s10, %s3674_s7  ;;  %p3683_p0 = scmp.lt.s32.totalorder %s3674_s7, %s3674_s7 }
  0x35   : > { %p3677_p7 = pnand %p3675_p5, %p3635_p13  ;;  %p3684_p2 = por %p3683_p0, %p3682_p12 }
  0x37   : > { %p3678_p9 = pneg %p3677_p7 }
  0x39   : > { %p3685_p1 = pnand %p3684_p2, %p3678_p9 }
  0x3b   : > { %3688 = shalt.err (!%p3685_p1)
}
  0x3c   : > { %3573 = dma.hbm_to_vmem [thread:$0]  (!%p3888_p11), %s4300_s4, 32, %s3892_s10, [#allocation6]  }
  0x3d   : > { %s3947_s19 = sadd.s32 1, %s3789_s24   ;;  %s30_s8 = sadd.s32 1, %s3785_s23 }
  0x3e   : > { %s27_s20 = ssub.s32 %s3789_s24, %s3947_s19  ;;  %p37_p13 = scmp.ne.s32.totalorder %s3785_s23, %s3781_s22 }
  0x3f   : > { %p28_p6 = scmp.eq.s32.totalorder %s27_s20, 0  ;;  %p38_p10 = scmp.eq.s32.totalorder %s3789_s24, 0 }
  0x40   : > { %p4310_p3 = scmp.eq.s32.totalorder %s3858_s25, 1  ;;  %p3584_p7 = scmp.lt.s32.totalorder %s3789_s24, 2 }
  0x41   : > { %s3963_s30 = scalar_select %p28_p6, %s3785_s23, %s30_s8  }
  0x42   : > { %p3957_p5 = por %p4310_p3, %p37_p13  ;;  %p39_p9 = por %p38_p10, %p37_p13 }
  0x43   : > { %s233_s9 = sand.u32 1, %s3785_s23   ;;  %s3553_s10 = smul.u32 1664, %s3789_s24 }
  0x44   : > { %s4311_s26 = scalar_select %p3957_p5, 1, 0 }
  0x45   : > { %s3552_s11 = smul.u32 104, %s233_s9  ;;  %p3967_p11 = pnand %p3584_p7, %p39_p9 }
  0x46   : > { %s3974_s15 = scalar_lea.hbm %s4296_s0, %s3553_s10  ;;  %s234_s17 = scalar_lea.sflag [#allocation3], %s233_s9 }
  0x47   : > { %s237_s16 = scalar_lea.vmem [#allocation2], %s3552_s11  ;;  %s3689_s18 = scalar_lea.hbm %s3974_s15, 1664 }
  0x48   : > { %s245_s7 = sshll.u32 %s237_s16, 4  ;;  %p3690_p12 = scmp.ne.s32.totalorder %s3974_s15, %s3689_s18  ;;  %s3976_s7 = int_to_ptr.vmem [resolvable:$true] %s245_s7 }
  0x49   : > { %p3691_p0 = pneg %p3967_p11  ;;  %s3694_s10 = scalar_lea.hbm %s4296_s0, 3328 }
  0x4a   : > { %p3695_p13 = scmp.lt.u32.totalorder %s3974_s15, %s4296_s0  ;;  %p3696_p6 = scmp.lt.u32.totalorder %s3694_s10, %s3689_s18 }
  0x4b   : > { %p3692_p2 = pnand %p3691_p0, %p3690_p12  ;;  %p3698_p3 = scmp.lt.u32.totalorder %s3689_s18, %s3974_s15 }
  0x4c   : > { %p3697_p10 = por %p3696_p6, %p3695_p13 }
  0x4d   : > { %p3693_p1 = pneg %p3692_p2 }
  0x4e   : > { %p3699_p7 = por %p3698_p3, %p3697_p10 }
  0x50   : > { %p3700_p9 = pnand %p3699_p7, %p3693_p1 }
  0x52   : > { %3703 = shalt.err (!%p3700_p9)
}
  0x53   : > { %s3704_s9 = scalar_lea.vmem %s3976_s7, 1664  ;;  %s3795_s11 = smov [#allocation2]  }
  0x54   : > { %p3705_p12 = scmp.ne.s32.totalorder %s3976_s7, %s3704_s9  ;;  %s3709_s16 = sshll.u32 %s3795_s11, 4  ;;  %s3710_s16 = int_to_ptr.vmem [resolvable:$false] %s3709_s16 }
  0x55   : > { %s3711_s8 = scalar_lea.vmem %s3710_s16, 3328  ;;  %p3712_p4 = scmp.lt.s32.totalorder %s3976_s7, %s3710_s16 }
  0x56   : > { %p3707_p2 = pnand %p3705_p12, %p3691_p0  ;;  %p3713_p13 = scmp.lt.s32.totalorder %s3711_s8, %s3704_s9 }
  0x58   : > { %p3708_p5 = pneg %p3707_p2  ;;  %p3714_p6 = por %p3713_p13, %p3712_p4 }
  0x5a   : > { %p3715_p10 = pnand %p3714_p6, %p3708_p5 }
  0x5c   : > { %3718 = shalt.err (!%p3715_p10)
}
  0x5d   : > { %3577 = dma.hbm_to_vmem [thread:$0]  (!%p3967_p11), %s3974_s15, 1664, %s3976_s7, %s234_s17  }
  0x5e   : > { %261 = sbr.rel (%p3877_p8) target bundleno = 1318 (0x526), region = 44  ;;  %s4006_s18 = sand.u32 (!%p3877_p8), 1, %s3781_s22  }
  0x5f   : > { %s3554_s20 = smul.u32 (!%p3877_p8), 104, %s4006_s18  ;;  %s264_s10 = scalar_lea.sflag (!%p3877_p8), [#allocation3], %s4006_s18 }
  0x60   : > { %p4313_p4 = scmp.ne.s32.totalorder (!%p3877_p8), %s4306_s27, 0 }
  0x61   : > { %s4010_s13 = scalar_lea.vmem (!%p3877_p8), [#allocation2], %s3554_s20 }
  0x65   : > { %3764 = dma.done.wait (%p4313_p4), %s264_s10, 1664  }
  0x66   : > { %3766 = vsyncadd (%p4313_p4), %s264_s10, 4294965632  ;;  %p4314_p5 = scmp.eq.s32.totalorder %s3858_s25, 0 }
  0x68   : > { %3768 = dma.done.wait (%p4314_p5), [#allocation6], 102432   ;;  %p4315_p8 = pmov %p4314_p5 }
  0x69   : > { %v327_v0 = vld [vmem:[#allocation5 + $0x8] sm:$0xff]  ;;  %v329_v2 = vld [vmem:[#allocation5 + $0x18] sm:$0xff]  ;;  %v326_v5 = vld [vmem:[#allocation5] sm:$0xff]  ;;  %vm1126_vm0 = vcmask 523264   ;;  %vm3798_vm1 = vmmov 0   ;;  %vm2341_vm2 = vcmask 261120  }
  0x6a   : > { %3770 = vsyncadd (%p4315_p8), [#allocation6], 4294864864  ;;  %v331_v1 = vld [vmem:[#allocation5 + $0x28] sm:$0xff]  ;;  %v333_v4 = vld [vmem:[#allocation5 + $0x38] sm:$0xff]  ;;  %s3799_s20 = smov 8   ;;  %s3800_s10 = smov 120  }
  0x6b   : > { %v2658_v3 = vpack.c.bf16 %v331_v1, %v327_v0  ;;  %v330_v6 = vld [vmem:[#allocation5 + $0x20] sm:$0xff]  ;;  %v3058_v7 = vpack.c.bf16 %v333_v4, %v329_v2  ;;  %v328_v9 = vld [vmem:[#allocation5 + $0x10] sm:$0xff]  ;;  %v335_v11 = vld [vmem:[#allocation5 + $0x48] sm:$0xff]  ;;  %p308_p11 = scmp.lt.s32.totalorder %s3858_s25, 1  ;;  %s2563_s7 = sshll.u32 %s4006_s18, 3  ;;  %vm2432_vm3 = vcmask 64512  }
  0x6c   : > { %v2660_v8 = vpack.c.bf16 %v330_v6, %v326_v5  ;;  %v332_v10 = vld [vmem:[#allocation5 + $0x30] sm:$0xff]  ;;  %v339_v13 = vld [vmem:[#allocation5 + $0x68] sm:$0xff]  ;;  %v337_v14 = vld [vmem:[#allocation5 + $0x58] sm:$0xff]  ;;  %vm2434_vm4 = vcmask 130048   ;;  %s2569_s17 = sshll.u32 %s3858_s25, 7  ;;  %s307_s14 = scalar_lea.vmem [#allocation8], %s2563_s7 }
  0x6d   : > { %2659 = vmatprep.subr.bf16.mxu0 %v2658_v3  ;;  %v3060_v12 = vpack.c.bf16 %v332_v10, %v328_v9  ;;  %v341_v15 = vld [vmem:[#allocation5 + $0x78] sm:$0xff]  ;;  %3059 = vmatprep.subr.bf16.mxu1 %v3058_v7  ;;  %v2662_v16 = vpack.c.bf16 %v339_v13, %v335_v11  ;;  %v334_v18 = vld [vmem:[#allocation5 + $0x40] sm:$0xff]  ;;  %v336_v20 = vld [vmem:[#allocation5 + $0x50] sm:$0xff]  ;;  %s309_s27 = scalar_select %p308_p11, %s3858_s25, 1  ;;  %vm2436_vm5 = vcmask 195584  }
  0x6e   : > { %2661 = vmatpush1.bf16.msra.mxu0 %v2660_v8  ;;  %v3062_v17 = vpack.c.bf16 %v341_v15, %v337_v14  ;;  %v338_v19 = vld [vmem:[#allocation5 + $0x60] sm:$0xff]  ;;  %v340_v22 = vld [vmem:[#allocation5 + $0x70] sm:$0xff]  ;;  %v343_v23 = vld [vmem:[#allocation5 + $0x88] sm:$0xff]  ;;  %s2453_s9 = sshll.u32 %s307_s14, 4  ;;  %s4252_s8 = scalar_lea.hbm %s4302_s6, %s2569_s17  ;;  %s4254_s9 = int_to_ptr.vmem [resolvable:$true] %s2453_s9 }
  0x6f   : > { %3061 = vmatpush1.bf16.msra.mxu1 %v3060_v12  ;;  %v2664_v21 = vpack.c.bf16 %v338_v19, %v334_v18  ;;  %v347_v24 = vld [vmem:[#allocation5 + $0xa8] sm:$0xff]  ;;  %2663 = vmatprep.subr.bf16.mxu0 %v2662_v16  ;;  %v3064_v25 = vpack.c.bf16 %v340_v22, %v336_v20  ;;  %v345_v27 = vld [vmem:[#allocation5 + $0x98] sm:$0xff]  ;;  %v342_v29 = vld [vmem:[#allocation5 + $0x80] sm:$0xff]  ;;  %s2564_s29 = sshll.u32 %s309_s27, 3  ;;  %s2440_s25 = scalar_lea.sflag [#allocation4], %s4006_s18 }
  0x70   : > { %3063 = vmatprep.subr.bf16.mxu1 %v3062_v17  ;;  %v2666_v26 = vpack.c.bf16 %v347_v24, %v343_v23  ;;  %v349_v28 = vld [vmem:[#allocation5 + $0xb8] sm:$0xff]  ;;  %v346_v31 = vld [vmem:[#allocation5 + $0xa0] sm:$0xff]  ;;  %v344_v32 = vld [vmem:[#allocation5 + $0x90] sm:$0xff]  ;;  %p4316_p1 = scmp.ne.s32.totalorder %s4311_s26, 0 }
  0x71   : > { %v3066_v30 = vpack.c.bf16 %v349_v28, %v345_v27  ;;  %v348_v33 = vld [vmem:[#allocation5 + $0xb0] sm:$0xff]  ;;  %v2668_v34 = vpack.c.bf16 %v346_v31, %v342_v29  ;;  %v351_v35 = vld [vmem:[#allocation5 + $0xc8] sm:$0xff]  ;;  %v353_v37 = vld [vmem:[#allocation5 + $0xd8] sm:$0xff] }
  0x72   : > { %2665 = vmatpush1.bf16.msra.mxu0 %v2664_v21  ;;  %v355_v36 = vld [vmem:[#allocation5 + $0xe8] sm:$0xff]  ;;  %v3068_v38 = vpack.c.bf16 %v348_v33, %v344_v32  ;;  %v357_v40 = vld [vmem:[#allocation5 + $0xf8] sm:$0xff]  ;;  %v350_v41 = vld [vmem:[#allocation5 + $0xc0] sm:$0xff] }
  0x73   : > { %3065 = vmatpush1.bf16.msra.mxu1 %v3064_v25  ;;  %2667 = vmatprep.subr.bf16.mxu0 %v2666_v26  ;;  %v2670_v39 = vpack.c.bf16 %v355_v36, %v351_v35  ;;  %v354_v42 = vld [vmem:[#allocation5 + $0xe0] sm:$0xff]  ;;  %v3070_v43 = vpack.c.bf16 %v357_v40, %v353_v37  ;;  %v352_v44 = vld [vmem:[#allocation5 + $0xd0] sm:$0xff]  ;;  %v359_v46 = vld [vmem:[#allocation5 + $0x108] sm:$0xff] }
  0x74   : > { %3067 = vmatprep.subr.bf16.mxu1 %v3066_v30  ;;  %v356_v45 = vld [vmem:[#allocation5 + $0xf0] sm:$0xff]  ;;  %v363_v47 = vld [vmem:[#allocation5 + $0x128] sm:$0xff]  ;;  %v361_v48 = vld [vmem:[#allocation5 + $0x118] sm:$0xff]  ;;  %v2672_v50 = vpack.c.bf16 %v354_v42, %v350_v41 }
  0x75   : > { %v365_v49 = vld [vmem:[#allocation5 + $0x138] sm:$0xff]  ;;  %v3072_v51 = vpack.c.bf16 %v356_v45, %v352_v44  ;;  %v2674_v52 = vpack.c.bf16 %v363_v47, %v359_v46  ;;  %v358_v53 = vld [vmem:[#allocation5 + $0x100] sm:$0xff]  ;;  %v360_v55 = vld [vmem:[#allocation5 + $0x110] sm:$0xff] }
  0x76   : > { %2669 = vmatpush1.bf16.msra.mxu0 %v2668_v34  ;;  %v362_v54 = vld [vmem:[#allocation5 + $0x120] sm:$0xff]  ;;  %v3074_v56 = vpack.c.bf16 %v365_v49, %v361_v48  ;;  %v364_v57 = vld [vmem:[#allocation5 + $0x130] sm:$0xff]  ;;  %v367_v58 = vld [vmem:[#allocation5 + $0x148] sm:$0xff] }
  0x77   : > { %3069 = vmatpush1.bf16.msra.mxu1 %v3068_v38  ;;  %2671 = vmatprep.subr.bf16.mxu0 %v2670_v39  ;;  %v371_v59 = vld [vmem:[#allocation5 + $0x168] sm:$0xff]  ;;  %v369_v60 = vld [vmem:[#allocation5 + $0x158] sm:$0xff]  ;;  %v2676_v62 = vpack.c.bf16 %v362_v54, %v358_v53  ;;  %v3076_v63 = vpack.c.bf16 %v364_v57, %v360_v55  ;;  %v366_v1 = vld [vmem:[#allocation5 + $0x140] sm:$0xff] }
  0x78   : > { %3071 = vmatprep.subr.bf16.mxu1 %v3070_v43  ;;  %v373_v61 = vld [vmem:[#allocation5 + $0x178] sm:$0xff]  ;;  %v2678_v0 = vpack.c.bf16 %v371_v59, %v367_v58  ;;  %v370_v2 = vld [vmem:[#allocation5 + $0x160] sm:$0xff]  ;;  %v368_v3 = vld [vmem:[#allocation5 + $0x150] sm:$0xff] }
  0x79   : > { %v3078_v4 = vpack.c.bf16 %v373_v61, %v369_v60  ;;  %v372_v5 = vld [vmem:[#allocation5 + $0x170] sm:$0xff]  ;;  %v375_v6 = vld [vmem:[#allocation5 + $0x188] sm:$0xff]  ;;  %v377_v8 = vld [vmem:[#allocation5 + $0x198] sm:$0xff]  ;;  %v2680_v10 = vpack.c.bf16 %v370_v2, %v366_v1 }
  0x7a   : > { %2673 = vmatpush1.bf16.msra.mxu0 %v2672_v50  ;;  %v379_v7 = vld [vmem:[#allocation5 + $0x1a8] sm:$0xff]  ;;  %v381_v9 = vld [vmem:[#allocation5 + $0x1b8] sm:$0xff]  ;;  %v3080_v11 = vpack.c.bf16 %v372_v5, %v368_v3  ;;  %v374_v13 = vld [vmem:[#allocation5 + $0x180] sm:$0xff] }
  0x7b   : > { %3073 = vmatpush1.bf16.msra.mxu1 %v3072_v51  ;;  %2675 = vmatprep.subr.bf16.mxu0 %v2674_v52  ;;  %v2682_v12 = vpack.c.bf16 %v379_v7, %v375_v6  ;;  %v378_v14 = vld [vmem:[#allocation5 + $0x1a0] sm:$0xff]  ;;  %v376_v15 = vld [vmem:[#allocation5 + $0x190] sm:$0xff]  ;;  %v3082_v16 = vpack.c.bf16 %v381_v9, %v377_v8  ;;  %v383_v18 = vld [vmem:[#allocation5 + $0x1c8] sm:$0xff] }
  0x7c   : > { %3075 = vmatprep.subr.bf16.mxu1 %v3074_v56  ;;  %v380_v17 = vld [vmem:[#allocation5 + $0x1b0] sm:$0xff]  ;;  %v387_v19 = vld [vmem:[#allocation5 + $0x1e8] sm:$0xff]  ;;  %v385_v20 = vld [vmem:[#allocation5 + $0x1d8] sm:$0xff]  ;;  %v2684_v22 = vpack.c.bf16 %v378_v14, %v374_v13 }
  0x7d   : > { %v389_v21 = vld [vmem:[#allocation5 + $0x1f8] sm:$0xff]  ;;  %v3084_v23 = vpack.c.bf16 %v380_v17, %v376_v15  ;;  %v2686_v24 = vpack.c.bf16 %v387_v19, %v383_v18  ;;  %v382_v25 = vld [vmem:[#allocation5 + $0x1c0] sm:$0xff]  ;;  %v384_v27 = vld [vmem:[#allocation5 + $0x1d0] sm:$0xff] }
  0x7e   : > { %2677 = vmatpush1.bf16.msra.mxu0 %v2676_v62  ;;  %v386_v26 = vld [vmem:[#allocation5 + $0x1e0] sm:$0xff]  ;;  %v3086_v28 = vpack.c.bf16 %v389_v21, %v385_v20  ;;  %v388_v29 = vld [vmem:[#allocation5 + $0x1f0] sm:$0xff]  ;;  %v391_v30 = vld [vmem:[#allocation5 + $0x208] sm:$0xff] }
  0x7f   : > { %3077 = vmatpush1.bf16.msra.mxu1 %v3076_v63  ;;  %2679 = vmatprep.subr.bf16.mxu0 %v2678_v0  ;;  %v395_v31 = vld [vmem:[#allocation5 + $0x228] sm:$0xff]  ;;  %v393_v32 = vld [vmem:[#allocation5 + $0x218] sm:$0xff]  ;;  %v2688_v34 = vpack.c.bf16 %v386_v26, %v382_v25  ;;  %v3088_v35 = vpack.c.bf16 %v388_v29, %v384_v27  ;;  %v390_v37 = vld [vmem:[#allocation5 + $0x200] sm:$0xff] }
  0x80   : > { %3079 = vmatprep.subr.bf16.mxu1 %v3078_v4  ;;  %v397_v33 = vld [vmem:[#allocation5 + $0x238] sm:$0xff]  ;;  %v2690_v36 = vpack.c.bf16 %v395_v31, %v391_v30  ;;  %v394_v38 = vld [vmem:[#allocation5 + $0x220] sm:$0xff]  ;;  %v392_v39 = vld [vmem:[#allocation5 + $0x210] sm:$0xff] }
  0x81   : > { %v3090_v40 = vpack.c.bf16 %v397_v33, %v393_v32  ;;  %v396_v41 = vld [vmem:[#allocation5 + $0x230] sm:$0xff]  ;;  %v399_v42 = vld [vmem:[#allocation5 + $0x248] sm:$0xff]  ;;  %v401_v44 = vld [vmem:[#allocation5 + $0x258] sm:$0xff]  ;;  %v2692_v46 = vpack.c.bf16 %v394_v38, %v390_v37 }
  0x82   : > { %2681 = vmatpush1.bf16.msra.mxu0 %v2680_v10  ;;  %v403_v43 = vld [vmem:[#allocation5 + $0x268] sm:$0xff]  ;;  %v405_v45 = vld [vmem:[#allocation5 + $0x278] sm:$0xff]  ;;  %v3092_v47 = vpack.c.bf16 %v396_v41, %v392_v39  ;;  %v398_v49 = vld [vmem:[#allocation5 + $0x240] sm:$0xff] }
  0x83   : > { %3081 = vmatpush1.bf16.msra.mxu1 %v3080_v11  ;;  %2683 = vmatprep.subr.bf16.mxu0 %v2682_v12  ;;  %v2694_v48 = vpack.c.bf16 %v403_v43, %v399_v42  ;;  %v402_v50 = vld [vmem:[#allocation5 + $0x260] sm:$0xff]  ;;  %v400_v51 = vld [vmem:[#allocation5 + $0x250] sm:$0xff]  ;;  %v3094_v52 = vpack.c.bf16 %v405_v45, %v401_v44  ;;  %v407_v54 = vld [vmem:[#allocation5 + $0x288] sm:$0xff] }
  0x84   : > { %3083 = vmatprep.subr.bf16.mxu1 %v3082_v16  ;;  %v404_v53 = vld [vmem:[#allocation5 + $0x270] sm:$0xff]  ;;  %v411_v55 = vld [vmem:[#allocation5 + $0x2a8] sm:$0xff]  ;;  %v409_v56 = vld [vmem:[#allocation5 + $0x298] sm:$0xff]  ;;  %v2696_v58 = vpack.c.bf16 %v402_v50, %v398_v49 }
  0x85   : > { %v413_v57 = vld [vmem:[#allocation5 + $0x2b8] sm:$0xff]  ;;  %v3096_v59 = vpack.c.bf16 %v404_v53, %v400_v51  ;;  %v2698_v60 = vpack.c.bf16 %v411_v55, %v407_v54  ;;  %v406_v61 = vld [vmem:[#allocation5 + $0x280] sm:$0xff]  ;;  %v408_v63 = vld [vmem:[#allocation5 + $0x290] sm:$0xff] }
  0x86   : > { %2685 = vmatpush1.bf16.msra.mxu0 %v2684_v22  ;;  %v410_v62 = vld [vmem:[#allocation5 + $0x2a0] sm:$0xff]  ;;  %v3098_v0 = vpack.c.bf16 %v413_v57, %v409_v56  ;;  %v412_v1 = vld [vmem:[#allocation5 + $0x2b0] sm:$0xff]  ;;  %v415_v2 = vld [vmem:[#allocation5 + $0x2c8] sm:$0xff] }
  0x87   : > { %3085 = vmatpush1.bf16.msra.mxu1 %v3084_v23  ;;  %2687 = vmatprep.subr.bf16.mxu0 %v2686_v24  ;;  %v419_v3 = vld [vmem:[#allocation5 + $0x2e8] sm:$0xff]  ;;  %v417_v4 = vld [vmem:[#allocation5 + $0x2d8] sm:$0xff]  ;;  %v2700_v6 = vpack.c.bf16 %v410_v62, %v406_v61  ;;  %v414_v7 = vld [vmem:[#allocation5 + $0x2c0] sm:$0xff]  ;;  %v3100_v8 = vpack.c.bf16 %v412_v1, %v408_v63 }
  0x88   : > { %3087 = vmatprep.subr.bf16.mxu1 %v3086_v28  ;;  %v421_v5 = vld [vmem:[#allocation5 + $0x2f8] sm:$0xff]  ;;  %v2702_v9 = vpack.c.bf16 %v419_v3, %v415_v2  ;;  %v418_v10 = vld [vmem:[#allocation5 + $0x2e0] sm:$0xff]  ;;  %v416_v11 = vld [vmem:[#allocation5 + $0x2d0] sm:$0xff] }
  0x89   : > { %v420_v12 = vld [vmem:[#allocation5 + $0x2f0] sm:$0xff]  ;;  %v3102_v13 = vpack.c.bf16 %v421_v5, %v417_v4  ;;  %v423_v14 = vld [vmem:[#allocation5 + $0x308] sm:$0xff]  ;;  %v314_v16 = vld [vmem:[%s4010_s13 + $0x8] sm:$0xff]  ;;  %v2704_v19 = vpack.c.bf16 %v418_v10, %v414_v7 }
  0x8a   : > { %2689 = vmatpush1.bf16.msra.mxu0 %v2688_v34  ;;  %v427_v15 = vld [vmem:[#allocation5 + $0x328] sm:$0xff]  ;;  %v425_v17 = vld [vmem:[#allocation5 + $0x318] sm:$0xff]  ;;  %1194 = vmatprep.mubr.f32.mxu0 %v314_v16  ;;  %v3104_v20 = vpack.c.bf16 %v420_v12, %v416_v11  ;;  %v422_v22 = vld [vmem:[#allocation5 + $0x300] sm:$0xff] }
  0x8b   : > { %3089 = vmatpush1.bf16.msra.mxu1 %v3088_v35  ;;  %2691 = vmatprep.subr.bf16.mxu0 %v2690_v36  ;;  %v429_v18 = vld [vmem:[#allocation5 + $0x338] sm:$0xff]  ;;  %v2706_v21 = vpack.c.bf16 %v427_v15, %v423_v14  ;;  %v426_v23 = vld [vmem:[#allocation5 + $0x320] sm:$0xff]  ;;  %v424_v24 = vld [vmem:[#allocation5 + $0x310] sm:$0xff] }
  0x8c   : > { %3091 = vmatprep.subr.bf16.mxu1 %v3090_v40  ;;  %1691 = vmatprep.mubr.f32.mxu1 %v314_v16  ;;  %v3106_v25 = vpack.c.bf16 %v429_v18, %v425_v17  ;;  %v428_v26 = vld [vmem:[#allocation5 + $0x330] sm:$0xff]  ;;  %v431_v27 = vld [vmem:[#allocation5 + $0x348] sm:$0xff]  ;;  %v433_v29 = vld [vmem:[#allocation5 + $0x358] sm:$0xff]  ;;  %v2708_v31 = vpack.c.bf16 %v426_v23, %v422_v22 }
  0x8d   : > { %v435_v28 = vld [vmem:[#allocation5 + $0x368] sm:$0xff]  ;;  %v437_v30 = vld [vmem:[#allocation5 + $0x378] sm:$0xff]  ;;  %v3108_v32 = vpack.c.bf16 %v428_v26, %v424_v24  ;;  %v430_v34 = vld [vmem:[#allocation5 + $0x340] sm:$0xff] }
  0x8e   : > { %2693 = vmatpush1.bf16.msra.mxu0 %v2692_v46  ;;  %v2710_v33 = vpack.c.bf16 %v435_v28, %v431_v27  ;;  %v434_v35 = vld [vmem:[#allocation5 + $0x360] sm:$0xff]  ;;  %v432_v36 = vld [vmem:[#allocation5 + $0x350] sm:$0xff]  ;;  %v3110_v37 = vpack.c.bf16 %v437_v30, %v433_v29  ;;  %v439_v39 = vld [vmem:[#allocation5 + $0x388] sm:$0xff] }
  0x8f   : > { %3093 = vmatpush1.bf16.msra.mxu1 %v3092_v47  ;;  %2695 = vmatprep.subr.bf16.mxu0 %v2694_v48  ;;  %v436_v38 = vld [vmem:[#allocation5 + $0x370] sm:$0xff]  ;;  %v443_v40 = vld [vmem:[#allocation5 + $0x3a8] sm:$0xff]  ;;  %v441_v41 = vld [vmem:[#allocation5 + $0x398] sm:$0xff]  ;;  %v2712_v43 = vpack.c.bf16 %v434_v35, %v430_v34 }
  0x90   : > { %3095 = vmatprep.subr.bf16.mxu1 %v3094_v52  ;;  %v445_v42 = vld [vmem:[#allocation5 + $0x3b8] sm:$0xff]  ;;  %v3112_v44 = vpack.c.bf16 %v436_v38, %v432_v36  ;;  %v2714_v45 = vpack.c.bf16 %v443_v40, %v439_v39  ;;  %v438_v46 = vld [vmem:[#allocation5 + $0x380] sm:$0xff]  ;;  %v440_v48 = vld [vmem:[#allocation5 + $0x390] sm:$0xff] }
  0x91   : > { %v442_v47 = vld [vmem:[#allocation5 + $0x3a0] sm:$0xff]  ;;  %v3114_v49 = vpack.c.bf16 %v445_v42, %v441_v41  ;;  %v444_v50 = vld [vmem:[#allocation5 + $0x3b0] sm:$0xff]  ;;  %v447_v51 = vld [vmem:[#allocation5 + $0x3c8] sm:$0xff] }
  0x92   : > { %2697 = vmatpush1.bf16.msra.mxu0 %v2696_v58  ;;  %v451_v52 = vld [vmem:[#allocation5 + $0x3e8] sm:$0xff]  ;;  %v449_v53 = vld [vmem:[#allocation5 + $0x3d8] sm:$0xff]  ;;  %v2716_v55 = vpack.c.bf16 %v442_v47, %v438_v46  ;;  %v3116_v56 = vpack.c.bf16 %v444_v50, %v440_v48  ;;  %v446_v58 = vld [vmem:[#allocation5 + $0x3c0] sm:$0xff] }
  0x93   : > { %3097 = vmatpush1.bf16.msra.mxu1 %v3096_v59  ;;  %2699 = vmatprep.subr.bf16.mxu0 %v2698_v60  ;;  %v453_v54 = vld [vmem:[#allocation5 + $0x3f8] sm:$0xff]  ;;  %v2718_v57 = vpack.c.bf16 %v451_v52, %v447_v51  ;;  %v450_v59 = vld [vmem:[#allocation5 + $0x3e0] sm:$0xff]  ;;  %v448_v60 = vld [vmem:[#allocation5 + $0x3d0] sm:$0xff] }
  0x94   : > { %3099 = vmatprep.subr.bf16.mxu1 %v3098_v0  ;;  %v3118_v61 = vpack.c.bf16 %v453_v54, %v449_v53  ;;  %v452_v62 = vld [vmem:[#allocation5 + $0x3f0] sm:$0xff]  ;;  %v455_v63 = vld [vmem:[#allocation5 + $0x408] sm:$0xff]  ;;  %v457_v1 = vld [vmem:[#allocation5 + $0x418] sm:$0xff]  ;;  %v2720_v3 = vpack.c.bf16 %v450_v59, %v446_v58 }
  0x95   : > { %v459_v0 = vld [vmem:[#allocation5 + $0x428] sm:$0xff]  ;;  %v461_v2 = vld [vmem:[#allocation5 + $0x438] sm:$0xff]  ;;  %v3120_v4 = vpack.c.bf16 %v452_v62, %v448_v60  ;;  %v458_v7 = vld [vmem:[#allocation5 + $0x420] sm:$0xff] }
  0x96   : > { %2701 = vmatpush1.bf16.msra.mxu0 %v2700_v6  ;;  %v2722_v5 = vpack.c.bf16 %v459_v0, %v455_v63  ;;  %v454_v6 = vld [vmem:[#allocation5 + $0x400] sm:$0xff]  ;;  %v460_v10 = vld [vmem:[#allocation5 + $0x430] sm:$0xff]  ;;  %v463_v11 = vld [vmem:[#allocation5 + $0x448] sm:$0xff] }
  0x97   : > { %3101 = vmatpush1.bf16.msra.mxu1 %v3100_v8  ;;  %2703 = vmatprep.subr.bf16.mxu0 %v2702_v9  ;;  %v456_v8 = vld [vmem:[#allocation5 + $0x410] sm:$0xff]  ;;  %v3122_v9 = vpack.c.bf16 %v461_v2, %v457_v1  ;;  %v467_v12 = vld [vmem:[#allocation5 + $0x468] sm:$0xff]  ;;  %v469_v14 = vld [vmem:[#allocation5 + $0x478] sm:$0xff]  ;;  %v2724_v16 = vpack.c.bf16 %v458_v7, %v454_v6 }
  0x98   : > { %3103 = vmatprep.subr.bf16.mxu1 %v3102_v13  ;;  %v465_v13 = vld [vmem:[#allocation5 + $0x458] sm:$0xff]  ;;  %v3124_v17 = vpack.c.bf16 %v460_v10, %v456_v8  ;;  %v2726_v18 = vpack.c.bf16 %v467_v12, %v463_v11  ;;  %v468_v23 = vld [vmem:[#allocation5 + $0x470] sm:$0xff]  ;;  %v471_v24 = vld [vmem:[#allocation5 + $0x488] sm:$0xff] }
  0x99   : > { %v313_v15 = vld [vmem:[%s4010_s13] sm:$0xff]  ;;  %v3126_v22 = vpack.c.bf16 %v469_v14, %v465_v13  ;;  %v479_v36 = vld [vmem:[#allocation5 + $0x4c8] sm:$0xff]  ;;  %v502_v13 = vld [vmem:[#allocation5 + $0x580] sm:$0xff] }
  0x9a   : > { %2705 = vmatpush1.bf16.msra.mxu0 %v2704_v19  ;;  %v462_v19 = vld [vmem:[#allocation5 + $0x440] sm:$0xff]  ;;  %v473_v26 = vld [vmem:[#allocation5 + $0x498] sm:$0xff]  ;;  %v476_v35 = vld [vmem:[#allocation5 + $0x4b0] sm:$0xff] }
  0x9b   : > { %3105 = vmatpush1.bf16.msra.mxu1 %v3104_v20  ;;  %2707 = vmatprep.subr.bf16.mxu0 %v2706_v21  ;;  %v466_v20 = vld [vmem:[#allocation5 + $0x460] sm:$0xff]  ;;  %v464_v21 = vld [vmem:[#allocation5 + $0x450] sm:$0xff]  ;;  %v477_v27 = vld [vmem:[#allocation5 + $0x4b8] sm:$0xff] }
  0x9c   : > { %3107 = vmatprep.subr.bf16.mxu1 %v3106_v25  ;;  %v475_v25 = vld [vmem:[#allocation5 + $0x4a8] sm:$0xff]  ;;  %v2728_v28 = vpack.c.bf16 %v466_v20, %v462_v19  ;;  %v3128_v29 = vpack.c.bf16 %v468_v23, %v464_v21  ;;  %v3130_v34 = vpack.c.bf16 %v477_v27, %v473_v26  ;;  %v481_v38 = vld [vmem:[#allocation5 + $0x4d8] sm:$0xff]  ;;  %v484_v47 = vld [vmem:[#allocation5 + $0x4f0] sm:$0xff] }
  0x9d   : > { %v2730_v30 = vpack.c.bf16 %v475_v25, %v471_v24  ;;  %v485_v39 = vld [vmem:[#allocation5 + $0x4f8] sm:$0xff]  ;;  %v487_v48 = vld [vmem:[#allocation5 + $0x508] sm:$0xff]  ;;  %v492_v59 = vld [vmem:[#allocation5 + $0x530] sm:$0xff] }
  0x9e   : > { %2709 = vmatpush1.bf16.msra.mxu0 %v2708_v31  ;;  %v470_v31 = vld [vmem:[#allocation5 + $0x480] sm:$0xff]  ;;  %v3134_v46 = vpack.c.bf16 %v485_v39, %v481_v38  ;;  %v489_v50 = vld [vmem:[#allocation5 + $0x518] sm:$0xff]  ;;  %v495_v60 = vld [vmem:[#allocation5 + $0x548] sm:$0xff] }
  0x9f   : > { %3109 = vmatpush1.bf16.msra.mxu1 %v3108_v32  ;;  %2711 = vmatprep.subr.bf16.mxu0 %v2710_v33  ;;  %v474_v32 = vld [vmem:[#allocation5 + $0x4a0] sm:$0xff]  ;;  %v472_v33 = vld [vmem:[#allocation5 + $0x490] sm:$0xff]  ;;  %v493_v51 = vld [vmem:[#allocation5 + $0x538] sm:$0xff] }
  0xa0   : > { %3111 = vmatprep.subr.bf16.mxu1 %v3110_v37  ;;  %v483_v37 = vld [vmem:[#allocation5 + $0x4e8] sm:$0xff]  ;;  %v2732_v40 = vpack.c.bf16 %v474_v32, %v470_v31  ;;  %v3132_v41 = vpack.c.bf16 %v476_v35, %v472_v33  ;;  %v3138_v58 = vpack.c.bf16 %v493_v51, %v489_v50  ;;  %v497_v62 = vld [vmem:[#allocation5 + $0x558] sm:$0xff]  ;;  %v500_v7 = vld [vmem:[#allocation5 + $0x570] sm:$0xff] }
  0xa1   : > { %v2734_v42 = vpack.c.bf16 %v483_v37, %v479_v36  ;;  %v501_v63 = vld [vmem:[#allocation5 + $0x578] sm:$0xff]  ;;  %v503_v8 = vld [vmem:[#allocation5 + $0x588] sm:$0xff]  ;;  %v516_v32 = vld [vmem:[#allocation5 + $0x5f0] sm:$0xff] }
  0xa2   : > { %2713 = vmatpush1.bf16.msra.mxu0 %v2712_v43  ;;  %v478_v43 = vld [vmem:[#allocation5 + $0x4c0] sm:$0xff]  ;;  %v3142_v6 = vpack.c.bf16 %v501_v63, %v497_v62  ;;  %v505_v10 = vld [vmem:[#allocation5 + $0x598] sm:$0xff]  ;;  %v511_v20 = vld [vmem:[#allocation5 + $0x5c8] sm:$0xff] }
  0xa3   : > { %3113 = vmatpush1.bf16.msra.mxu1 %v3112_v44  ;;  %2715 = vmatprep.subr.bf16.mxu0 %v2714_v45  ;;  %v482_v44 = vld [vmem:[#allocation5 + $0x4e0] sm:$0xff]  ;;  %v480_v45 = vld [vmem:[#allocation5 + $0x4d0] sm:$0xff]  ;;  %v509_v11 = vld [vmem:[#allocation5 + $0x5b8] sm:$0xff] }
  0xa4   : > { %3115 = vmatprep.subr.bf16.mxu1 %v3114_v49  ;;  %v491_v49 = vld [vmem:[#allocation5 + $0x528] sm:$0xff]  ;;  %v2736_v52 = vpack.c.bf16 %v482_v44, %v478_v43  ;;  %v3136_v53 = vpack.c.bf16 %v484_v47, %v480_v45  ;;  %v3146_v19 = vpack.c.bf16 %v509_v11, %v505_v10  ;;  %v513_v23 = vld [vmem:[#allocation5 + $0x5d8] sm:$0xff]  ;;  %v524_v44 = vld [vmem:[#allocation5 + $0x630] sm:$0xff] }
  0xa5   : > { %v2738_v54 = vpack.c.bf16 %v491_v49, %v487_v48  ;;  %v515_v21 = vld [vmem:[#allocation5 + $0x5e8] sm:$0xff]  ;;  %v517_v24 = vld [vmem:[#allocation5 + $0x5f8] sm:$0xff] }
  0xa6   : > { %2717 = vmatpush1.bf16.msra.mxu0 %v2716_v55  ;;  %v486_v55 = vld [vmem:[#allocation5 + $0x500] sm:$0xff]  ;;  %v2750_v27 = vpack.c.bf16 %v515_v21, %v511_v20  ;;  %v3150_v31 = vpack.c.bf16 %v517_v24, %v513_v23  ;;  %v519_v33 = vld [vmem:[#allocation5 + $0x608] sm:$0xff]  ;;  %v521_v35 = vld [vmem:[#allocation5 + $0x618] sm:$0xff] }
  0xa7   : > { %3117 = vmatpush1.bf16.msra.mxu1 %v3116_v56  ;;  %2719 = vmatprep.subr.bf16.mxu0 %v2718_v57  ;;  %v490_v56 = vld [vmem:[#allocation5 + $0x520] sm:$0xff]  ;;  %v488_v57 = vld [vmem:[#allocation5 + $0x510] sm:$0xff]  ;;  %v525_v36 = vld [vmem:[#allocation5 + $0x638] sm:$0xff] }
  0xa8   : > { %3119 = vmatprep.subr.bf16.mxu1 %v3118_v61  ;;  %v499_v61 = vld [vmem:[#allocation5 + $0x568] sm:$0xff]  ;;  %v2740_v0 = vpack.c.bf16 %v490_v56, %v486_v55  ;;  %v3140_v1 = vpack.c.bf16 %v492_v59, %v488_v57  ;;  %v3154_v43 = vpack.c.bf16 %v525_v36, %v521_v35  ;;  %v529_v47 = vld [vmem:[#allocation5 + $0x658] sm:$0xff]  ;;  %v532_v56 = vld [vmem:[#allocation5 + $0x670] sm:$0xff] }
  0xa9   : > { %v2742_v2 = vpack.c.bf16 %v499_v61, %v495_v60  ;;  %v527_v45 = vld [vmem:[#allocation5 + $0x648] sm:$0xff]  ;;  %v533_v48 = vld [vmem:[#allocation5 + $0x678] sm:$0xff]  ;;  %v550_v24 = vld [vmem:[#allocation5 + $0x700] sm:$0xff] }
  0xaa   : > { %2721 = vmatpush1.bf16.msra.mxu0 %v2720_v3  ;;  %v494_v3 = vld [vmem:[#allocation5 + $0x540] sm:$0xff]  ;;  %v3158_v55 = vpack.c.bf16 %v533_v48, %v529_v47  ;;  %v535_v57 = vld [vmem:[#allocation5 + $0x688] sm:$0xff]  ;;  %v537_v59 = vld [vmem:[#allocation5 + $0x698] sm:$0xff] }
  0xab   : > { %3121 = vmatpush1.bf16.msra.mxu1 %v3120_v4  ;;  %2723 = vmatprep.subr.bf16.mxu0 %v2722_v5  ;;  %v498_v4 = vld [vmem:[#allocation5 + $0x560] sm:$0xff]  ;;  %v496_v5 = vld [vmem:[#allocation5 + $0x550] sm:$0xff]  ;;  %v541_v60 = vld [vmem:[#allocation5 + $0x6b8] sm:$0xff] }
  0xac   : > { %3123 = vmatprep.subr.bf16.mxu1 %v3122_v9  ;;  %v507_v9 = vld [vmem:[#allocation5 + $0x5a8] sm:$0xff]  ;;  %v2744_v12 = vpack.c.bf16 %v498_v4, %v494_v3  ;;  %v3144_v14 = vpack.c.bf16 %v500_v7, %v496_v5  ;;  %v3162_v3 = vpack.c.bf16 %v541_v60, %v537_v59  ;;  %v540_v4 = vld [vmem:[#allocation5 + $0x6b0] sm:$0xff]  ;;  %v545_v7 = vld [vmem:[#allocation5 + $0x6d8] sm:$0xff] }
  0xad   : > { %1195 = vmatmul.mubr.f32.vlgmr.msra.gmra.mrb[0].mxu0 %v313_v15  ;;  %v543_v5 = vld [vmem:[#allocation5 + $0x6c8] sm:$0xff]  ;;  %v557_v20 = vld [vmem:[#allocation5 + $0x738] sm:$0xff]  ;;  %v558_v36 = vld [vmem:[#allocation5 + $0x740] sm:$0xff] }
  0xae   : > { %2725 = vmatpush1.bf16.msra.mxu0 %v2724_v16  ;;  %1692 = vmatmul.mubr.f32.vlgmr.msra.gmra.mrb[0].mxu1 %v313_v15  ;;  %v2746_v15 = vpack.c.bf16 %v507_v9, %v503_v8  ;;  %v506_v16 = vld [vmem:[#allocation5 + $0x5a0] sm:$0xff]  ;;  %v549_v8 = vld [vmem:[#allocation5 + $0x6f8] sm:$0xff] }
  0xaf   : > { %3125 = vmatpush1.bf16.msra.mxu1 %v3124_v17  ;;  %2727 = vmatprep.subr.bf16.mxu0 %v2726_v18  ;;  %v504_v17 = vld [vmem:[#allocation5 + $0x590] sm:$0xff]  ;;  %v2748_v25 = vpack.c.bf16 %v506_v16, %v502_v13  ;;  %v546_v13 = vld [vmem:[#allocation5 + $0x6e0] sm:$0xff] }
  0xb0   : > { %3127 = vmatprep.subr.bf16.mxu1 %v3126_v22  ;;  %v508_v18 = vld [vmem:[#allocation5 + $0x5b0] sm:$0xff]  ;;  %v566_v48 = vld [vmem:[#allocation5 + $0x780] sm:$0xff] }
  0xb1   : > { %v316_v22 = vld [vmem:[%s4010_s13 + $0x18] sm:$0xff]  ;;  %v3148_v26 = vpack.c.bf16 %v508_v18, %v504_v17  ;;  %v574_v60 = vld [vmem:[#allocation5 + $0x7c0] sm:$0xff] }
  0xb2   : > { %2729 = vmatpush1.bf16.msra.mxu0 %v2728_v28  ;;  %1265 = vmatprep.mubr.f32.mxu0 %v316_v22  ;;  %v510_v28 = vld [vmem:[#allocation5 + $0x5c0] sm:$0xff]  ;;  %v548_v16 = vld [vmem:[#allocation5 + $0x6f0] sm:$0xff]  ;;  %v551_v17 = vld [vmem:[#allocation5 + $0x708] sm:$0xff] }
  0xb3   : > { %3129 = vmatpush1.bf16.msra.mxu1 %v3128_v29  ;;  %2731 = vmatprep.subr.bf16.mxu0 %v2730_v30  ;;  %v514_v29 = vld [vmem:[#allocation5 + $0x5e0] sm:$0xff]  ;;  %v512_v30 = vld [vmem:[#allocation5 + $0x5d0] sm:$0xff]  ;;  %v555_v18 = vld [vmem:[#allocation5 + $0x728] sm:$0xff] }
  0xb4   : > { %3131 = vmatprep.subr.bf16.mxu1 %v3130_v34  ;;  %1762 = vmatprep.mubr.f32.mxu1 %v316_v22  ;;  %v523_v34 = vld [vmem:[#allocation5 + $0x628] sm:$0xff]  ;;  %v2752_v37 = vpack.c.bf16 %v514_v29, %v510_v28  ;;  %v3152_v38 = vpack.c.bf16 %v516_v32, %v512_v30  ;;  %v2770_v23 = vpack.c.bf16 %v555_v18, %v551_v17  ;;  %v556_v28 = vld [vmem:[#allocation5 + $0x730] sm:$0xff]  ;;  %v565_v32 = vld [vmem:[#allocation5 + $0x778] sm:$0xff] }
  0xb5   : > { %v2754_v39 = vpack.c.bf16 %v523_v34, %v519_v33  ;;  %v559_v29 = vld [vmem:[#allocation5 + $0x748] sm:$0xff] }
  0xb6   : > { %2733 = vmatpush1.bf16.msra.mxu0 %v2732_v40  ;;  %v518_v40 = vld [vmem:[#allocation5 + $0x600] sm:$0xff]  ;;  %v563_v30 = vld [vmem:[#allocation5 + $0x768] sm:$0xff] }
  0xb7   : > { %3133 = vmatpush1.bf16.msra.mxu1 %v3132_v41  ;;  %2735 = vmatprep.subr.bf16.mxu0 %v2734_v42  ;;  %v522_v41 = vld [vmem:[#allocation5 + $0x620] sm:$0xff]  ;;  %v520_v42 = vld [vmem:[#allocation5 + $0x610] sm:$0xff]  ;;  %v2774_v35 = vpack.c.bf16 %v563_v30, %v559_v29  ;;  %v605_v29 = vld [vmem:[#allocation5 + $0x8b8] sm:$0xff] }
  0xb8   : > { %3135 = vmatprep.subr.bf16.mxu1 %v3134_v46  ;;  %v531_v46 = vld [vmem:[#allocation5 + $0x668] sm:$0xff]  ;;  %v2756_v49 = vpack.c.bf16 %v522_v41, %v518_v40  ;;  %v3156_v50 = vpack.c.bf16 %v524_v44, %v520_v42  ;;  %v564_v40 = vld [vmem:[#allocation5 + $0x770] sm:$0xff]  ;;  %v573_v44 = vld [vmem:[#allocation5 + $0x7b8] sm:$0xff] }
  0xb9   : > { %v2758_v51 = vpack.c.bf16 %v531_v46, %v527_v45  ;;  %v567_v41 = vld [vmem:[#allocation5 + $0x788] sm:$0xff]  ;;  %v318_v30 = vld [vmem:[%s4010_s13 + $0x28] sm:$0xff] }
  0xba   : > { %2737 = vmatpush1.bf16.msra.mxu0 %v2736_v52  ;;  %v526_v52 = vld [vmem:[#allocation5 + $0x640] sm:$0xff]  ;;  %v571_v42 = vld [vmem:[#allocation5 + $0x7a8] sm:$0xff] }
  0xbb   : > { %3137 = vmatpush1.bf16.msra.mxu1 %v3136_v53  ;;  %2739 = vmatprep.subr.bf16.mxu0 %v2738_v54  ;;  %v530_v53 = vld [vmem:[#allocation5 + $0x660] sm:$0xff]  ;;  %v528_v54 = vld [vmem:[#allocation5 + $0x650] sm:$0xff]  ;;  %v2778_v47 = vpack.c.bf16 %v571_v42, %v567_v41  ;;  %v609_v41 = vld [vmem:[#allocation5 + $0x8d8] sm:$0xff] }
  0xbc   : > { %3139 = vmatprep.subr.bf16.mxu1 %v3138_v58  ;;  %v539_v58 = vld [vmem:[#allocation5 + $0x6a8] sm:$0xff]  ;;  %v2760_v61 = vpack.c.bf16 %v530_v53, %v526_v52  ;;  %v3160_v62 = vpack.c.bf16 %v532_v56, %v528_v54  ;;  %v572_v52 = vld [vmem:[#allocation5 + $0x7b0] sm:$0xff]  ;;  %v581_v56 = vld [vmem:[#allocation5 + $0x7f8] sm:$0xff] }
  0xbd   : > { %v2762_v63 = vpack.c.bf16 %v539_v58, %v535_v57  ;;  %v575_v53 = vld [vmem:[#allocation5 + $0x7c8] sm:$0xff]  ;;  %v613_v42 = vld [vmem:[#allocation5 + $0x8f8] sm:$0xff] }
  0xbe   : > { %2741 = vmatpush1.bf16.msra.mxu0 %v2740_v0  ;;  %v534_v0 = vld [vmem:[#allocation5 + $0x680] sm:$0xff]  ;;  %v579_v54 = vld [vmem:[#allocation5 + $0x7e8] sm:$0xff] }
  0xbf   : > { %3141 = vmatpush1.bf16.msra.mxu1 %v3140_v1  ;;  %2743 = vmatprep.subr.bf16.mxu0 %v2742_v2  ;;  %v538_v1 = vld [vmem:[#allocation5 + $0x6a0] sm:$0xff]  ;;  %v536_v2 = vld [vmem:[#allocation5 + $0x690] sm:$0xff]  ;;  %v2782_v59 = vpack.c.bf16 %v579_v54, %v575_v53  ;;  %v617_v53 = vld [vmem:[#allocation5 + $0x918] sm:$0xff] }
  0xc0   : > { %3143 = vmatprep.subr.bf16.mxu1 %v3142_v6  ;;  %v547_v6 = vld [vmem:[#allocation5 + $0x6e8] sm:$0xff]  ;;  %v2764_v9 = vpack.c.bf16 %v538_v1, %v534_v0  ;;  %v3164_v10 = vpack.c.bf16 %v540_v4, %v536_v2  ;;  %v580_v0 = vld [vmem:[#allocation5 + $0x7f0] sm:$0xff]  ;;  %v589_v4 = vld [vmem:[#allocation5 + $0x838] sm:$0xff] }
  0xc1   : > { %v2766_v11 = vpack.c.bf16 %v547_v6, %v543_v5  ;;  %v583_v1 = vld [vmem:[#allocation5 + $0x808] sm:$0xff]  ;;  %v621_v54 = vld [vmem:[#allocation5 + $0x938] sm:$0xff] }
  0xc2   : > { %2745 = vmatpush1.bf16.msra.mxu0 %v2744_v12  ;;  %v542_v12 = vld [vmem:[#allocation5 + $0x6c0] sm:$0xff]  ;;  %v587_v2 = vld [vmem:[#allocation5 + $0x828] sm:$0xff] }
  0xc3   : > { %3145 = vmatpush1.bf16.msra.mxu1 %v3144_v14  ;;  %2747 = vmatprep.subr.bf16.mxu0 %v2746_v15  ;;  %v544_v14 = vld [vmem:[#allocation5 + $0x6d0] sm:$0xff]  ;;  %v3166_v15 = vpack.c.bf16 %v549_v8, %v545_v7  ;;  %v2768_v21 = vpack.c.bf16 %v546_v13, %v542_v12  ;;  %v2786_v7 = vpack.c.bf16 %v587_v2, %v583_v1  ;;  %v582_v8 = vld [vmem:[#allocation5 + $0x800] sm:$0xff]  ;;  %v591_v13 = vld [vmem:[#allocation5 + $0x848] sm:$0xff] }
  0xc4   : > { %3147 = vmatprep.subr.bf16.mxu1 %v3146_v19  ;;  %v553_v19 = vld [vmem:[#allocation5 + $0x718] sm:$0xff]  ;;  %v3168_v22 = vpack.c.bf16 %v548_v16, %v544_v14  ;;  %v588_v12 = vld [vmem:[#allocation5 + $0x830] sm:$0xff]  ;;  %v595_v14 = vld [vmem:[#allocation5 + $0x868] sm:$0xff] }
  0xc5   : > { %v597_v16 = vld [vmem:[#allocation5 + $0x878] sm:$0xff]  ;;  %v315_v17 = vld [vmem:[%s4010_s13 + $0x10] sm:$0xff] }
  0xc6   : > { %2749 = vmatpush1.bf16.msra.mxu0 %v2748_v25  ;;  %v554_v25 = vld [vmem:[#allocation5 + $0x720] sm:$0xff]  ;;  %v625_v1 = vld [vmem:[#allocation5 + $0x958] sm:$0xff] }
  0xc7   : > { %3149 = vmatpush1.bf16.msra.mxu1 %v3148_v26  ;;  %2751 = vmatprep.subr.bf16.mxu0 %v2750_v27  ;;  %v552_v26 = vld [vmem:[#allocation5 + $0x710] sm:$0xff]  ;;  %v3170_v27 = vpack.c.bf16 %v557_v20, %v553_v19  ;;  %v2772_v33 = vpack.c.bf16 %v554_v25, %v550_v24  ;;  %v2790_v20 = vpack.c.bf16 %v595_v14, %v591_v13  ;;  %v629_v2 = vld [vmem:[#allocation5 + $0x978] sm:$0xff] }
  0xc8   : > { %3151 = vmatprep.subr.bf16.mxu1 %v3150_v31  ;;  %v561_v31 = vld [vmem:[#allocation5 + $0x758] sm:$0xff]  ;;  %v3172_v34 = vpack.c.bf16 %v556_v28, %v552_v26  ;;  %v596_v25 = vld [vmem:[#allocation5 + $0x870] sm:$0xff]  ;;  %v599_v26 = vld [vmem:[#allocation5 + $0x888] sm:$0xff] }
  0xc9   : > { %v601_v28 = vld [vmem:[#allocation5 + $0x898] sm:$0xff] }
  0xca   : > { %2753 = vmatpush1.bf16.msra.mxu0 %v2752_v37  ;;  %v562_v37 = vld [vmem:[#allocation5 + $0x760] sm:$0xff]  ;;  %v633_v13 = vld [vmem:[#allocation5 + $0x998] sm:$0xff] }
  0xcb   : > { %3153 = vmatpush1.bf16.msra.mxu1 %v3152_v38  ;;  %2755 = vmatprep.subr.bf16.mxu0 %v2754_v39  ;;  %v560_v38 = vld [vmem:[#allocation5 + $0x750] sm:$0xff]  ;;  %v3174_v39 = vpack.c.bf16 %v565_v32, %v561_v31  ;;  %v2776_v45 = vpack.c.bf16 %v562_v37, %v558_v36  ;;  %v3194_v37 = vpack.c.bf16 %v605_v29, %v601_v28  ;;  %v637_v14 = vld [vmem:[#allocation5 + $0x9b8] sm:$0xff] }
  0xcc   : > { %3155 = vmatprep.subr.bf16.mxu1 %v3154_v43  ;;  %v569_v43 = vld [vmem:[#allocation5 + $0x798] sm:$0xff]  ;;  %v3176_v46 = vpack.c.bf16 %v564_v40, %v560_v38  ;;  %v600_v36 = vld [vmem:[#allocation5 + $0x890] sm:$0xff]  ;;  %v611_v40 = vld [vmem:[#allocation5 + $0x8e8] sm:$0xff] }
  0xcd   : > { %v604_v38 = vld [vmem:[#allocation5 + $0x8b0] sm:$0xff] }
  0xce   : > { %2757 = vmatpush1.bf16.msra.mxu0 %v2756_v49  ;;  %v570_v49 = vld [vmem:[#allocation5 + $0x7a0] sm:$0xff] }
  0xcf   : > { %3157 = vmatpush1.bf16.msra.mxu1 %v3156_v50  ;;  %2759 = vmatprep.subr.bf16.mxu0 %v2758_v51  ;;  %v568_v50 = vld [vmem:[#allocation5 + $0x790] sm:$0xff]  ;;  %v3178_v51 = vpack.c.bf16 %v573_v44, %v569_v43  ;;  %v2780_v57 = vpack.c.bf16 %v570_v49, %v566_v48  ;;  %v3196_v44 = vpack.c.bf16 %v604_v38, %v600_v36  ;;  %v651_v36 = vld [vmem:[#allocation5 + $0xa28] sm:$0xff]  ;;  %v653_v38 = vld [vmem:[#allocation5 + $0xa38] sm:$0xff] }
  0xd0   : > { %3159 = vmatprep.subr.bf16.mxu1 %v3158_v55  ;;  %v577_v55 = vld [vmem:[#allocation5 + $0x7d8] sm:$0xff]  ;;  %v3180_v58 = vpack.c.bf16 %v572_v52, %v568_v50  ;;  %v608_v48 = vld [vmem:[#allocation5 + $0x8d0] sm:$0xff]  ;;  %v3198_v49 = vpack.c.bf16 %v613_v42, %v609_v41  ;;  %v619_v52 = vld [vmem:[#allocation5 + $0x928] sm:$0xff] }
  0xd1   : > { %v612_v50 = vld [vmem:[#allocation5 + $0x8f0] sm:$0xff]  ;;  %v646_v42 = vld [vmem:[#allocation5 + $0xa00] sm:$0xff] }
  0xd2   : > { %2761 = vmatpush1.bf16.msra.mxu0 %v2760_v61  ;;  %v578_v61 = vld [vmem:[#allocation5 + $0x7e0] sm:$0xff] }
  0xd3   : > { %3161 = vmatpush1.bf16.msra.mxu1 %v3160_v62  ;;  %2763 = vmatprep.subr.bf16.mxu0 %v2762_v63  ;;  %v576_v62 = vld [vmem:[#allocation5 + $0x7d0] sm:$0xff]  ;;  %v3182_v63 = vpack.c.bf16 %v581_v56, %v577_v55  ;;  %v2784_v5 = vpack.c.bf16 %v578_v61, %v574_v60  ;;  %v3200_v56 = vpack.c.bf16 %v612_v50, %v608_v48  ;;  %v659_v48 = vld [vmem:[#allocation5 + $0xa68] sm:$0xff]  ;;  %v661_v50 = vld [vmem:[#allocation5 + $0xa78] sm:$0xff] }
  0xd4   : > { %3163 = vmatprep.subr.bf16.mxu1 %v3162_v3  ;;  %v585_v3 = vld [vmem:[#allocation5 + $0x818] sm:$0xff]  ;;  %v3184_v6 = vpack.c.bf16 %v580_v0, %v576_v62  ;;  %v616_v60 = vld [vmem:[#allocation5 + $0x910] sm:$0xff]  ;;  %v3202_v61 = vpack.c.bf16 %v621_v54, %v617_v53  ;;  %v627_v0 = vld [vmem:[#allocation5 + $0x968] sm:$0xff] }
  0xd5   : > { %v620_v62 = vld [vmem:[#allocation5 + $0x930] sm:$0xff]  ;;  %v654_v54 = vld [vmem:[#allocation5 + $0xa40] sm:$0xff] }
  0xd6   : > { %2765 = vmatpush1.bf16.msra.mxu0 %v2764_v9  ;;  %v586_v9 = vld [vmem:[#allocation5 + $0x820] sm:$0xff] }
  0xd7   : > { %3165 = vmatpush1.bf16.msra.mxu1 %v3164_v10  ;;  %2767 = vmatprep.subr.bf16.mxu0 %v2766_v11  ;;  %v584_v10 = vld [vmem:[#allocation5 + $0x810] sm:$0xff]  ;;  %v3186_v11 = vpack.c.bf16 %v589_v4, %v585_v3  ;;  %v2788_v18 = vpack.c.bf16 %v586_v9, %v582_v8  ;;  %v3204_v4 = vpack.c.bf16 %v620_v62, %v616_v60  ;;  %v667_v60 = vld [vmem:[#allocation5 + $0xaa8] sm:$0xff]  ;;  %v669_v62 = vld [vmem:[#allocation5 + $0xab8] sm:$0xff] }
  0xd8   : > { %3167 = vmatprep.subr.bf16.mxu1 %v3166_v15  ;;  %v593_v15 = vld [vmem:[#allocation5 + $0x858] sm:$0xff]  ;;  %v3188_v19 = vpack.c.bf16 %v588_v12, %v584_v10  ;;  %v624_v8 = vld [vmem:[#allocation5 + $0x950] sm:$0xff]  ;;  %v3206_v9 = vpack.c.bf16 %v629_v2, %v625_v1  ;;  %v635_v12 = vld [vmem:[#allocation5 + $0x9a8] sm:$0xff] }
  0xd9   : > { %v3190_v24 = vpack.c.bf16 %v597_v16, %v593_v15  ;;  %v628_v10 = vld [vmem:[#allocation5 + $0x970] sm:$0xff]  ;;  %v662_v2 = vld [vmem:[#allocation5 + $0xa80] sm:$0xff] }
  0xda   : > { %2769 = vmatpush1.bf16.msra.mxu0 %v2768_v21  ;;  %v590_v21 = vld [vmem:[#allocation5 + $0x840] sm:$0xff]  ;;  %v3208_v16 = vpack.c.bf16 %v628_v10, %v624_v8  ;;  %v675_v8 = vld [vmem:[#allocation5 + $0xae8] sm:$0xff]  ;;  %v677_v10 = vld [vmem:[#allocation5 + $0xaf8] sm:$0xff] }
  0xdb   : > { %3169 = vmatpush1.bf16.msra.mxu1 %v3168_v22  ;;  %2771 = vmatprep.subr.bf16.mxu0 %v2770_v23  ;;  %v594_v22 = vld [vmem:[#allocation5 + $0x860] sm:$0xff]  ;;  %v592_v23 = vld [vmem:[#allocation5 + $0x850] sm:$0xff] }
  0xdc   : > { %3171 = vmatprep.subr.bf16.mxu1 %v3170_v27  ;;  %v603_v27 = vld [vmem:[#allocation5 + $0x8a8] sm:$0xff]  ;;  %v2792_v31 = vpack.c.bf16 %v594_v22, %v590_v21  ;;  %v3192_v32 = vpack.c.bf16 %v596_v25, %v592_v23  ;;  %v3210_v21 = vpack.c.bf16 %v637_v14, %v633_v13  ;;  %v636_v22 = vld [vmem:[#allocation5 + $0x9b0] sm:$0xff]  ;;  %v641_v25 = vld [vmem:[#allocation5 + $0x9d8] sm:$0xff] }
  0xdd   : > { %v639_v23 = vld [vmem:[#allocation5 + $0x9c8] sm:$0xff]  ;;  %v670_v14 = vld [vmem:[#allocation5 + $0xac0] sm:$0xff] }
  0xde   : > { %2773 = vmatpush1.bf16.msra.mxu0 %v2772_v33  ;;  %v2794_v33 = vpack.c.bf16 %v603_v27, %v599_v26  ;;  %v645_v26 = vld [vmem:[#allocation5 + $0x9f8] sm:$0xff] }
  0xdf   : > { %3173 = vmatpush1.bf16.msra.mxu1 %v3172_v34  ;;  %2775 = vmatprep.subr.bf16.mxu0 %v2774_v35  ;;  %v598_v34 = vld [vmem:[#allocation5 + $0x880] sm:$0xff] }
  0xe0   : > { %3175 = vmatprep.subr.bf16.mxu1 %v3174_v39  ;;  %v602_v35 = vld [vmem:[#allocation5 + $0x8a0] sm:$0xff]  ;;  %v607_v39 = vld [vmem:[#allocation5 + $0x8c8] sm:$0xff] }
  0xe1   : > { %v2796_v43 = vpack.c.bf16 %v602_v35, %v598_v34  ;;  %v644_v34 = vld [vmem:[#allocation5 + $0x9f0] sm:$0xff]  ;;  %v647_v35 = vld [vmem:[#allocation5 + $0xa08] sm:$0xff] }
  0xe2   : > { %2777 = vmatpush1.bf16.msra.mxu0 %v2776_v45  ;;  %v2798_v45 = vpack.c.bf16 %v611_v40, %v607_v39  ;;  %v2818_v41 = vpack.c.bf16 %v651_v36, %v647_v35 }
  0xe3   : > { %3177 = vmatpush1.bf16.msra.mxu1 %v3176_v46  ;;  %2779 = vmatprep.subr.bf16.mxu0 %v2778_v47  ;;  %v606_v46 = vld [vmem:[#allocation5 + $0x8c0] sm:$0xff] }
  0xe4   : > { %3179 = vmatprep.subr.bf16.mxu1 %v3178_v51  ;;  %v610_v47 = vld [vmem:[#allocation5 + $0x8e0] sm:$0xff]  ;;  %v615_v51 = vld [vmem:[#allocation5 + $0x908] sm:$0xff] }
  0xe5   : > { %v2800_v55 = vpack.c.bf16 %v610_v47, %v606_v46  ;;  %v652_v46 = vld [vmem:[#allocation5 + $0xa30] sm:$0xff]  ;;  %v655_v47 = vld [vmem:[#allocation5 + $0xa48] sm:$0xff] }
  0xe6   : > { %2781 = vmatpush1.bf16.msra.mxu0 %v2780_v57  ;;  %v2802_v57 = vpack.c.bf16 %v619_v52, %v615_v51  ;;  %v2822_v53 = vpack.c.bf16 %v659_v48, %v655_v47 }
  0xe7   : > { %3181 = vmatpush1.bf16.msra.mxu1 %v3180_v58  ;;  %2783 = vmatprep.subr.bf16.mxu0 %v2782_v59  ;;  %v614_v58 = vld [vmem:[#allocation5 + $0x900] sm:$0xff] }
  0xe8   : > { %3183 = vmatprep.subr.bf16.mxu1 %v3182_v63  ;;  %v618_v59 = vld [vmem:[#allocation5 + $0x920] sm:$0xff]  ;;  %v623_v63 = vld [vmem:[#allocation5 + $0x948] sm:$0xff] }
  0xe9   : > { %v2804_v3 = vpack.c.bf16 %v618_v59, %v614_v58  ;;  %v660_v58 = vld [vmem:[#allocation5 + $0xa70] sm:$0xff]  ;;  %v663_v59 = vld [vmem:[#allocation5 + $0xa88] sm:$0xff] }
  0xea   : > { %2785 = vmatpush1.bf16.msra.mxu0 %v2784_v5  ;;  %v2806_v5 = vpack.c.bf16 %v627_v0, %v623_v63  ;;  %v2826_v1 = vpack.c.bf16 %v667_v60, %v663_v59 }
  0xeb   : > { %3185 = vmatpush1.bf16.msra.mxu1 %v3184_v6  ;;  %2787 = vmatprep.subr.bf16.mxu0 %v2786_v7  ;;  %v622_v6 = vld [vmem:[#allocation5 + $0x940] sm:$0xff] }
  0xec   : > { %3187 = vmatprep.subr.bf16.mxu1 %v3186_v11  ;;  %v626_v7 = vld [vmem:[#allocation5 + $0x960] sm:$0xff]  ;;  %v631_v11 = vld [vmem:[#allocation5 + $0x988] sm:$0xff] }
  0xed   : > { %1266 = vmatmul.mubr.f32.vlgmr.msra.gmra.mrb[0].mxu0 %v315_v17  ;;  %v2808_v15 = vpack.c.bf16 %v626_v7, %v622_v6  ;;  %v668_v6 = vld [vmem:[#allocation5 + $0xab0] sm:$0xff]  ;;  %v671_v7 = vld [vmem:[#allocation5 + $0xac8] sm:$0xff] }
  0xee   : > { %2789 = vmatpush1.bf16.msra.mxu0 %v2788_v18  ;;  %1763 = vmatmul.mubr.f32.vlgmr.msra.gmra.mrb[0].mxu1 %v315_v17  ;;  %v2810_v17 = vpack.c.bf16 %v635_v12, %v631_v11  ;;  %v630_v18 = vld [vmem:[#allocation5 + $0x980] sm:$0xff]  ;;  %v2830_v13 = vpack.c.bf16 %v675_v8, %v671_v7 }
  0xef   : > { %3189 = vmatpush1.bf16.msra.mxu1 %v3188_v19  ;;  %2791 = vmatprep.subr.bf16.mxu0 %v2790_v20  ;;  %v634_v19 = vld [vmem:[#allocation5 + $0x9a0] sm:$0xff]  ;;  %v632_v20 = vld [vmem:[#allocation5 + $0x990] sm:$0xff] }
  0xf0   : > { %3191 = vmatprep.subr.bf16.mxu1 %v3190_v24  ;;  %1336 = vmatprep.mubr.f32.mxu0 %v318_v30  ;;  %v643_v24 = vld [vmem:[#allocation5 + $0x9e8] sm:$0xff]  ;;  %v2812_v27 = vpack.c.bf16 %v634_v19, %v630_v18  ;;  %v3212_v28 = vpack.c.bf16 %v636_v22, %v632_v20  ;;  %v676_v18 = vld [vmem:[#allocation5 + $0xaf0] sm:$0xff]  ;;  %v685_v22 = vld [vmem:[#allocation5 + $0xb38] sm:$0xff] }
  0xf1   : > { %1833 = vmatprep.mubr.f32.mxu1 %v318_v30  ;;  %v2814_v29 = vpack.c.bf16 %v643_v24, %v639_v23  ;;  %v638_v30 = vld [vmem:[#allocation5 + $0x9c0] sm:$0xff]  ;;  %v679_v19 = vld [vmem:[#allocation5 + $0xb08] sm:$0xff] }
  0xf2   : > { %2793 = vmatpush1.bf16.msra.mxu0 %v2792_v31  ;;  %v642_v31 = vld [vmem:[#allocation5 + $0x9e0] sm:$0xff]  ;;  %v683_v20 = vld [vmem:[#allocation5 + $0xb28] sm:$0xff] }
  0xf3   : > { %3193 = vmatpush1.bf16.msra.mxu1 %v3192_v32  ;;  %2795 = vmatprep.subr.bf16.mxu0 %v2794_v33  ;;  %v640_v32 = vld [vmem:[#allocation5 + $0x9d0] sm:$0xff]  ;;  %v3214_v33 = vpack.c.bf16 %v645_v26, %v641_v25  ;;  %v2816_v39 = vpack.c.bf16 %v642_v31, %v638_v30  ;;  %v2834_v25 = vpack.c.bf16 %v683_v20, %v679_v19  ;;  %v678_v26 = vld [vmem:[#allocation5 + $0xb00] sm:$0xff]  ;;  %v687_v31 = vld [vmem:[#allocation5 + $0xb48] sm:$0xff] }
  0xf4   : > { %3195 = vmatprep.subr.bf16.mxu1 %v3194_v37  ;;  %v649_v37 = vld [vmem:[#allocation5 + $0xa18] sm:$0xff]  ;;  %v3216_v40 = vpack.c.bf16 %v644_v34, %v640_v32  ;;  %v684_v30 = vld [vmem:[#allocation5 + $0xb30] sm:$0xff]  ;;  %v691_v32 = vld [vmem:[#allocation5 + $0xb68] sm:$0xff] }
  0xf5   : > { %v693_v34 = vld [vmem:[#allocation5 + $0xb78] sm:$0xff] }
  0xf6   : > { %2797 = vmatpush1.bf16.msra.mxu0 %v2796_v43  ;;  %v650_v43 = vld [vmem:[#allocation5 + $0xa20] sm:$0xff]  ;;  %v317_v19 = vld [vmem:[%s4010_s13 + $0x20] sm:$0xff] }
  0xf7   : > { %3197 = vmatpush1.bf16.msra.mxu1 %v3196_v44  ;;  %2799 = vmatprep.subr.bf16.mxu0 %v2798_v45  ;;  %v648_v44 = vld [vmem:[#allocation5 + $0xa10] sm:$0xff]  ;;  %v3218_v45 = vpack.c.bf16 %v653_v38, %v649_v37  ;;  %v2820_v51 = vpack.c.bf16 %v650_v43, %v646_v42  ;;  %v2838_v37 = vpack.c.bf16 %v691_v32, %v687_v31  ;;  %v686_v38 = vld [vmem:[#allocation5 + $0xb40] sm:$0xff]  ;;  %v695_v43 = vld [vmem:[#allocation5 + $0xb88] sm:$0xff] }
  0xf8   : > { %3199 = vmatprep.subr.bf16.mxu1 %v3198_v49  ;;  %v657_v49 = vld [vmem:[#allocation5 + $0xa58] sm:$0xff]  ;;  %v3220_v52 = vpack.c.bf16 %v652_v46, %v648_v44  ;;  %v692_v42 = vld [vmem:[#allocation5 + $0xb70] sm:$0xff]  ;;  %v699_v44 = vld [vmem:[#allocation5 + $0xba8] sm:$0xff] }
  0xf9   : > { %v701_v46 = vld [vmem:[#allocation5 + $0xbb8] sm:$0xff]  ;;  %v320_v32 = vld [vmem:[%s4010_s13 + $0x38] sm:$0xff] }
  0xfa   : > { %2801 = vmatpush1.bf16.msra.mxu0 %v2800_v55  ;;  %v658_v55 = vld [vmem:[#allocation5 + $0xa60] sm:$0xff]  ;;  %v733_v31 = vld [vmem:[#allocation5 + $0xcb8] sm:$0xff] }
  0xfb   : > { %3201 = vmatpush1.bf16.msra.mxu1 %v3200_v56  ;;  %2803 = vmatprep.subr.bf16.mxu0 %v2802_v57  ;;  %v656_v56 = vld [vmem:[#allocation5 + $0xa50] sm:$0xff]  ;;  %v3222_v57 = vpack.c.bf16 %v661_v50, %v657_v49  ;;  %v2824_v63 = vpack.c.bf16 %v658_v55, %v654_v54  ;;  %v2842_v49 = vpack.c.bf16 %v699_v44, %v695_v43  ;;  %v694_v50 = vld [vmem:[#allocation5 + $0xb80] sm:$0xff]  ;;  %v703_v55 = vld [vmem:[#allocation5 + $0xbc8] sm:$0xff] }
  0xfc   : > { %3203 = vmatprep.subr.bf16.mxu1 %v3202_v61  ;;  %v665_v61 = vld [vmem:[#allocation5 + $0xa98] sm:$0xff]  ;;  %v3224_v0 = vpack.c.bf16 %v660_v58, %v656_v56  ;;  %v700_v54 = vld [vmem:[#allocation5 + $0xbb0] sm:$0xff]  ;;  %v707_v56 = vld [vmem:[#allocation5 + $0xbe8] sm:$0xff] }
  0xfd   : > { %v709_v58 = vld [vmem:[#allocation5 + $0xbf8] sm:$0xff] }
  0xfe   : > { %2805 = vmatpush1.bf16.msra.mxu0 %v2804_v3  ;;  %v666_v3 = vld [vmem:[#allocation5 + $0xaa0] sm:$0xff]  ;;  %v737_v43 = vld [vmem:[#allocation5 + $0xcd8] sm:$0xff] }
  0xff   : > { %3205 = vmatpush1.bf16.msra.mxu1 %v3204_v4  ;;  %2807 = vmatprep.subr.bf16.mxu0 %v2806_v5  ;;  %v664_v4 = vld [vmem:[#allocation5 + $0xa90] sm:$0xff]  ;;  %v3226_v5 = vpack.c.bf16 %v669_v62, %v665_v61  ;;  %v2828_v11 = vpack.c.bf16 %v666_v3, %v662_v2  ;;  %v2846_v61 = vpack.c.bf16 %v707_v56, %v703_v55  ;;  %v702_v62 = vld [vmem:[#allocation5 + $0xbc0] sm:$0xff]  ;;  %v711_v3 = vld [vmem:[#allocation5 + $0xc08] sm:$0xff] }
 0x100   : > { %3207 = vmatprep.subr.bf16.mxu1 %v3206_v9  ;;  %v673_v9 = vld [vmem:[#allocation5 + $0xad8] sm:$0xff]  ;;  %v3228_v12 = vpack.c.bf16 %v668_v6, %v664_v4  ;;  %v708_v2 = vld [vmem:[#allocation5 + $0xbf0] sm:$0xff]  ;;  %v715_v4 = vld [vmem:[#allocation5 + $0xc28] sm:$0xff] }
 0x101   : > { %v717_v6 = vld [vmem:[#allocation5 + $0xc38] sm:$0xff] }
 0x102   : > { %2809 = vmatpush1.bf16.msra.mxu0 %v2808_v15  ;;  %v674_v15 = vld [vmem:[#allocation5 + $0xae0] sm:$0xff]  ;;  %v741_v44 = vld [vmem:[#allocation5 + $0xcf8] sm:$0xff] }
 0x103   : > { %3209 = vmatpush1.bf16.msra.mxu1 %v3208_v16  ;;  %2811 = vmatprep.subr.bf16.mxu0 %v2810_v17  ;;  %v672_v16 = vld [vmem:[#allocation5 + $0xad0] sm:$0xff]  ;;  %v3230_v17 = vpack.c.bf16 %v677_v10, %v673_v9  ;;  %v2832_v23 = vpack.c.bf16 %v674_v15, %v670_v14  ;;  %v2850_v9 = vpack.c.bf16 %v715_v4, %v711_v3  ;;  %v710_v10 = vld [vmem:[#allocation5 + $0xc00] sm:$0xff]  ;;  %v719_v15 = vld [vmem:[#allocation5 + $0xc48] sm:$0xff] }
 0x104   : > { %3211 = vmatprep.subr.bf16.mxu1 %v3210_v21  ;;  %v681_v21 = vld [vmem:[#allocation5 + $0xb18] sm:$0xff]  ;;  %v3232_v24 = vpack.c.bf16 %v676_v18, %v672_v16  ;;  %v716_v14 = vld [vmem:[#allocation5 + $0xc30] sm:$0xff]  ;;  %v723_v16 = vld [vmem:[#allocation5 + $0xc68] sm:$0xff] }
 0x105   : > { %v725_v18 = vld [vmem:[#allocation5 + $0xc78] sm:$0xff] }
 0x106   : > { %2813 = vmatpush1.bf16.msra.mxu0 %v2812_v27  ;;  %v682_v27 = vld [vmem:[#allocation5 + $0xb20] sm:$0xff]  ;;  %v745_v55 = vld [vmem:[#allocation5 + $0xd18] sm:$0xff] }
 0x107   : > { %3213 = vmatpush1.bf16.msra.mxu1 %v3212_v28  ;;  %2815 = vmatprep.subr.bf16.mxu0 %v2814_v29  ;;  %v680_v28 = vld [vmem:[#allocation5 + $0xb10] sm:$0xff]  ;;  %v3234_v29 = vpack.c.bf16 %v685_v22, %v681_v21  ;;  %v2836_v35 = vpack.c.bf16 %v682_v27, %v678_v26  ;;  %v2854_v22 = vpack.c.bf16 %v723_v16, %v719_v15  ;;  %v749_v56 = vld [vmem:[#allocation5 + $0xd38] sm:$0xff] }
 0x108   : > { %3215 = vmatprep.subr.bf16.mxu1 %v3214_v33  ;;  %v689_v33 = vld [vmem:[#allocation5 + $0xb58] sm:$0xff]  ;;  %v3236_v36 = vpack.c.bf16 %v684_v30, %v680_v28  ;;  %v724_v27 = vld [vmem:[#allocation5 + $0xc70] sm:$0xff]  ;;  %v727_v28 = vld [vmem:[#allocation5 + $0xc88] sm:$0xff] }
 0x109   : > { %v729_v30 = vld [vmem:[#allocation5 + $0xc98] sm:$0xff] }
 0x10a   : > { %2817 = vmatpush1.bf16.msra.mxu0 %v2816_v39  ;;  %v690_v39 = vld [vmem:[#allocation5 + $0xb60] sm:$0xff]  ;;  %v753_v3 = vld [vmem:[#allocation5 + $0xd58] sm:$0xff] }
 0x10b   : > { %3217 = vmatpush1.bf16.msra.mxu1 %v3216_v40  ;;  %2819 = vmatprep.subr.bf16.mxu0 %v2818_v41  ;;  %v688_v40 = vld [vmem:[#allocation5 + $0xb50] sm:$0xff]  ;;  %v3238_v41 = vpack.c.bf16 %v693_v34, %v689_v33  ;;  %v2840_v47 = vpack.c.bf16 %v690_v39, %v686_v38  ;;  %v3258_v39 = vpack.c.bf16 %v733_v31, %v729_v30  ;;  %v757_v4 = vld [vmem:[#allocation5 + $0xd78] sm:$0xff] }
 0x10c   : > { %3219 = vmatprep.subr.bf16.mxu1 %v3218_v45  ;;  %v697_v45 = vld [vmem:[#allocation5 + $0xb98] sm:$0xff]  ;;  %v3240_v48 = vpack.c.bf16 %v692_v42, %v688_v40  ;;  %v728_v38 = vld [vmem:[#allocation5 + $0xc90] sm:$0xff]  ;;  %v739_v42 = vld [vmem:[#allocation5 + $0xce8] sm:$0xff] }
 0x10d   : > { %v732_v40 = vld [vmem:[#allocation5 + $0xcb0] sm:$0xff]  ;;  %v761_v15 = vld [vmem:[#allocation5 + $0xd98] sm:$0xff] }
 0x10e   : > { %2821 = vmatpush1.bf16.msra.mxu0 %v2820_v51  ;;  %v698_v51 = vld [vmem:[#allocation5 + $0xba0] sm:$0xff]  ;;  %v765_v16 = vld [vmem:[#allocation5 + $0xdb8] sm:$0xff] }
 0x10f   : > { %3221 = vmatpush1.bf16.msra.mxu1 %v3220_v52  ;;  %2823 = vmatprep.subr.bf16.mxu0 %v2822_v53  ;;  %v696_v52 = vld [vmem:[#allocation5 + $0xb90] sm:$0xff]  ;;  %v3242_v53 = vpack.c.bf16 %v701_v46, %v697_v45  ;;  %v2844_v59 = vpack.c.bf16 %v698_v51, %v694_v50  ;;  %v3260_v46 = vpack.c.bf16 %v732_v40, %v728_v38  ;;  %v779_v38 = vld [vmem:[#allocation5 + $0xe28] sm:$0xff]  ;;  %v781_v40 = vld [vmem:[#allocation5 + $0xe38] sm:$0xff] }
 0x110   : > { %3223 = vmatprep.subr.bf16.mxu1 %v3222_v57  ;;  %v705_v57 = vld [vmem:[#allocation5 + $0xbd8] sm:$0xff]  ;;  %v3244_v60 = vpack.c.bf16 %v700_v54, %v696_v52  ;;  %v736_v50 = vld [vmem:[#allocation5 + $0xcd0] sm:$0xff]  ;;  %v3262_v51 = vpack.c.bf16 %v741_v44, %v737_v43  ;;  %v747_v54 = vld [vmem:[#allocation5 + $0xd28] sm:$0xff] }
 0x111   : > { %v740_v52 = vld [vmem:[#allocation5 + $0xcf0] sm:$0xff]  ;;  %v774_v44 = vld [vmem:[#allocation5 + $0xe00] sm:$0xff] }
 0x112   : > { %2825 = vmatpush1.bf16.msra.mxu0 %v2824_v63  ;;  %v706_v63 = vld [vmem:[#allocation5 + $0xbe0] sm:$0xff] }
 0x113   : > { %3225 = vmatpush1.bf16.msra.mxu1 %v3224_v0  ;;  %2827 = vmatprep.subr.bf16.mxu0 %v2826_v1  ;;  %v704_v0 = vld [vmem:[#allocation5 + $0xbd0] sm:$0xff]  ;;  %v3246_v1 = vpack.c.bf16 %v709_v58, %v705_v57  ;;  %v2848_v7 = vpack.c.bf16 %v706_v63, %v702_v62  ;;  %v3264_v58 = vpack.c.bf16 %v740_v52, %v736_v50  ;;  %v787_v50 = vld [vmem:[#allocation5 + $0xe68] sm:$0xff]  ;;  %v789_v52 = vld [vmem:[#allocation5 + $0xe78] sm:$0xff] }
 0x114   : > { %3227 = vmatprep.subr.bf16.mxu1 %v3226_v5  ;;  %v713_v5 = vld [vmem:[#allocation5 + $0xc18] sm:$0xff]  ;;  %v3248_v8 = vpack.c.bf16 %v708_v2, %v704_v0  ;;  %v744_v62 = vld [vmem:[#allocation5 + $0xd10] sm:$0xff]  ;;  %v3266_v63 = vpack.c.bf16 %v749_v56, %v745_v55  ;;  %v755_v2 = vld [vmem:[#allocation5 + $0xd68] sm:$0xff] }
 0x115   : > { %v748_v0 = vld [vmem:[#allocation5 + $0xd30] sm:$0xff]  ;;  %v782_v56 = vld [vmem:[#allocation5 + $0xe40] sm:$0xff] }
 0x116   : > { %2829 = vmatpush1.bf16.msra.mxu0 %v2828_v11  ;;  %v714_v11 = vld [vmem:[#allocation5 + $0xc20] sm:$0xff] }
 0x117   : > { %3229 = vmatpush1.bf16.msra.mxu1 %v3228_v12  ;;  %2831 = vmatprep.subr.bf16.mxu0 %v2830_v13  ;;  %v712_v12 = vld [vmem:[#allocation5 + $0xc10] sm:$0xff]  ;;  %v3250_v13 = vpack.c.bf16 %v717_v6, %v713_v5  ;;  %v2852_v20 = vpack.c.bf16 %v714_v11, %v710_v10  ;;  %v3268_v6 = vpack.c.bf16 %v748_v0, %v744_v62  ;;  %v795_v62 = vld [vmem:[#allocation5 + $0xea8] sm:$0xff]  ;;  %v797_v0 = vld [vmem:[#allocation5 + $0xeb8] sm:$0xff] }
 0x118   : > { %3231 = vmatprep.subr.bf16.mxu1 %v3230_v17  ;;  %v721_v17 = vld [vmem:[#allocation5 + $0xc58] sm:$0xff]  ;;  %v3252_v21 = vpack.c.bf16 %v716_v14, %v712_v12  ;;  %v752_v10 = vld [vmem:[#allocation5 + $0xd50] sm:$0xff]  ;;  %v3270_v11 = vpack.c.bf16 %v757_v4, %v753_v3  ;;  %v763_v14 = vld [vmem:[#allocation5 + $0xda8] sm:$0xff] }
 0x119   : > { %v3254_v26 = vpack.c.bf16 %v725_v18, %v721_v17  ;;  %v756_v12 = vld [vmem:[#allocation5 + $0xd70] sm:$0xff]  ;;  %v790_v4 = vld [vmem:[#allocation5 + $0xe80] sm:$0xff] }
 0x11a   : > { %2833 = vmatpush1.bf16.msra.mxu0 %v2832_v23  ;;  %v718_v23 = vld [vmem:[#allocation5 + $0xc40] sm:$0xff]  ;;  %v3272_v18 = vpack.c.bf16 %v756_v12, %v752_v10  ;;  %v803_v10 = vld [vmem:[#allocation5 + $0xee8] sm:$0xff]  ;;  %v805_v12 = vld [vmem:[#allocation5 + $0xef8] sm:$0xff] }
 0x11b   : > { %3233 = vmatpush1.bf16.msra.mxu1 %v3232_v24  ;;  %2835 = vmatprep.subr.bf16.mxu0 %v2834_v25  ;;  %v722_v24 = vld [vmem:[#allocation5 + $0xc60] sm:$0xff]  ;;  %v720_v25 = vld [vmem:[#allocation5 + $0xc50] sm:$0xff] }
 0x11c   : > { %3235 = vmatprep.subr.bf16.mxu1 %v3234_v29  ;;  %v731_v29 = vld [vmem:[#allocation5 + $0xca8] sm:$0xff]  ;;  %v2856_v33 = vpack.c.bf16 %v722_v24, %v718_v23  ;;  %v3256_v34 = vpack.c.bf16 %v724_v27, %v720_v25  ;;  %v3274_v23 = vpack.c.bf16 %v765_v16, %v761_v15  ;;  %v764_v24 = vld [vmem:[#allocation5 + $0xdb0] sm:$0xff]  ;;  %v769_v27 = vld [vmem:[#allocation5 + $0xdd8] sm:$0xff] }
 0x11d   : > { %v767_v25 = vld [vmem:[#allocation5 + $0xdc8] sm:$0xff]  ;;  %v798_v16 = vld [vmem:[#allocation5 + $0xec0] sm:$0xff] }
 0x11e   : > { %2837 = vmatpush1.bf16.msra.mxu0 %v2836_v35  ;;  %v2858_v35 = vpack.c.bf16 %v731_v29, %v727_v28  ;;  %v773_v28 = vld [vmem:[#allocation5 + $0xdf8] sm:$0xff] }
 0x11f   : > { %3237 = vmatpush1.bf16.msra.mxu1 %v3236_v36  ;;  %2839 = vmatprep.subr.bf16.mxu0 %v2838_v37  ;;  %v726_v36 = vld [vmem:[#allocation5 + $0xc80] sm:$0xff] }
 0x120   : > { %3239 = vmatprep.subr.bf16.mxu1 %v3238_v41  ;;  %v730_v37 = vld [vmem:[#allocation5 + $0xca0] sm:$0xff]  ;;  %v735_v41 = vld [vmem:[#allocation5 + $0xcc8] sm:$0xff] }
 0x121   : > { %v2860_v45 = vpack.c.bf16 %v730_v37, %v726_v36  ;;  %v772_v36 = vld [vmem:[#allocation5 + $0xdf0] sm:$0xff]  ;;  %v775_v37 = vld [vmem:[#allocation5 + $0xe08] sm:$0xff] }
 0x122   : > { %2841 = vmatpush1.bf16.msra.mxu0 %v2840_v47  ;;  %v2862_v47 = vpack.c.bf16 %v739_v42, %v735_v41  ;;  %v2882_v43 = vpack.c.bf16 %v779_v38, %v775_v37 }
 0x123   : > { %3241 = vmatpush1.bf16.msra.mxu1 %v3240_v48  ;;  %2843 = vmatprep.subr.bf16.mxu0 %v2842_v49  ;;  %v734_v48 = vld [vmem:[#allocation5 + $0xcc0] sm:$0xff] }
 0x124   : > { %3243 = vmatprep.subr.bf16.mxu1 %v3242_v53  ;;  %v738_v49 = vld [vmem:[#allocation5 + $0xce0] sm:$0xff]  ;;  %v743_v53 = vld [vmem:[#allocation5 + $0xd08] sm:$0xff] }
 0x125   : > { %v2864_v57 = vpack.c.bf16 %v738_v49, %v734_v48  ;;  %v780_v48 = vld [vmem:[#allocation5 + $0xe30] sm:$0xff]  ;;  %v783_v49 = vld [vmem:[#allocation5 + $0xe48] sm:$0xff] }
 0x126   : > { %2845 = vmatpush1.bf16.msra.mxu0 %v2844_v59  ;;  %v2866_v59 = vpack.c.bf16 %v747_v54, %v743_v53  ;;  %v2886_v55 = vpack.c.bf16 %v787_v50, %v783_v49 }
 0x127   : > { %3245 = vmatpush1.bf16.msra.mxu1 %v3244_v60  ;;  %2847 = vmatprep.subr.bf16.mxu0 %v2846_v61  ;;  %v742_v60 = vld [vmem:[#allocation5 + $0xd00] sm:$0xff] }
 0x128   : > { %3247 = vmatprep.subr.bf16.mxu1 %v3246_v1  ;;  %v746_v61 = vld [vmem:[#allocation5 + $0xd20] sm:$0xff]  ;;  %v751_v1 = vld [vmem:[#allocation5 + $0xd48] sm:$0xff] }
 0x129   : > { %v2868_v5 = vpack.c.bf16 %v746_v61, %v742_v60  ;;  %v788_v60 = vld [vmem:[#allocation5 + $0xe70] sm:$0xff]  ;;  %v791_v61 = vld [vmem:[#allocation5 + $0xe88] sm:$0xff] }
 0x12a   : > { %2849 = vmatpush1.bf16.msra.mxu0 %v2848_v7  ;;  %v2870_v7 = vpack.c.bf16 %v755_v2, %v751_v1  ;;  %v2890_v3 = vpack.c.bf16 %v795_v62, %v791_v61 }
 0x12b   : > { %3249 = vmatpush1.bf16.msra.mxu1 %v3248_v8  ;;  %2851 = vmatprep.subr.bf16.mxu0 %v2850_v9  ;;  %v750_v8 = vld [vmem:[#allocation5 + $0xd40] sm:$0xff] }
 0x12c   : > { %3251 = vmatprep.subr.bf16.mxu1 %v3250_v13  ;;  %v754_v9 = vld [vmem:[#allocation5 + $0xd60] sm:$0xff]  ;;  %v759_v13 = vld [vmem:[#allocation5 + $0xd88] sm:$0xff] }
 0x12d   : > { %1337 = vmatmul.mubr.f32.vlgmr.msra.gmra.mrb[0].mxu0 %v317_v19  ;;  %v2872_v17 = vpack.c.bf16 %v754_v9, %v750_v8  ;;  %v796_v8 = vld [vmem:[#allocation5 + $0xeb0] sm:$0xff]  ;;  %v799_v9 = vld [vmem:[#allocation5 + $0xec8] sm:$0xff] }
 0x12e   : > { %2853 = vmatpush1.bf16.msra.mxu0 %v2852_v20  ;;  %1834 = vmatmul.mubr.f32.vlgmr.msra.gmra.mrb[0].mxu1 %v317_v19  ;;  %v2874_v19 = vpack.c.bf16 %v763_v14, %v759_v13  ;;  %v758_v20 = vld [vmem:[#allocation5 + $0xd80] sm:$0xff]  ;;  %v2894_v15 = vpack.c.bf16 %v803_v10, %v799_v9 }
 0x12f   : > { %3253 = vmatpush1.bf16.msra.mxu1 %v3252_v21  ;;  %2855 = vmatprep.subr.bf16.mxu0 %v2854_v22  ;;  %v762_v21 = vld [vmem:[#allocation5 + $0xda0] sm:$0xff]  ;;  %v760_v22 = vld [vmem:[#allocation5 + $0xd90] sm:$0xff] }
 0x130   : > { %3255 = vmatprep.subr.bf16.mxu1 %v3254_v26  ;;  %1407 = vmatprep.mubr.f32.mxu0 %v320_v32  ;;  %v771_v26 = vld [vmem:[#allocation5 + $0xde8] sm:$0xff]  ;;  %v2876_v29 = vpack.c.bf16 %v762_v21, %v758_v20  ;;  %v3276_v30 = vpack.c.bf16 %v764_v24, %v760_v22  ;;  %v804_v20 = vld [vmem:[#allocation5 + $0xef0] sm:$0xff]  ;;  %v813_v24 = vld [vmem:[#allocation5 + $0xf38] sm:$0xff] }
 0x131   : > { %1904 = vmatprep.mubr.f32.mxu1 %v320_v32  ;;  %v2878_v31 = vpack.c.bf16 %v771_v26, %v767_v25  ;;  %v766_v32 = vld [vmem:[#allocation5 + $0xdc0] sm:$0xff]  ;;  %v807_v21 = vld [vmem:[#allocation5 + $0xf08] sm:$0xff] }
 0x132   : > { %2857 = vmatpush1.bf16.msra.mxu0 %v2856_v33  ;;  %v770_v33 = vld [vmem:[#allocation5 + $0xde0] sm:$0xff]  ;;  %v811_v22 = vld [vmem:[#allocation5 + $0xf28] sm:$0xff] }
 0x133   : > { %3257 = vmatpush1.bf16.msra.mxu1 %v3256_v34  ;;  %2859 = vmatprep.subr.bf16.mxu0 %v2858_v35  ;;  %v768_v34 = vld [vmem:[#allocation5 + $0xdd0] sm:$0xff]  ;;  %v3278_v35 = vpack.c.bf16 %v773_v28, %v769_v27  ;;  %v2880_v41 = vpack.c.bf16 %v770_v33, %v766_v32  ;;  %v2898_v27 = vpack.c.bf16 %v811_v22, %v807_v21  ;;  %v806_v28 = vld [vmem:[#allocation5 + $0xf00] sm:$0xff]  ;;  %v815_v33 = vld [vmem:[#allocation5 + $0xf48] sm:$0xff] }
 0x134   : > { %3259 = vmatprep.subr.bf16.mxu1 %v3258_v39  ;;  %v777_v39 = vld [vmem:[#allocation5 + $0xe18] sm:$0xff]  ;;  %v3280_v42 = vpack.c.bf16 %v772_v36, %v768_v34  ;;  %v812_v32 = vld [vmem:[#allocation5 + $0xf30] sm:$0xff]  ;;  %v819_v34 = vld [vmem:[#allocation5 + $0xf68] sm:$0xff] }
 0x135   : > { %v821_v36 = vld [vmem:[#allocation5 + $0xf78] sm:$0xff]  ;;  %v319_v21 = vld [vmem:[%s4010_s13 + $0x30] sm:$0xff] }
 0x136   : > { %2861 = vmatpush1.bf16.msra.mxu0 %v2860_v45  ;;  %v778_v45 = vld [vmem:[#allocation5 + $0xe20] sm:$0xff] }
 0x137   : > { %3261 = vmatpush1.bf16.msra.mxu1 %v3260_v46  ;;  %2863 = vmatprep.subr.bf16.mxu0 %v2862_v47  ;;  %v776_v46 = vld [vmem:[#allocation5 + $0xe10] sm:$0xff]  ;;  %v3282_v47 = vpack.c.bf16 %v781_v40, %v777_v39  ;;  %v2884_v53 = vpack.c.bf16 %v778_v45, %v774_v44  ;;  %v2902_v39 = vpack.c.bf16 %v819_v34, %v815_v33  ;;  %v814_v40 = vld [vmem:[#allocation5 + $0xf40] sm:$0xff]  ;;  %v823_v45 = vld [vmem:[#allocation5 + $0xf88] sm:$0xff] }
 0x138   : > { %3263 = vmatprep.subr.bf16.mxu1 %v3262_v51  ;;  %v785_v51 = vld [vmem:[#allocation5 + $0xe58] sm:$0xff]  ;;  %v3284_v54 = vpack.c.bf16 %v780_v48, %v776_v46  ;;  %v820_v44 = vld [vmem:[#allocation5 + $0xf70] sm:$0xff]  ;;  %v827_v46 = vld [vmem:[#allocation5 + $0xfa8] sm:$0xff] }
 0x139   : > { %v829_v48 = vld [vmem:[#allocation5 + $0xfb8] sm:$0xff] }
 0x13a   : > { %2865 = vmatpush1.bf16.msra.mxu0 %v2864_v57  ;;  %v786_v57 = vld [vmem:[#allocation5 + $0xe60] sm:$0xff]  ;;  %v861_v33 = vld [vmem:[#allocation5 + $0x10b8] sm:$0xff] }
 0x13b   : > { %3265 = vmatpush1.bf16.msra.mxu1 %v3264_v58  ;;  %2867 = vmatprep.subr.bf16.mxu0 %v2866_v59  ;;  %v784_v58 = vld [vmem:[#allocation5 + $0xe50] sm:$0xff]  ;;  %v3286_v59 = vpack.c.bf16 %v789_v52, %v785_v51  ;;  %v2888_v1 = vpack.c.bf16 %v786_v57, %v782_v56  ;;  %v2906_v51 = vpack.c.bf16 %v827_v46, %v823_v45  ;;  %v822_v52 = vld [vmem:[#allocation5 + $0xf80] sm:$0xff]  ;;  %v831_v57 = vld [vmem:[#allocation5 + $0xfc8] sm:$0xff] }
 0x13c   : > { %3267 = vmatprep.subr.bf16.mxu1 %v3266_v63  ;;  %v793_v63 = vld [vmem:[#allocation5 + $0xe98] sm:$0xff]  ;;  %v3288_v2 = vpack.c.bf16 %v788_v60, %v784_v58  ;;  %v828_v56 = vld [vmem:[#allocation5 + $0xfb0] sm:$0xff]  ;;  %v835_v58 = vld [vmem:[#allocation5 + $0xfe8] sm:$0xff] }
 0x13d   : > { %v837_v60 = vld [vmem:[#allocation5 + $0xff8] sm:$0xff] }
 0x13e   : > { %2869 = vmatpush1.bf16.msra.mxu0 %v2868_v5  ;;  %v794_v5 = vld [vmem:[#allocation5 + $0xea0] sm:$0xff]  ;;  %v865_v45 = vld [vmem:[#allocation5 + $0x10d8] sm:$0xff] }
 0x13f   : > { %3269 = vmatpush1.bf16.msra.mxu1 %v3268_v6  ;;  %2871 = vmatprep.subr.bf16.mxu0 %v2870_v7  ;;  %v792_v6 = vld [vmem:[#allocation5 + $0xe90] sm:$0xff]  ;;  %v3290_v7 = vpack.c.bf16 %v797_v0, %v793_v63  ;;  %v2892_v13 = vpack.c.bf16 %v794_v5, %v790_v4  ;;  %v2910_v63 = vpack.c.bf16 %v835_v58, %v831_v57  ;;  %v830_v0 = vld [vmem:[#allocation5 + $0xfc0] sm:$0xff]  ;;  %v839_v5 = vld [vmem:[#allocation5 + $0x1008] sm:$0xff] }
 0x140   : > { %3271 = vmatprep.subr.bf16.mxu1 %v3270_v11  ;;  %v801_v11 = vld [vmem:[#allocation5 + $0xed8] sm:$0xff]  ;;  %v3292_v14 = vpack.c.bf16 %v796_v8, %v792_v6  ;;  %v836_v4 = vld [vmem:[#allocation5 + $0xff0] sm:$0xff]  ;;  %v843_v6 = vld [vmem:[#allocation5 + $0x1028] sm:$0xff] }
 0x141   : > { %v845_v8 = vld [vmem:[#allocation5 + $0x1038] sm:$0xff] }
 0x142   : > { %2873 = vmatpush1.bf16.msra.mxu0 %v2872_v17  ;;  %v802_v17 = vld [vmem:[#allocation5 + $0xee0] sm:$0xff]  ;;  %v869_v46 = vld [vmem:[#allocation5 + $0x10f8] sm:$0xff] }
 0x143   : > { %3273 = vmatpush1.bf16.msra.mxu1 %v3272_v18  ;;  %2875 = vmatprep.subr.bf16.mxu0 %v2874_v19  ;;  %v800_v18 = vld [vmem:[#allocation5 + $0xed0] sm:$0xff]  ;;  %v3294_v19 = vpack.c.bf16 %v805_v12, %v801_v11  ;;  %v2896_v25 = vpack.c.bf16 %v802_v17, %v798_v16  ;;  %v2914_v11 = vpack.c.bf16 %v843_v6, %v839_v5  ;;  %v838_v12 = vld [vmem:[#allocation5 + $0x1000] sm:$0xff]  ;;  %v847_v17 = vld [vmem:[#allocation5 + $0x1048] sm:$0xff] }
 0x144   : > { %3275 = vmatprep.subr.bf16.mxu1 %v3274_v23  ;;  %v809_v23 = vld [vmem:[#allocation5 + $0xf18] sm:$0xff]  ;;  %v3296_v26 = vpack.c.bf16 %v804_v20, %v800_v18  ;;  %v844_v16 = vld [vmem:[#allocation5 + $0x1030] sm:$0xff]  ;;  %v851_v18 = vld [vmem:[#allocation5 + $0x1068] sm:$0xff] }
 0x145   : > { %v853_v20 = vld [vmem:[#allocation5 + $0x1078] sm:$0xff] }
 0x146   : > { %2877 = vmatpush1.bf16.msra.mxu0 %v2876_v29  ;;  %v810_v29 = vld [vmem:[#allocation5 + $0xf20] sm:$0xff]  ;;  %v873_v57 = vld [vmem:[#allocation5 + $0x1118] sm:$0xff] }
 0x147   : > { %3277 = vmatpush1.bf16.msra.mxu1 %v3276_v30  ;;  %2879 = vmatprep.subr.bf16.mxu0 %v2878_v31  ;;  %v808_v30 = vld [vmem:[#allocation5 + $0xf10] sm:$0xff]  ;;  %v3298_v31 = vpack.c.bf16 %v813_v24, %v809_v23  ;;  %v2900_v37 = vpack.c.bf16 %v810_v29, %v806_v28  ;;  %v2918_v24 = vpack.c.bf16 %v851_v18, %v847_v17  ;;  %v322_v34 = vld [vmem:[%s4010_s13 + $0x48] sm:$0xff] }
 0x148   : > { %3279 = vmatprep.subr.bf16.mxu1 %v3278_v35  ;;  %v817_v35 = vld [vmem:[#allocation5 + $0xf58] sm:$0xff]  ;;  %v3300_v38 = vpack.c.bf16 %v812_v32, %v808_v30  ;;  %v852_v29 = vld [vmem:[#allocation5 + $0x1070] sm:$0xff]  ;;  %v855_v30 = vld [vmem:[#allocation5 + $0x1088] sm:$0xff] }
 0x149   : > { %v857_v32 = vld [vmem:[#allocation5 + $0x1098] sm:$0xff] }
 0x14a   : > { %2881 = vmatpush1.bf16.msra.mxu0 %v2880_v41  ;;  %v818_v41 = vld [vmem:[#allocation5 + $0xf60] sm:$0xff]  ;;  %v877_v58 = vld [vmem:[#allocation5 + $0x1138] sm:$0xff] }
 0x14b   : > { %3281 = vmatpush1.bf16.msra.mxu1 %v3280_v42  ;;  %2883 = vmatprep.subr.bf16.mxu0 %v2882_v43  ;;  %v816_v42 = vld [vmem:[#allocation5 + $0xf50] sm:$0xff]  ;;  %v3302_v43 = vpack.c.bf16 %v821_v36, %v817_v35  ;;  %v2904_v49 = vpack.c.bf16 %v818_v41, %v814_v40  ;;  %v3322_v41 = vpack.c.bf16 %v861_v33, %v857_v32  ;;  %v881_v5 = vld [vmem:[#allocation5 + $0x1158] sm:$0xff] }
 0x14c   : > { %3283 = vmatprep.subr.bf16.mxu1 %v3282_v47  ;;  %v825_v47 = vld [vmem:[#allocation5 + $0xf98] sm:$0xff]  ;;  %v3304_v50 = vpack.c.bf16 %v820_v44, %v816_v42  ;;  %v856_v40 = vld [vmem:[#allocation5 + $0x1090] sm:$0xff]  ;;  %v867_v44 = vld [vmem:[#allocation5 + $0x10e8] sm:$0xff] }
 0x14d   : > { %v860_v42 = vld [vmem:[#allocation5 + $0x10b0] sm:$0xff]  ;;  %v885_v6 = vld [vmem:[#allocation5 + $0x1178] sm:$0xff] }
 0x14e   : > { %2885 = vmatpush1.bf16.msra.mxu0 %v2884_v53  ;;  %v826_v53 = vld [vmem:[#allocation5 + $0xfa0] sm:$0xff]  ;;  %v889_v17 = vld [vmem:[#allocation5 + $0x1198] sm:$0xff] }
 0x14f   : > { %3285 = vmatpush1.bf16.msra.mxu1 %v3284_v54  ;;  %2887 = vmatprep.subr.bf16.mxu0 %v2886_v55  ;;  %v824_v54 = vld [vmem:[#allocation5 + $0xf90] sm:$0xff]  ;;  %v3306_v55 = vpack.c.bf16 %v829_v48, %v825_v47  ;;  %v2908_v61 = vpack.c.bf16 %v826_v53, %v822_v52  ;;  %v3324_v48 = vpack.c.bf16 %v860_v42, %v856_v40  ;;  %v893_v18 = vld [vmem:[#allocation5 + $0x11b8] sm:$0xff]  ;;  %v907_v40 = vld [vmem:[#allocation5 + $0x1228] sm:$0xff] }
 0x150   : > { %3287 = vmatprep.subr.bf16.mxu1 %v3286_v59  ;;  %v833_v59 = vld [vmem:[#allocation5 + $0xfd8] sm:$0xff]  ;;  %v3308_v62 = vpack.c.bf16 %v828_v56, %v824_v54  ;;  %v864_v52 = vld [vmem:[#allocation5 + $0x10d0] sm:$0xff]  ;;  %v3326_v53 = vpack.c.bf16 %v869_v46, %v865_v45  ;;  %v875_v56 = vld [vmem:[#allocation5 + $0x1128] sm:$0xff] }
 0x151   : > { %v868_v54 = vld [vmem:[#allocation5 + $0x10f0] sm:$0xff]  ;;  %v909_v42 = vld [vmem:[#allocation5 + $0x1238] sm:$0xff]  ;;  %v902_v46 = vld [vmem:[#allocation5 + $0x1200] sm:$0xff] }
 0x152   : > { %2889 = vmatpush1.bf16.msra.mxu0 %v2888_v1  ;;  %v834_v1 = vld [vmem:[#allocation5 + $0xfe0] sm:$0xff] }
 0x153   : > { %3289 = vmatpush1.bf16.msra.mxu1 %v3288_v2  ;;  %2891 = vmatprep.subr.bf16.mxu0 %v2890_v3  ;;  %v832_v2 = vld [vmem:[#allocation5 + $0xfd0] sm:$0xff]  ;;  %v3310_v3 = vpack.c.bf16 %v837_v60, %v833_v59  ;;  %v2912_v9 = vpack.c.bf16 %v834_v1, %v830_v0  ;;  %v3328_v60 = vpack.c.bf16 %v868_v54, %v864_v52  ;;  %v915_v52 = vld [vmem:[#allocation5 + $0x1268] sm:$0xff]  ;;  %v917_v54 = vld [vmem:[#allocation5 + $0x1278] sm:$0xff] }
 0x154   : > { %3291 = vmatprep.subr.bf16.mxu1 %v3290_v7  ;;  %v841_v7 = vld [vmem:[#allocation5 + $0x1018] sm:$0xff]  ;;  %v3312_v10 = vpack.c.bf16 %v836_v4, %v832_v2  ;;  %v872_v0 = vld [vmem:[#allocation5 + $0x1110] sm:$0xff]  ;;  %v3330_v1 = vpack.c.bf16 %v877_v58, %v873_v57  ;;  %v883_v4 = vld [vmem:[#allocation5 + $0x1168] sm:$0xff] }
 0x155   : > { %v876_v2 = vld [vmem:[#allocation5 + $0x1130] sm:$0xff]  ;;  %v910_v58 = vld [vmem:[#allocation5 + $0x1240] sm:$0xff] }
 0x156   : > { %2893 = vmatpush1.bf16.msra.mxu0 %v2892_v13  ;;  %v842_v13 = vld [vmem:[#allocation5 + $0x1020] sm:$0xff] }
 0x157   : > { %3293 = vmatpush1.bf16.msra.mxu1 %v3292_v14  ;;  %2895 = vmatprep.subr.bf16.mxu0 %v2894_v15  ;;  %v840_v14 = vld [vmem:[#allocation5 + $0x1010] sm:$0xff]  ;;  %v3314_v15 = vpack.c.bf16 %v845_v8, %v841_v7  ;;  %v2916_v22 = vpack.c.bf16 %v842_v13, %v838_v12  ;;  %v3332_v8 = vpack.c.bf16 %v876_v2, %v872_v0  ;;  %v923_v0 = vld [vmem:[#allocation5 + $0x12a8] sm:$0xff]  ;;  %v925_v2 = vld [vmem:[#allocation5 + $0x12b8] sm:$0xff] }
 0x158   : > { %3295 = vmatprep.subr.bf16.mxu1 %v3294_v19  ;;  %v849_v19 = vld [vmem:[#allocation5 + $0x1058] sm:$0xff]  ;;  %v3316_v23 = vpack.c.bf16 %v844_v16, %v840_v14  ;;  %v880_v12 = vld [vmem:[#allocation5 + $0x1150] sm:$0xff]  ;;  %v3334_v13 = vpack.c.bf16 %v885_v6, %v881_v5  ;;  %v891_v16 = vld [vmem:[#allocation5 + $0x11a8] sm:$0xff] }
 0x159   : > { %v3318_v28 = vpack.c.bf16 %v853_v20, %v849_v19  ;;  %v884_v14 = vld [vmem:[#allocation5 + $0x1170] sm:$0xff]  ;;  %v918_v6 = vld [vmem:[#allocation5 + $0x1280] sm:$0xff] }
 0x15a   : > { %2897 = vmatpush1.bf16.msra.mxu0 %v2896_v25  ;;  %v846_v25 = vld [vmem:[#allocation5 + $0x1040] sm:$0xff]  ;;  %v3336_v20 = vpack.c.bf16 %v884_v14, %v880_v12  ;;  %v931_v12 = vld [vmem:[#allocation5 + $0x12e8] sm:$0xff]  ;;  %v933_v14 = vld [vmem:[#allocation5 + $0x12f8] sm:$0xff] }
 0x15b   : > { %3297 = vmatpush1.bf16.msra.mxu1 %v3296_v26  ;;  %2899 = vmatprep.subr.bf16.mxu0 %v2898_v27  ;;  %v850_v26 = vld [vmem:[#allocation5 + $0x1060] sm:$0xff]  ;;  %v848_v27 = vld [vmem:[#allocation5 + $0x1050] sm:$0xff] }
 0x15c   : > { %3299 = vmatprep.subr.bf16.mxu1 %v3298_v31  ;;  %v859_v31 = vld [vmem:[#allocation5 + $0x10a8] sm:$0xff]  ;;  %v2920_v35 = vpack.c.bf16 %v850_v26, %v846_v25  ;;  %v3320_v36 = vpack.c.bf16 %v852_v29, %v848_v27  ;;  %v3338_v25 = vpack.c.bf16 %v893_v18, %v889_v17  ;;  %v892_v26 = vld [vmem:[#allocation5 + $0x11b0] sm:$0xff]  ;;  %v897_v29 = vld [vmem:[#allocation5 + $0x11d8] sm:$0xff] }
 0x15d   : > { %v895_v27 = vld [vmem:[#allocation5 + $0x11c8] sm:$0xff]  ;;  %v926_v18 = vld [vmem:[#allocation5 + $0x12c0] sm:$0xff] }
 0x15e   : > { %2901 = vmatpush1.bf16.msra.mxu0 %v2900_v37  ;;  %v2922_v37 = vpack.c.bf16 %v859_v31, %v855_v30  ;;  %v901_v30 = vld [vmem:[#allocation5 + $0x11f8] sm:$0xff] }
 0x15f   : > { %3301 = vmatpush1.bf16.msra.mxu1 %v3300_v38  ;;  %2903 = vmatprep.subr.bf16.mxu0 %v2902_v39  ;;  %v854_v38 = vld [vmem:[#allocation5 + $0x1080] sm:$0xff] }
 0x160   : > { %3303 = vmatprep.subr.bf16.mxu1 %v3302_v43  ;;  %v858_v39 = vld [vmem:[#allocation5 + $0x10a0] sm:$0xff]  ;;  %v863_v43 = vld [vmem:[#allocation5 + $0x10c8] sm:$0xff] }
 0x161   : > { %v2924_v47 = vpack.c.bf16 %v858_v39, %v854_v38  ;;  %v900_v38 = vld [vmem:[#allocation5 + $0x11f0] sm:$0xff]  ;;  %v903_v39 = vld [vmem:[#allocation5 + $0x1208] sm:$0xff] }
 0x162   : > { %2905 = vmatpush1.bf16.msra.mxu0 %v2904_v49  ;;  %v2926_v49 = vpack.c.bf16 %v867_v44, %v863_v43  ;;  %v2946_v45 = vpack.c.bf16 %v907_v40, %v903_v39 }
 0x163   : > { %3305 = vmatpush1.bf16.msra.mxu1 %v3304_v50  ;;  %2907 = vmatprep.subr.bf16.mxu0 %v2906_v51  ;;  %v862_v50 = vld [vmem:[#allocation5 + $0x10c0] sm:$0xff] }
 0x164   : > { %3307 = vmatprep.subr.bf16.mxu1 %v3306_v55  ;;  %v866_v51 = vld [vmem:[#allocation5 + $0x10e0] sm:$0xff]  ;;  %v871_v55 = vld [vmem:[#allocation5 + $0x1108] sm:$0xff] }
 0x165   : > { %v2928_v59 = vpack.c.bf16 %v866_v51, %v862_v50  ;;  %v908_v50 = vld [vmem:[#allocation5 + $0x1230] sm:$0xff]  ;;  %v911_v51 = vld [vmem:[#allocation5 + $0x1248] sm:$0xff] }
 0x166   : > { %2909 = vmatpush1.bf16.msra.mxu0 %v2908_v61  ;;  %v2930_v61 = vpack.c.bf16 %v875_v56, %v871_v55  ;;  %v2950_v57 = vpack.c.bf16 %v915_v52, %v911_v51 }
 0x167   : > { %3309 = vmatpush1.bf16.msra.mxu1 %v3308_v62  ;;  %2911 = vmatprep.subr.bf16.mxu0 %v2910_v63  ;;  %v870_v62 = vld [vmem:[#allocation5 + $0x1100] sm:$0xff] }
 0x168   : > { %3311 = vmatprep.subr.bf16.mxu1 %v3310_v3  ;;  %v874_v63 = vld [vmem:[#allocation5 + $0x1120] sm:$0xff]  ;;  %v879_v3 = vld [vmem:[#allocation5 + $0x1148] sm:$0xff] }
 0x169   : > { %v2932_v7 = vpack.c.bf16 %v874_v63, %v870_v62  ;;  %v916_v62 = vld [vmem:[#allocation5 + $0x1270] sm:$0xff]  ;;  %v919_v63 = vld [vmem:[#allocation5 + $0x1288] sm:$0xff] }
 0x16a   : > { %2913 = vmatpush1.bf16.msra.mxu0 %v2912_v9  ;;  %v2934_v9 = vpack.c.bf16 %v883_v4, %v879_v3  ;;  %v2954_v5 = vpack.c.bf16 %v923_v0, %v919_v63 }
 0x16b   : > { %3313 = vmatpush1.bf16.msra.mxu1 %v3312_v10  ;;  %2915 = vmatprep.subr.bf16.mxu0 %v2914_v11  ;;  %v878_v10 = vld [vmem:[#allocation5 + $0x1140] sm:$0xff] }
 0x16c   : > { %3315 = vmatprep.subr.bf16.mxu1 %v3314_v15  ;;  %v882_v11 = vld [vmem:[#allocation5 + $0x1160] sm:$0xff]  ;;  %v887_v15 = vld [vmem:[#allocation5 + $0x1188] sm:$0xff] }
 0x16d   : > { %1408 = vmatmul.mubr.f32.vlgmr.msra.gmra.mrb[0].mxu0 %v319_v21  ;;  %v2936_v19 = vpack.c.bf16 %v882_v11, %v878_v10  ;;  %v924_v10 = vld [vmem:[#allocation5 + $0x12b0] sm:$0xff]  ;;  %v927_v11 = vld [vmem:[#allocation5 + $0x12c8] sm:$0xff] }
 0x16e   : > { %2917 = vmatpush1.bf16.msra.mxu0 %v2916_v22  ;;  %1905 = vmatmul.mubr.f32.vlgmr.msra.gmra.mrb[0].mxu1 %v319_v21  ;;  %v2938_v21 = vpack.c.bf16 %v891_v16, %v887_v15  ;;  %v886_v22 = vld [vmem:[#allocation5 + $0x1180] sm:$0xff]  ;;  %v2958_v17 = vpack.c.bf16 %v931_v12, %v927_v11 }
 0x16f   : > { %3317 = vmatpush1.bf16.msra.mxu1 %v3316_v23  ;;  %2919 = vmatprep.subr.bf16.mxu0 %v2918_v24  ;;  %v890_v23 = vld [vmem:[#allocation5 + $0x11a0] sm:$0xff]  ;;  %v888_v24 = vld [vmem:[#allocation5 + $0x1190] sm:$0xff] }
 0x170   : > { %3319 = vmatprep.subr.bf16.mxu1 %v3318_v28  ;;  %1478 = vmatprep.mubr.f32.mxu0 %v322_v34  ;;  %v899_v28 = vld [vmem:[#allocation5 + $0x11e8] sm:$0xff]  ;;  %v2940_v31 = vpack.c.bf16 %v890_v23, %v886_v22  ;;  %v3340_v32 = vpack.c.bf16 %v892_v26, %v888_v24  ;;  %v932_v22 = vld [vmem:[#allocation5 + $0x12f0] sm:$0xff]  ;;  %v941_v26 = vld [vmem:[#allocation5 + $0x1338] sm:$0xff] }
 0x171   : > { %1975 = vmatprep.mubr.f32.mxu1 %v322_v34  ;;  %v2942_v33 = vpack.c.bf16 %v899_v28, %v895_v27  ;;  %v894_v34 = vld [vmem:[#allocation5 + $0x11c0] sm:$0xff]  ;;  %v935_v23 = vld [vmem:[#allocation5 + $0x1308] sm:$0xff] }
 0x172   : > { %2921 = vmatpush1.bf16.msra.mxu0 %v2920_v35  ;;  %v898_v35 = vld [vmem:[#allocation5 + $0x11e0] sm:$0xff]  ;;  %v939_v24 = vld [vmem:[#allocation5 + $0x1328] sm:$0xff] }
 0x173   : > { %3321 = vmatpush1.bf16.msra.mxu1 %v3320_v36  ;;  %2923 = vmatprep.subr.bf16.mxu0 %v2922_v37  ;;  %v896_v36 = vld [vmem:[#allocation5 + $0x11d0] sm:$0xff]  ;;  %v3342_v37 = vpack.c.bf16 %v901_v30, %v897_v29  ;;  %v2944_v43 = vpack.c.bf16 %v898_v35, %v894_v34  ;;  %v2962_v29 = vpack.c.bf16 %v939_v24, %v935_v23  ;;  %v934_v30 = vld [vmem:[#allocation5 + $0x1300] sm:$0xff]  ;;  %v943_v35 = vld [vmem:[#allocation5 + $0x1348] sm:$0xff] }
 0x174   : > { %3323 = vmatprep.subr.bf16.mxu1 %v3322_v41  ;;  %v905_v41 = vld [vmem:[#allocation5 + $0x1218] sm:$0xff]  ;;  %v3344_v44 = vpack.c.bf16 %v900_v38, %v896_v36  ;;  %v940_v34 = vld [vmem:[#allocation5 + $0x1330] sm:$0xff]  ;;  %v947_v36 = vld [vmem:[#allocation5 + $0x1368] sm:$0xff] }
 0x175   : > { %v949_v38 = vld [vmem:[#allocation5 + $0x1378] sm:$0xff] }
 0x176   : > { %2925 = vmatpush1.bf16.msra.mxu0 %v2924_v47  ;;  %v906_v47 = vld [vmem:[#allocation5 + $0x1220] sm:$0xff]  ;;  %v321_v23 = vld [vmem:[%s4010_s13 + $0x40] sm:$0xff] }
 0x177   : > { %3325 = vmatpush1.bf16.msra.mxu1 %v3324_v48  ;;  %2927 = vmatprep.subr.bf16.mxu0 %v2926_v49  ;;  %v904_v48 = vld [vmem:[#allocation5 + $0x1210] sm:$0xff]  ;;  %v3346_v49 = vpack.c.bf16 %v909_v42, %v905_v41  ;;  %v2948_v55 = vpack.c.bf16 %v906_v47, %v902_v46  ;;  %v2966_v41 = vpack.c.bf16 %v947_v36, %v943_v35  ;;  %v942_v42 = vld [vmem:[#allocation5 + $0x1340] sm:$0xff]  ;;  %v951_v47 = vld [vmem:[#allocation5 + $0x1388] sm:$0xff] }
 0x178   : > { %3327 = vmatprep.subr.bf16.mxu1 %v3326_v53  ;;  %v913_v53 = vld [vmem:[#allocation5 + $0x1258] sm:$0xff]  ;;  %v3348_v56 = vpack.c.bf16 %v908_v50, %v904_v48  ;;  %v948_v46 = vld [vmem:[#allocation5 + $0x1370] sm:$0xff]  ;;  %v955_v48 = vld [vmem:[#allocation5 + $0x13a8] sm:$0xff] }
 0x179   : > { %v957_v50 = vld [vmem:[#allocation5 + $0x13b8] sm:$0xff]  ;;  %v324_v36 = vld [vmem:[%s4010_s13 + $0x58] sm:$0xff] }
 0x17a   : > { %2929 = vmatpush1.bf16.msra.mxu0 %v2928_v59  ;;  %v914_v59 = vld [vmem:[#allocation5 + $0x1260] sm:$0xff]  ;;  %v989_v35 = vld [vmem:[#allocation5 + $0x14b8] sm:$0xff] }
 0x17b   : > { %3329 = vmatpush1.bf16.msra.mxu1 %v3328_v60  ;;  %2931 = vmatprep.subr.bf16.mxu0 %v2930_v61  ;;  %v912_v60 = vld [vmem:[#allocation5 + $0x1250] sm:$0xff]  ;;  %v3350_v61 = vpack.c.bf16 %v917_v54, %v913_v53  ;;  %v2952_v3 = vpack.c.bf16 %v914_v59, %v910_v58  ;;  %v2970_v53 = vpack.c.bf16 %v955_v48, %v951_v47  ;;  %v950_v54 = vld [vmem:[#allocation5 + $0x1380] sm:$0xff]  ;;  %v959_v59 = vld [vmem:[#allocation5 + $0x13c8] sm:$0xff] }
 0x17c   : > { %3331 = vmatprep.subr.bf16.mxu1 %v3330_v1  ;;  %v921_v1 = vld [vmem:[#allocation5 + $0x1298] sm:$0xff]  ;;  %v3352_v4 = vpack.c.bf16 %v916_v62, %v912_v60  ;;  %v956_v58 = vld [vmem:[#allocation5 + $0x13b0] sm:$0xff]  ;;  %v963_v60 = vld [vmem:[#allocation5 + $0x13e8] sm:$0xff] }
 0x17d   : > { %v965_v62 = vld [vmem:[#allocation5 + $0x13f8] sm:$0xff] }
 0x17e   : > { %2933 = vmatpush1.bf16.msra.mxu0 %v2932_v7  ;;  %v922_v7 = vld [vmem:[#allocation5 + $0x12a0] sm:$0xff]  ;;  %v993_v47 = vld [vmem:[#allocation5 + $0x14d8] sm:$0xff] }
 0x17f   : > { %3333 = vmatpush1.bf16.msra.mxu1 %v3332_v8  ;;  %2935 = vmatprep.subr.bf16.mxu0 %v2934_v9  ;;  %v920_v8 = vld [vmem:[#allocation5 + $0x1290] sm:$0xff]  ;;  %v3354_v9 = vpack.c.bf16 %v925_v2, %v921_v1  ;;  %v2956_v15 = vpack.c.bf16 %v922_v7, %v918_v6  ;;  %v2974_v1 = vpack.c.bf16 %v963_v60, %v959_v59  ;;  %v958_v2 = vld [vmem:[#allocation5 + $0x13c0] sm:$0xff]  ;;  %v967_v7 = vld [vmem:[#allocation5 + $0x1408] sm:$0xff] }
 0x180   : > { %3335 = vmatprep.subr.bf16.mxu1 %v3334_v13  ;;  %v929_v13 = vld [vmem:[#allocation5 + $0x12d8] sm:$0xff]  ;;  %v3356_v16 = vpack.c.bf16 %v924_v10, %v920_v8  ;;  %v964_v6 = vld [vmem:[#allocation5 + $0x13f0] sm:$0xff]  ;;  %v971_v8 = vld [vmem:[#allocation5 + $0x1428] sm:$0xff] }
 0x181   : > { %v973_v10 = vld [vmem:[#allocation5 + $0x1438] sm:$0xff] }
 0x182   : > { %2937 = vmatpush1.bf16.msra.mxu0 %v2936_v19  ;;  %v930_v19 = vld [vmem:[#allocation5 + $0x12e0] sm:$0xff]  ;;  %v997_v48 = vld [vmem:[#allocation5 + $0x14f8] sm:$0xff] }
 0x183   : > { %3337 = vmatpush1.bf16.msra.mxu1 %v3336_v20  ;;  %2939 = vmatprep.subr.bf16.mxu0 %v2938_v21  ;;  %v928_v20 = vld [vmem:[#allocation5 + $0x12d0] sm:$0xff]  ;;  %v3358_v21 = vpack.c.bf16 %v933_v14, %v929_v13  ;;  %v2960_v27 = vpack.c.bf16 %v930_v19, %v926_v18  ;;  %v2978_v13 = vpack.c.bf16 %v971_v8, %v967_v7  ;;  %v966_v14 = vld [vmem:[#allocation5 + $0x1400] sm:$0xff]  ;;  %v975_v19 = vld [vmem:[#allocation5 + $0x1448] sm:$0xff] }
 0x184   : > { %3339 = vmatprep.subr.bf16.mxu1 %v3338_v25  ;;  %v937_v25 = vld [vmem:[#allocation5 + $0x1318] sm:$0xff]  ;;  %v3360_v28 = vpack.c.bf16 %v932_v22, %v928_v20  ;;  %v972_v18 = vld [vmem:[#allocation5 + $0x1430] sm:$0xff]  ;;  %v979_v20 = vld [vmem:[#allocation5 + $0x1468] sm:$0xff] }
 0x185   : > { %v981_v22 = vld [vmem:[#allocation5 + $0x1478] sm:$0xff] }
 0x186   : > { %2941 = vmatpush1.bf16.msra.mxu0 %v2940_v31  ;;  %v938_v31 = vld [vmem:[#allocation5 + $0x1320] sm:$0xff]  ;;  %v1001_v59 = vld [vmem:[#allocation5 + $0x1518] sm:$0xff] }
 0x187   : > { %3341 = vmatpush1.bf16.msra.mxu1 %v3340_v32  ;;  %2943 = vmatprep.subr.bf16.mxu0 %v2942_v33  ;;  %v936_v32 = vld [vmem:[#allocation5 + $0x1310] sm:$0xff]  ;;  %v3362_v33 = vpack.c.bf16 %v941_v26, %v937_v25  ;;  %v2964_v39 = vpack.c.bf16 %v938_v31, %v934_v30  ;;  %v2982_v26 = vpack.c.bf16 %v979_v20, %v975_v19  ;;  %v1005_v60 = vld [vmem:[#allocation5 + $0x1538] sm:$0xff] }
 0x188   : > { %3343 = vmatprep.subr.bf16.mxu1 %v3342_v37  ;;  %v945_v37 = vld [vmem:[#allocation5 + $0x1358] sm:$0xff]  ;;  %v3364_v40 = vpack.c.bf16 %v940_v34, %v936_v32  ;;  %v980_v31 = vld [vmem:[#allocation5 + $0x1470] sm:$0xff]  ;;  %v983_v32 = vld [vmem:[#allocation5 + $0x1488] sm:$0xff] }
 0x189   : > { %v985_v34 = vld [vmem:[#allocation5 + $0x1498] sm:$0xff] }
 0x18a   : > { %2945 = vmatpush1.bf16.msra.mxu0 %v2944_v43  ;;  %v946_v43 = vld [vmem:[#allocation5 + $0x1360] sm:$0xff]  ;;  %v1009_v7 = vld [vmem:[#allocation5 + $0x1558] sm:$0xff] }
 0x18b   : > { %3345 = vmatpush1.bf16.msra.mxu1 %v3344_v44  ;;  %2947 = vmatprep.subr.bf16.mxu0 %v2946_v45  ;;  %v944_v44 = vld [vmem:[#allocation5 + $0x1350] sm:$0xff]  ;;  %v3366_v45 = vpack.c.bf16 %v949_v38, %v945_v37  ;;  %v2968_v51 = vpack.c.bf16 %v946_v43, %v942_v42  ;;  %v3386_v43 = vpack.c.bf16 %v989_v35, %v985_v34  ;;  %v1013_v8 = vld [vmem:[#allocation5 + $0x1578] sm:$0xff] }
 0x18c   : > { %3347 = vmatprep.subr.bf16.mxu1 %v3346_v49  ;;  %v953_v49 = vld [vmem:[#allocation5 + $0x1398] sm:$0xff]  ;;  %v3368_v52 = vpack.c.bf16 %v948_v46, %v944_v44  ;;  %v984_v42 = vld [vmem:[#allocation5 + $0x1490] sm:$0xff]  ;;  %v995_v46 = vld [vmem:[#allocation5 + $0x14e8] sm:$0xff] }
 0x18d   : > { %v988_v44 = vld [vmem:[#allocation5 + $0x14b0] sm:$0xff]  ;;  %v1017_v19 = vld [vmem:[#allocation5 + $0x1598] sm:$0xff] }
 0x18e   : > { %2949 = vmatpush1.bf16.msra.mxu0 %v2948_v55  ;;  %v954_v55 = vld [vmem:[#allocation5 + $0x13a0] sm:$0xff]  ;;  %v1021_v20 = vld [vmem:[#allocation5 + $0x15b8] sm:$0xff] }
 0x18f   : > { %3349 = vmatpush1.bf16.msra.mxu1 %v3348_v56  ;;  %2951 = vmatprep.subr.bf16.mxu0 %v2950_v57  ;;  %v952_v56 = vld [vmem:[#allocation5 + $0x1390] sm:$0xff]  ;;  %v3370_v57 = vpack.c.bf16 %v957_v50, %v953_v49  ;;  %v2972_v63 = vpack.c.bf16 %v954_v55, %v950_v54  ;;  %v3388_v50 = vpack.c.bf16 %v988_v44, %v984_v42  ;;  %v1035_v42 = vld [vmem:[#allocation5 + $0x1628] sm:$0xff]  ;;  %v1037_v44 = vld [vmem:[#allocation5 + $0x1638] sm:$0xff] }
 0x190   : > { %3351 = vmatprep.subr.bf16.mxu1 %v3350_v61  ;;  %v961_v61 = vld [vmem:[#allocation5 + $0x13d8] sm:$0xff]  ;;  %v3372_v0 = vpack.c.bf16 %v956_v58, %v952_v56  ;;  %v992_v54 = vld [vmem:[#allocation5 + $0x14d0] sm:$0xff]  ;;  %v3390_v55 = vpack.c.bf16 %v997_v48, %v993_v47  ;;  %v1003_v58 = vld [vmem:[#allocation5 + $0x1528] sm:$0xff] }
 0x191   : > { %v996_v56 = vld [vmem:[#allocation5 + $0x14f0] sm:$0xff]  ;;  %v1030_v48 = vld [vmem:[#allocation5 + $0x1600] sm:$0xff] }
 0x192   : > { %2953 = vmatpush1.bf16.msra.mxu0 %v2952_v3  ;;  %v962_v3 = vld [vmem:[#allocation5 + $0x13e0] sm:$0xff] }
 0x193   : > { %3353 = vmatpush1.bf16.msra.mxu1 %v3352_v4  ;;  %2955 = vmatprep.subr.bf16.mxu0 %v2954_v5  ;;  %v960_v4 = vld [vmem:[#allocation5 + $0x13d0] sm:$0xff]  ;;  %v3374_v5 = vpack.c.bf16 %v965_v62, %v961_v61  ;;  %v2976_v11 = vpack.c.bf16 %v962_v3, %v958_v2  ;;  %v3392_v62 = vpack.c.bf16 %v996_v56, %v992_v54  ;;  %v1043_v54 = vld [vmem:[#allocation5 + $0x1668] sm:$0xff]  ;;  %v1045_v56 = vld [vmem:[#allocation5 + $0x1678] sm:$0xff] }
 0x194   : > { %3355 = vmatprep.subr.bf16.mxu1 %v3354_v9  ;;  %v969_v9 = vld [vmem:[#allocation5 + $0x1418] sm:$0xff]  ;;  %v3376_v12 = vpack.c.bf16 %v964_v6, %v960_v4  ;;  %v1000_v2 = vld [vmem:[#allocation5 + $0x1510] sm:$0xff]  ;;  %v3394_v3 = vpack.c.bf16 %v1005_v60, %v1001_v59  ;;  %v1011_v6 = vld [vmem:[#allocation5 + $0x1568] sm:$0xff] }
 0x195   : > { %v1004_v4 = vld [vmem:[#allocation5 + $0x1530] sm:$0xff]  ;;  %v1038_v60 = vld [vmem:[#allocation5 + $0x1640] sm:$0xff] }
 0x196   : > { %2957 = vmatpush1.bf16.msra.mxu0 %v2956_v15  ;;  %v970_v15 = vld [vmem:[#allocation5 + $0x1420] sm:$0xff] }
 0x197   : > { %3357 = vmatpush1.bf16.msra.mxu1 %v3356_v16  ;;  %2959 = vmatprep.subr.bf16.mxu0 %v2958_v17  ;;  %v968_v16 = vld [vmem:[#allocation5 + $0x1410] sm:$0xff]  ;;  %v3378_v17 = vpack.c.bf16 %v973_v10, %v969_v9  ;;  %v2980_v24 = vpack.c.bf16 %v970_v15, %v966_v14  ;;  %v3396_v10 = vpack.c.bf16 %v1004_v4, %v1000_v2  ;;  %v1051_v2 = vld [vmem:[#allocation5 + $0x16a8] sm:$0xff]  ;;  %v1053_v4 = vld [vmem:[#allocation5 + $0x16b8] sm:$0xff] }
 0x198   : > { %3359 = vmatprep.subr.bf16.mxu1 %v3358_v21  ;;  %v977_v21 = vld [vmem:[#allocation5 + $0x1458] sm:$0xff]  ;;  %v3380_v25 = vpack.c.bf16 %v972_v18, %v968_v16  ;;  %v1008_v14 = vld [vmem:[#allocation5 + $0x1550] sm:$0xff]  ;;  %v3398_v15 = vpack.c.bf16 %v1013_v8, %v1009_v7  ;;  %v1019_v18 = vld [vmem:[#allocation5 + $0x15a8] sm:$0xff] }
 0x199   : > { %v3382_v30 = vpack.c.bf16 %v981_v22, %v977_v21  ;;  %v1012_v16 = vld [vmem:[#allocation5 + $0x1570] sm:$0xff]  ;;  %v1046_v8 = vld [vmem:[#allocation5 + $0x1680] sm:$0xff] }
 0x19a   : > { %2961 = vmatpush1.bf16.msra.mxu0 %v2960_v27  ;;  %v974_v27 = vld [vmem:[#allocation5 + $0x1440] sm:$0xff]  ;;  %v3400_v22 = vpack.c.bf16 %v1012_v16, %v1008_v14  ;;  %v1059_v14 = vld [vmem:[#allocation5 + $0x16e8] sm:$0xff]  ;;  %v1061_v16 = vld [vmem:[#allocation5 + $0x16f8] sm:$0xff] }
 0x19b   : > { %3361 = vmatpush1.bf16.msra.mxu1 %v3360_v28  ;;  %2963 = vmatprep.subr.bf16.mxu0 %v2962_v29  ;;  %v978_v28 = vld [vmem:[#allocation5 + $0x1460] sm:$0xff]  ;;  %v976_v29 = vld [vmem:[#allocation5 + $0x1450] sm:$0xff] }
 0x19c   : > { %3363 = vmatprep.subr.bf16.mxu1 %v3362_v33  ;;  %v987_v33 = vld [vmem:[#allocation5 + $0x14a8] sm:$0xff]  ;;  %v2984_v37 = vpack.c.bf16 %v978_v28, %v974_v27  ;;  %v3384_v38 = vpack.c.bf16 %v980_v31, %v976_v29  ;;  %v3402_v27 = vpack.c.bf16 %v1021_v20, %v1017_v19  ;;  %v1020_v28 = vld [vmem:[#allocation5 + $0x15b0] sm:$0xff]  ;;  %v1025_v31 = vld [vmem:[#allocation5 + $0x15d8] sm:$0xff] }
 0x19d   : > { %v1023_v29 = vld [vmem:[#allocation5 + $0x15c8] sm:$0xff]  ;;  %v1054_v20 = vld [vmem:[#allocation5 + $0x16c0] sm:$0xff] }
 0x19e   : > { %2965 = vmatpush1.bf16.msra.mxu0 %v2964_v39  ;;  %v2986_v39 = vpack.c.bf16 %v987_v33, %v983_v32  ;;  %v1029_v32 = vld [vmem:[#allocation5 + $0x15f8] sm:$0xff] }
 0x19f   : > { %3365 = vmatpush1.bf16.msra.mxu1 %v3364_v40  ;;  %2967 = vmatprep.subr.bf16.mxu0 %v2966_v41  ;;  %v982_v40 = vld [vmem:[#allocation5 + $0x1480] sm:$0xff] }
 0x1a0   : > { %3367 = vmatprep.subr.bf16.mxu1 %v3366_v45  ;;  %v986_v41 = vld [vmem:[#allocation5 + $0x14a0] sm:$0xff]  ;;  %v991_v45 = vld [vmem:[#allocation5 + $0x14c8] sm:$0xff] }
 0x1a1   : > { %v2988_v49 = vpack.c.bf16 %v986_v41, %v982_v40  ;;  %v1028_v40 = vld [vmem:[#allocation5 + $0x15f0] sm:$0xff]  ;;  %v1031_v41 = vld [vmem:[#allocation5 + $0x1608] sm:$0xff] }
 0x1a2   : > { %2969 = vmatpush1.bf16.msra.mxu0 %v2968_v51  ;;  %v2990_v51 = vpack.c.bf16 %v995_v46, %v991_v45  ;;  %v3010_v47 = vpack.c.bf16 %v1035_v42, %v1031_v41 }
 0x1a3   : > { %3369 = vmatpush1.bf16.msra.mxu1 %v3368_v52  ;;  %2971 = vmatprep.subr.bf16.mxu0 %v2970_v53  ;;  %v990_v52 = vld [vmem:[#allocation5 + $0x14c0] sm:$0xff] }
 0x1a4   : > { %3371 = vmatprep.subr.bf16.mxu1 %v3370_v57  ;;  %v994_v53 = vld [vmem:[#allocation5 + $0x14e0] sm:$0xff]  ;;  %v999_v57 = vld [vmem:[#allocation5 + $0x1508] sm:$0xff] }
 0x1a5   : > { %v2992_v61 = vpack.c.bf16 %v994_v53, %v990_v52  ;;  %v1036_v52 = vld [vmem:[#allocation5 + $0x1630] sm:$0xff]  ;;  %v1039_v53 = vld [vmem:[#allocation5 + $0x1648] sm:$0xff] }
 0x1a6   : > { %2973 = vmatpush1.bf16.msra.mxu0 %v2972_v63  ;;  %v2994_v63 = vpack.c.bf16 %v1003_v58, %v999_v57  ;;  %v3014_v59 = vpack.c.bf16 %v1043_v54, %v1039_v53 }
 0x1a7   : > { %3373 = vmatpush1.bf16.msra.mxu1 %v3372_v0  ;;  %2975 = vmatprep.subr.bf16.mxu0 %v2974_v1  ;;  %v998_v0 = vld [vmem:[#allocation5 + $0x1500] sm:$0xff] }
 0x1a8   : > { %3375 = vmatprep.subr.bf16.mxu1 %v3374_v5  ;;  %v1002_v1 = vld [vmem:[#allocation5 + $0x1520] sm:$0xff]  ;;  %v1007_v5 = vld [vmem:[#allocation5 + $0x1548] sm:$0xff] }
 0x1a9   : > { %v2996_v9 = vpack.c.bf16 %v1002_v1, %v998_v0  ;;  %v1044_v0 = vld [vmem:[#allocation5 + $0x1670] sm:$0xff]  ;;  %v1047_v1 = vld [vmem:[#allocation5 + $0x1688] sm:$0xff] }
 0x1aa   : > { %2977 = vmatpush1.bf16.msra.mxu0 %v2976_v11  ;;  %v2998_v11 = vpack.c.bf16 %v1011_v6, %v1007_v5  ;;  %v3018_v7 = vpack.c.bf16 %v1051_v2, %v1047_v1 }
 0x1ab   : > { %3377 = vmatpush1.bf16.msra.mxu1 %v3376_v12  ;;  %2979 = vmatprep.subr.bf16.mxu0 %v2978_v13  ;;  %v1006_v12 = vld [vmem:[#allocation5 + $0x1540] sm:$0xff] }
 0x1ac   : > { %3379 = vmatprep.subr.bf16.mxu1 %v3378_v17  ;;  %v1010_v13 = vld [vmem:[#allocation5 + $0x1560] sm:$0xff]  ;;  %v1015_v17 = vld [vmem:[#allocation5 + $0x1588] sm:$0xff] }
 0x1ad   : > { %1479 = vmatmul.mubr.f32.vlgmr.msra.gmra.mrb[0].mxu0 %v321_v23  ;;  %v3000_v21 = vpack.c.bf16 %v1010_v13, %v1006_v12  ;;  %v1052_v12 = vld [vmem:[#allocation5 + $0x16b0] sm:$0xff]  ;;  %v1055_v13 = vld [vmem:[#allocation5 + $0x16c8] sm:$0xff] }
 0x1ae   : > { %2981 = vmatpush1.bf16.msra.mxu0 %v2980_v24  ;;  %1976 = vmatmul.mubr.f32.vlgmr.msra.gmra.mrb[0].mxu1 %v321_v23  ;;  %v3002_v23 = vpack.c.bf16 %v1019_v18, %v1015_v17  ;;  %v1014_v24 = vld [vmem:[#allocation5 + $0x1580] sm:$0xff]  ;;  %v3022_v19 = vpack.c.bf16 %v1059_v14, %v1055_v13 }
 0x1af   : > { %3381 = vmatpush1.bf16.msra.mxu1 %v3380_v25  ;;  %2983 = vmatprep.subr.bf16.mxu0 %v2982_v26  ;;  %v1018_v25 = vld [vmem:[#allocation5 + $0x15a0] sm:$0xff]  ;;  %v1016_v26 = vld [vmem:[#allocation5 + $0x1590] sm:$0xff] }
 0x1b0   : > { %3383 = vmatprep.subr.bf16.mxu1 %v3382_v30  ;;  %1549 = vmatprep.mubr.f32.mxu0 %v324_v36  ;;  %v1027_v30 = vld [vmem:[#allocation5 + $0x15e8] sm:$0xff]  ;;  %v3004_v33 = vpack.c.bf16 %v1018_v25, %v1014_v24  ;;  %v3404_v34 = vpack.c.bf16 %v1020_v28, %v1016_v26  ;;  %v1060_v24 = vld [vmem:[#allocation5 + $0x16f0] sm:$0xff]  ;;  %v1069_v28 = vld [vmem:[#allocation5 + $0x1738] sm:$0xff] }
 0x1b1   : > { %2046 = vmatprep.mubr.f32.mxu1 %v324_v36  ;;  %v3006_v35 = vpack.c.bf16 %v1027_v30, %v1023_v29  ;;  %v1022_v36 = vld [vmem:[#allocation5 + $0x15c0] sm:$0xff]  ;;  %v1063_v25 = vld [vmem:[#allocation5 + $0x1708] sm:$0xff] }
 0x1b2   : > { %2985 = vmatpush1.bf16.msra.mxu0 %v2984_v37  ;;  %v1026_v37 = vld [vmem:[#allocation5 + $0x15e0] sm:$0xff]  ;;  %v1067_v26 = vld [vmem:[#allocation5 + $0x1728] sm:$0xff] }
 0x1b3   : > { %3385 = vmatpush1.bf16.msra.mxu1 %v3384_v38  ;;  %2987 = vmatprep.subr.bf16.mxu0 %v2986_v39  ;;  %v1024_v38 = vld [vmem:[#allocation5 + $0x15d0] sm:$0xff]  ;;  %v3406_v39 = vpack.c.bf16 %v1029_v32, %v1025_v31  ;;  %v3008_v45 = vpack.c.bf16 %v1026_v37, %v1022_v36  ;;  %v3026_v31 = vpack.c.bf16 %v1067_v26, %v1063_v25  ;;  %v1062_v32 = vld [vmem:[#allocation5 + $0x1700] sm:$0xff]  ;;  %v1071_v37 = vld [vmem:[#allocation5 + $0x1748] sm:$0xff] }
 0x1b4   : > { %3387 = vmatprep.subr.bf16.mxu1 %v3386_v43  ;;  %v1033_v43 = vld [vmem:[#allocation5 + $0x1618] sm:$0xff]  ;;  %v3408_v46 = vpack.c.bf16 %v1028_v40, %v1024_v38  ;;  %v1068_v36 = vld [vmem:[#allocation5 + $0x1730] sm:$0xff]  ;;  %v1075_v38 = vld [vmem:[#allocation5 + $0x1768] sm:$0xff] }
 0x1b5   : > { %v1077_v40 = vld [vmem:[#allocation5 + $0x1778] sm:$0xff]  ;;  %v323_v25 = vld [vmem:[%s4010_s13 + $0x50] sm:$0xff] }
 0x1b6   : > { %2989 = vmatpush1.bf16.msra.mxu0 %v2988_v49  ;;  %v1034_v49 = vld [vmem:[#allocation5 + $0x1620] sm:$0xff] }
 0x1b7   : > { %3389 = vmatpush1.bf16.msra.mxu1 %v3388_v50  ;;  %2991 = vmatprep.subr.bf16.mxu0 %v2990_v51  ;;  %v1032_v50 = vld [vmem:[#allocation5 + $0x1610] sm:$0xff]  ;;  %v3410_v51 = vpack.c.bf16 %v1037_v44, %v1033_v43  ;;  %v3012_v57 = vpack.c.bf16 %v1034_v49, %v1030_v48  ;;  %v3030_v43 = vpack.c.bf16 %v1075_v38, %v1071_v37  ;;  %v1070_v44 = vld [vmem:[#allocation5 + $0x1740] sm:$0xff]  ;;  %v1079_v49 = vld [vmem:[#allocation5 + $0x1788] sm:$0xff] }
 0x1b8   : > { %3391 = vmatprep.subr.bf16.mxu1 %v3390_v55  ;;  %v1041_v55 = vld [vmem:[#allocation5 + $0x1658] sm:$0xff]  ;;  %v3412_v58 = vpack.c.bf16 %v1036_v52, %v1032_v50  ;;  %v1076_v48 = vld [vmem:[#allocation5 + $0x1770] sm:$0xff]  ;;  %v1083_v50 = vld [vmem:[#allocation5 + $0x17a8] sm:$0xff] }
 0x1b9   : > { %v1085_v52 = vld [vmem:[#allocation5 + $0x17b8] sm:$0xff] }
 0x1ba   : > { %2993 = vmatpush1.bf16.msra.mxu0 %v2992_v61  ;;  %v1042_v61 = vld [vmem:[#allocation5 + $0x1660] sm:$0xff]  ;;  %v1117_v37 = vld [vmem:[#allocation5 + $0x18b8] sm:$0xff] }
 0x1bb   : > { %3393 = vmatpush1.bf16.msra.mxu1 %v3392_v62  ;;  %2995 = vmatprep.subr.bf16.mxu0 %v2994_v63  ;;  %v1040_v62 = vld [vmem:[#allocation5 + $0x1650] sm:$0xff]  ;;  %v3414_v63 = vpack.c.bf16 %v1045_v56, %v1041_v55  ;;  %v3016_v5 = vpack.c.bf16 %v1042_v61, %v1038_v60  ;;  %v3034_v55 = vpack.c.bf16 %v1083_v50, %v1079_v49  ;;  %v1078_v56 = vld [vmem:[#allocation5 + $0x1780] sm:$0xff]  ;;  %v1087_v61 = vld [vmem:[#allocation5 + $0x17c8] sm:$0xff] }
 0x1bc   : > { %3395 = vmatprep.subr.bf16.mxu1 %v3394_v3  ;;  %v1049_v3 = vld [vmem:[#allocation5 + $0x1698] sm:$0xff]  ;;  %v3416_v6 = vpack.c.bf16 %v1044_v0, %v1040_v62  ;;  %v1084_v60 = vld [vmem:[#allocation5 + $0x17b0] sm:$0xff]  ;;  %v1091_v62 = vld [vmem:[#allocation5 + $0x17e8] sm:$0xff] }
 0x1bd   : > { %v1093_v0 = vld [vmem:[#allocation5 + $0x17f8] sm:$0xff] }
 0x1be   : > { %2997 = vmatpush1.bf16.msra.mxu0 %v2996_v9  ;;  %v1050_v9 = vld [vmem:[#allocation5 + $0x16a0] sm:$0xff]  ;;  %v1121_v49 = vld [vmem:[#allocation5 + $0x18d8] sm:$0xff] }
 0x1bf   : > { %3397 = vmatpush1.bf16.msra.mxu1 %v3396_v10  ;;  %2999 = vmatprep.subr.bf16.mxu0 %v2998_v11  ;;  %v1048_v10 = vld [vmem:[#allocation5 + $0x1690] sm:$0xff]  ;;  %v3418_v11 = vpack.c.bf16 %v1053_v4, %v1049_v3  ;;  %v3020_v17 = vpack.c.bf16 %v1050_v9, %v1046_v8  ;;  %v3038_v3 = vpack.c.bf16 %v1091_v62, %v1087_v61  ;;  %v1086_v4 = vld [vmem:[#allocation5 + $0x17c0] sm:$0xff]  ;;  %v1095_v9 = vld [vmem:[#allocation5 + $0x1808] sm:$0xff] }
 0x1c0   : > { %3399 = vmatprep.subr.bf16.mxu1 %v3398_v15  ;;  %v1057_v15 = vld [vmem:[#allocation5 + $0x16d8] sm:$0xff]  ;;  %v3420_v18 = vpack.c.bf16 %v1052_v12, %v1048_v10  ;;  %v1092_v8 = vld [vmem:[#allocation5 + $0x17f0] sm:$0xff]  ;;  %v1099_v10 = vld [vmem:[#allocation5 + $0x1828] sm:$0xff] }
 0x1c1   : > { %v1101_v12 = vld [vmem:[#allocation5 + $0x1838] sm:$0xff]  ;;  %v2172_v61 = vld [vmem:[%s4298_s2 + $0x180] sm:$0xff] }
 0x1c2   : > { %3001 = vmatpush1.bf16.msra.mxu0 %v3000_v21  ;;  %v1058_v21 = vld [vmem:[#allocation5 + $0x16e0] sm:$0xff]  ;;  %v1125_v50 = vld [vmem:[#allocation5 + $0x18f8] sm:$0xff] }
 0x1c3   : > { %3401 = vmatpush1.bf16.msra.mxu1 %v3400_v22  ;;  %3003 = vmatprep.subr.bf16.mxu0 %v3002_v23  ;;  %v1056_v22 = vld [vmem:[#allocation5 + $0x16d0] sm:$0xff]  ;;  %v3422_v23 = vpack.c.bf16 %v1061_v16, %v1057_v15  ;;  %v3024_v29 = vpack.c.bf16 %v1058_v21, %v1054_v20  ;;  %v3042_v15 = vpack.c.bf16 %v1099_v10, %v1095_v9  ;;  %v1094_v16 = vld [vmem:[#allocation5 + $0x1800] sm:$0xff]  ;;  %v1103_v21 = vld [vmem:[#allocation5 + $0x1848] sm:$0xff] }
 0x1c4   : > { %3403 = vmatprep.subr.bf16.mxu1 %v3402_v27  ;;  %v1065_v27 = vld [vmem:[#allocation5 + $0x1718] sm:$0xff]  ;;  %v3424_v30 = vpack.c.bf16 %v1060_v24, %v1056_v22  ;;  %v1100_v20 = vld [vmem:[#allocation5 + $0x1830] sm:$0xff]  ;;  %v1107_v22 = vld [vmem:[#allocation5 + $0x1868] sm:$0xff] }
 0x1c5   : > { %v1109_v24 = vld [vmem:[#allocation5 + $0x1878] sm:$0xff]  ;;  %v2174_v9 = vld [vmem:[%s4298_s2 + $0x190] sm:$0xff]  ;;  %v2175_v10 = vld [vmem:[%s4298_s2 + $0x198] sm:$0xff] }
 0x1c6   : > { %3005 = vmatpush1.bf16.msra.mxu0 %v3004_v33  ;;  %v1066_v33 = vld [vmem:[#allocation5 + $0x1720] sm:$0xff]  ;;  %v2173_v62 = vld [vmem:[%s4298_s2 + $0x188] sm:$0xff] }
 0x1c7   : > { %3405 = vmatpush1.bf16.msra.mxu1 %v3404_v34  ;;  %3007 = vmatprep.subr.bf16.mxu0 %v3006_v35  ;;  %v1064_v34 = vld [vmem:[#allocation5 + $0x1710] sm:$0xff]  ;;  %v3426_v35 = vpack.c.bf16 %v1069_v28, %v1065_v27  ;;  %v3028_v41 = vpack.c.bf16 %v1066_v33, %v1062_v32  ;;  %v3046_v28 = vpack.c.bf16 %v1107_v22, %v1103_v21  ;;  %v2145_v21 = vld [vmem:[%s4298_s2 + $0xa8] sm:$0xff] }
 0x1c8   : > { %3407 = vmatprep.subr.bf16.mxu1 %v3406_v39  ;;  %v1073_v39 = vld [vmem:[#allocation5 + $0x1758] sm:$0xff]  ;;  %v3428_v42 = vpack.c.bf16 %v1068_v36, %v1064_v34  ;;  %v1108_v33 = vld [vmem:[#allocation5 + $0x1870] sm:$0xff]  ;;  %v1111_v34 = vld [vmem:[#allocation5 + $0x1888] sm:$0xff] }
 0x1c9   : > { %v1113_v36 = vld [vmem:[#allocation5 + $0x1898] sm:$0xff]  ;;  %v2176_v22 = vld [vmem:[%s4298_s2 + $0x1a0] sm:$0xff] }
 0x1ca   : > { %3009 = vmatpush1.bf16.msra.mxu0 %v3008_v45  ;;  %v1074_v45 = vld [vmem:[#allocation5 + $0x1760] sm:$0xff] }
 0x1cb   : > { %3409 = vmatpush1.bf16.msra.mxu1 %v3408_v46  ;;  %3011 = vmatprep.subr.bf16.mxu0 %v3010_v47  ;;  %v1072_v46 = vld [vmem:[#allocation5 + $0x1750] sm:$0xff]  ;;  %v3430_v47 = vpack.c.bf16 %v1077_v40, %v1073_v39  ;;  %v3032_v53 = vpack.c.bf16 %v1074_v45, %v1070_v44  ;;  %v3450_v44 = vpack.c.bf16 %v1117_v37, %v1113_v36 }
 0x1cc   : > { %3411 = vmatprep.subr.bf16.mxu1 %v3410_v51  ;;  %v1081_v51 = vld [vmem:[#allocation5 + $0x1798] sm:$0xff]  ;;  %v3432_v54 = vpack.c.bf16 %v1076_v48, %v1072_v46  ;;  %v1116_v45 = vld [vmem:[#allocation5 + $0x18b0] sm:$0xff]  ;;  %v1119_v46 = vld [vmem:[#allocation5 + $0x18c8] sm:$0xff]  ;;  %v3796_v48 = vmov 0.0  }
 0x1ce   : > { %3013 = vmatpush1.bf16.msra.mxu0 %v3012_v57  ;;  %v1082_v57 = vld [vmem:[#allocation5 + $0x17a0] sm:$0xff] }
 0x1cf   : > { %3413 = vmatpush1.bf16.msra.mxu1 %v3412_v58  ;;  %3015 = vmatprep.subr.bf16.mxu0 %v3014_v59  ;;  %v1080_v58 = vld [vmem:[#allocation5 + $0x1790] sm:$0xff]  ;;  %v3434_v59 = vpack.c.bf16 %v1085_v52, %v1081_v51  ;;  %v3036_v1 = vpack.c.bf16 %v1082_v57, %v1078_v56  ;;  %v3454_v57 = vpack.c.bf16 %v1125_v50, %v1121_v49 }
 0x1d0   : > { %3415 = vmatprep.subr.bf16.mxu1 %v3414_v63  ;;  %v1089_v63 = vld [vmem:[#allocation5 + $0x17d8] sm:$0xff]  ;;  %v3436_v2 = vpack.c.bf16 %v1084_v60, %v1080_v58  ;;  %v1120_v56 = vld [vmem:[#allocation5 + $0x18d0] sm:$0xff] }
 0x1d1   : > { %v1124_v58 = vld [vmem:[#allocation5 + $0x18f0] sm:$0xff]  ;;  %v2141_v60 = vld [vmem:[%s4298_s2 + $0x88] sm:$0xff] }
 0x1d2   : > { %3017 = vmatpush1.bf16.msra.mxu0 %v3016_v5  ;;  %v1090_v5 = vld [vmem:[#allocation5 + $0x17e0] sm:$0xff] }
 0x1d3   : > { %3417 = vmatpush1.bf16.msra.mxu1 %v3416_v6  ;;  %3019 = vmatprep.subr.bf16.mxu0 %v3018_v7  ;;  %v1088_v6 = vld [vmem:[#allocation5 + $0x17d0] sm:$0xff]  ;;  %v3438_v7 = vpack.c.bf16 %v1093_v0, %v1089_v63  ;;  %v3040_v13 = vpack.c.bf16 %v1090_v5, %v1086_v4  ;;  %v3456_v0 = vpack.c.bf16 %v1124_v58, %v1120_v56  ;;  %v2165_v56 = vld [vmem:[%s4298_s2 + $0x148] sm:$0xff]  ;;  %v2151_v58 = vld [vmem:[%s4298_s2 + $0xd8] sm:$0xff] }
 0x1d4   : > { %3419 = vmatprep.subr.bf16.mxu1 %v3418_v11  ;;  %v1097_v11 = vld [vmem:[#allocation5 + $0x1818] sm:$0xff]  ;;  %v3440_v14 = vpack.c.bf16 %v1092_v8, %v1088_v6  ;;  %v2156_v4 = vld [vmem:[%s4298_s2 + $0x100] sm:$0xff]  ;;  %v3490_v5 = vpack.c.bf16 %v2173_v62, %v2172_v61  ;;  %v2143_v8 = vld [vmem:[%s4298_s2 + $0x98] sm:$0xff] }
 0x1d5   : > { %v2157_v6 = vld [vmem:[%s4298_s2 + $0x108] sm:$0xff] }
 0x1d6   : > { %3021 = vmatpush1.bf16.msra.mxu0 %v3020_v17  ;;  %v1098_v17 = vld [vmem:[#allocation5 + $0x1820] sm:$0xff] }
 0x1d7   : > { %3421 = vmatpush1.bf16.msra.mxu1 %v3420_v18  ;;  %3023 = vmatprep.subr.bf16.mxu0 %v3022_v19  ;;  %v1096_v18 = vld [vmem:[#allocation5 + $0x1810] sm:$0xff]  ;;  %v3442_v19 = vpack.c.bf16 %v1101_v12, %v1097_v11  ;;  %v3044_v26 = vpack.c.bf16 %v1098_v17, %v1094_v16  ;;  %v2127_v16 = vld [vmem:[%s4298_s2 + $0x18] sm:$0xff]  ;;  %v2158_v17 = vld [vmem:[%s4298_s2 + $0x110] sm:$0xff] }
 0x1d8   : > { %3423 = vmatprep.subr.bf16.mxu1 %v3422_v23  ;;  %v1105_v23 = vld [vmem:[#allocation5 + $0x1858] sm:$0xff]  ;;  %v3444_v27 = vpack.c.bf16 %v1100_v20, %v1096_v18  ;;  %v3494_v18 = vpack.c.bf16 %v2175_v10, %v2174_v9  ;;  %v2144_v20 = vld [vmem:[%s4298_s2 + $0xa0] sm:$0xff] }
 0x1d9   : > { %v3446_v32 = vpack.c.bf16 %v1109_v24, %v1105_v23  ;;  %v325_v11 = vld [vmem:[%s4010_s13 + $0x60] sm:$0xff]  ;;  %s311_s13 = scalar_lea.vmem %s4301_s5, %s2564_s29 }
 0x1da   : > { %3025 = vmatpush1.bf16.msra.mxu0 %v3024_v29  ;;  %v1102_v29 = vld [vmem:[#allocation5 + $0x1840] sm:$0xff]  ;;  %v2177_v23 = vld [vmem:[%s4298_s2 + $0x1a8] sm:$0xff] }
 0x1db   : > { %3425 = vmatpush1.bf16.msra.mxu1 %v3424_v30  ;;  %3027 = vmatprep.subr.bf16.mxu0 %v3026_v31  ;;  %v1106_v30 = vld [vmem:[#allocation5 + $0x1860] sm:$0xff]  ;;  %v1104_v31 = vld [vmem:[#allocation5 + $0x1850] sm:$0xff] }
 0x1dc   : > { %3427 = vmatprep.subr.bf16.mxu1 %v3426_v35  ;;  %v1115_v35 = vld [vmem:[#allocation5 + $0x18a8] sm:$0xff]  ;;  %v3048_v38 = vpack.c.bf16 %v1106_v30, %v1102_v29  ;;  %v3448_v39 = vpack.c.bf16 %v1108_v33, %v1104_v31  ;;  %v2160_v29 = vld [vmem:[%s4298_s2 + $0x120] sm:$0xff]  ;;  %v3498_v30 = vpack.c.bf16 %v2177_v23, %v2176_v22  ;;  %v2161_v31 = vld [vmem:[%s4298_s2 + $0x128] sm:$0xff] }
 0x1dd   : > { %v3050_v40 = vpack.c.bf16 %v1115_v35, %v1111_v34  ;;  %v2147_v33 = vld [vmem:[%s4298_s2 + $0xb8] sm:$0xff]  ;;  %v2178_v34 = vld [vmem:[%s4298_s2 + $0x1b0] sm:$0xff]  ;;  %v3500_v37 = vpack.c.bf16 %v2161_v31, %v2160_v29 }
 0x1de   : > { %3029 = vmatpush1.bf16.msra.mxu0 %v3028_v41  ;;  %v1110_v41 = vld [vmem:[#allocation5 + $0x1880] sm:$0xff]  ;;  %v2179_v35 = vld [vmem:[%s4298_s2 + $0x1b8] sm:$0xff] }
 0x1df   : > { %3429 = vmatpush1.bf16.msra.mxu1 %v3428_v42  ;;  %3031 = vmatprep.subr.bf16.mxu0 %v3030_v43  ;;  %v1114_v42 = vld [vmem:[#allocation5 + $0x18a0] sm:$0xff]  ;;  %v1112_v43 = vld [vmem:[#allocation5 + $0x1890] sm:$0xff]  ;;  %v2171_v29 = vld [vmem:[%s4298_s2 + $0x178] sm:$0xff] }
 0x1e0   : > { %3431 = vmatprep.subr.bf16.mxu1 %v3430_v47  ;;  %v1123_v47 = vld [vmem:[#allocation5 + $0x18e8] sm:$0xff]  ;;  %v3052_v51 = vpack.c.bf16 %v1114_v42, %v1110_v41  ;;  %v3452_v52 = vpack.c.bf16 %v1116_v45, %v1112_v43  ;;  %v2162_v41 = vld [vmem:[%s4298_s2 + $0x130] sm:$0xff]  ;;  %v3502_v42 = vpack.c.bf16 %v2179_v35, %v2178_v34  ;;  %v2149_v45 = vld [vmem:[%s4298_s2 + $0xc8] sm:$0xff] }
 0x1e1   : > { %v2163_v43 = vld [vmem:[%s4298_s2 + $0x138] sm:$0xff]  ;;  %v2333_v35 = vld [vmem:[%s4299_s3] sm:$0xff] }
 0x1e2   : > { %3033 = vmatpush1.bf16.msra.mxu0 %v3032_v53  ;;  %v3054_v53 = vpack.c.bf16 %v1123_v47, %v1119_v46  ;;  %v2180_v46 = vld [vmem:[%s4298_s2 + $0x1c0] sm:$0xff]  ;;  %v2181_v47 = vld [vmem:[%s4298_s2 + $0x1c8] sm:$0xff]  ;;  %v3504_v50 = vpack.c.bf16 %v2163_v43, %v2162_v41  ;;  %v2336_v41 = vld [vmem:[%s4299_s3 + $0x18] sm:$0xff] }
 0x1e3   : > { %3433 = vmatpush1.bf16.msra.mxu1 %v3432_v54  ;;  %3035 = vmatprep.subr.bf16.mxu0 %v3034_v55  ;;  %v1118_v54 = vld [vmem:[#allocation5 + $0x18c0] sm:$0xff] }
 0x1e4   : > { %3435 = vmatprep.subr.bf16.mxu1 %v3434_v59  ;;  %v1122_v55 = vld [vmem:[#allocation5 + $0x18e0] sm:$0xff]  ;;  %v2140_v59 = vld [vmem:[%s4298_s2 + $0x80] sm:$0xff] }
 0x1e5   : > { %v3056_v63 = vpack.c.bf16 %v1122_v55, %v1118_v54  ;;  %v2164_v54 = vld [vmem:[%s4298_s2 + $0x140] sm:$0xff]  ;;  %v3506_v55 = vpack.c.bf16 %v2181_v47, %v2180_v46 }
 0x1e6   : > { %3037 = vmatpush1.bf16.msra.mxu0 %v3036_v1  ;;  %v3458_v1 = vpack.c.bf16 %v2141_v60, %v2140_v59  ;;  %v2182_v59 = vld [vmem:[%s4298_s2 + $0x1d0] sm:$0xff]  ;;  %v2183_v60 = vld [vmem:[%s4298_s2 + $0x1d8] sm:$0xff]  ;;  %v3508_v62 = vpack.c.bf16 %v2165_v56, %v2164_v54 }
 0x1e7   : > { %3437 = vmatpush1.bf16.msra.mxu1 %v3436_v2  ;;  %3039 = vmatprep.subr.bf16.mxu0 %v3038_v3  ;;  %v2124_v2 = vld [vmem:[%s4298_s2] sm:$0xff]  ;;  %v2125_v3 = vld [vmem:[%s4298_s2 + $0x8] sm:$0xff] }
 0x1e8   : > { %3439 = vmatprep.subr.bf16.mxu1 %v3438_v7  ;;  %v2142_v7 = vld [vmem:[%s4298_s2 + $0x90] sm:$0xff]  ;;  %v3460_v12 = vpack.c.bf16 %v2125_v3, %v2124_v2  ;;  %v3510_v3 = vpack.c.bf16 %v2183_v60, %v2182_v59 }
 0x1e9   : > { %v2166_v2 = vld [vmem:[%s4298_s2 + $0x150] sm:$0xff] }
 0x1ea   : > { %3041 = vmatpush1.bf16.msra.mxu0 %v3040_v13  ;;  %v3492_v13 = vpack.c.bf16 %v2157_v6, %v2156_v4  ;;  %v2167_v4 = vld [vmem:[%s4298_s2 + $0x158] sm:$0xff]  ;;  %v2153_v6 = vld [vmem:[%s4298_s2 + $0xe8] sm:$0xff] }
 0x1eb   : > { %3441 = vmatpush1.bf16.msra.mxu1 %v3440_v14  ;;  %3043 = vmatprep.subr.bf16.mxu0 %v3042_v15  ;;  %v3462_v14 = vpack.c.bf16 %v2143_v8, %v2142_v7  ;;  %v2126_v15 = vld [vmem:[%s4298_s2 + $0x10] sm:$0xff]  ;;  %v2184_v7 = vld [vmem:[%s4298_s2 + $0x1e0] sm:$0xff]  ;;  %v2185_v8 = vld [vmem:[%s4298_s2 + $0x1e8] sm:$0xff]  ;;  %v3512_v10 = vpack.c.bf16 %v2167_v4, %v2166_v2 }
 0x1ec   : > { %3443 = vmatprep.subr.bf16.mxu1 %v3442_v19  ;;  %v2159_v19 = vld [vmem:[%s4298_s2 + $0x118] sm:$0xff]  ;;  %v3464_v24 = vpack.c.bf16 %v2127_v16, %v2126_v15  ;;  %v3514_v15 = vpack.c.bf16 %v2185_v8, %v2184_v7  ;;  %v2169_v16 = vld [vmem:[%s4298_s2 + $0x168] sm:$0xff] }
 0x1ed   : > { %1550 = vmatmul.mubr.f32.vlgmr.msra.gmra.mrb[0].mxu0 %v323_v25 }
 0x1ee   : > { %3045 = vmatpush1.bf16.msra.mxu0 %v3044_v26  ;;  %2047 = vmatmul.mubr.f32.vlgmr.msra.gmra.mrb[0].mxu1 %v323_v25  ;;  %v3496_v25 = vpack.c.bf16 %v2159_v19, %v2158_v17  ;;  %v3466_v26 = vpack.c.bf16 %v2145_v21, %v2144_v20  ;;  %v2154_v17 = vld [vmem:[%s4298_s2 + $0xf0] sm:$0xff]  ;;  %v2187_v20 = vld [vmem:[%s4298_s2 + $0x1f8] sm:$0xff] }
 0x1ef   : > { %3445 = vmatpush1.bf16.msra.mxu1 %v3444_v27  ;;  %3047 = vmatprep.subr.bf16.mxu0 %v3046_v28  ;;  %v2128_v27 = vld [vmem:[%s4298_s2 + $0x20] sm:$0xff]  ;;  %v2129_v28 = vld [vmem:[%s4298_s2 + $0x28] sm:$0xff]  ;;  %v2186_v19 = vld [vmem:[%s4298_s2 + $0x1f0] sm:$0xff] }
 0x1f0   : > { %3447 = vmatprep.subr.bf16.mxu1 %v3446_v32  ;;  %1620 = vmatprep.mubr.f32.mxu0 %v3796_v48  ;;  %v2146_v32 = vld [vmem:[%s4298_s2 + $0xb0] sm:$0xff]  ;;  %v3468_v36 = vpack.c.bf16 %v2129_v28, %v2128_v27 }
 0x1f1   : > { %2117 = vmatprep.mubr.f32.mxu1 %v3796_v48  ;;  %v2170_v27 = vld [vmem:[%s4298_s2 + $0x170] sm:$0xff] }
 0x1f2   : > { %3049 = vmatpush1.bf16.msra.mxu0 %v3048_v38  ;;  %v3470_v38 = vpack.c.bf16 %v2147_v33, %v2146_v32 }
 0x1f3   : > { %3449 = vmatpush1.bf16.msra.mxu1 %v3448_v39  ;;  %3051 = vmatprep.subr.bf16.mxu0 %v3050_v40  ;;  %v2130_v39 = vld [vmem:[%s4298_s2 + $0x30] sm:$0xff]  ;;  %v2131_v40 = vld [vmem:[%s4298_s2 + $0x38] sm:$0xff] }
 0x1f4   : > { %3451 = vmatprep.subr.bf16.mxu1 %v3450_v44  ;;  %v2148_v44 = vld [vmem:[%s4298_s2 + $0xc0] sm:$0xff]  ;;  %v3472_v49 = vpack.c.bf16 %v2131_v40, %v2130_v39  ;;  %v2188_v39 = vlaneseq  ;;  %v2335_v40 = vld [vmem:[%s4299_s3 + $0x10] sm:$0xff] }
 0x1f6   : > { %3053 = vmatpush1.bf16.msra.mxu0 %v3052_v51  ;;  %v3474_v51 = vpack.c.bf16 %v2149_v45, %v2148_v44  ;;  %v2189_v43 = vshrl.u32 %v2188_v39, 7  ;;  %v312_v45 = vld [vmem:[#allocation7] sm:$0x3] }
 0x1f7   : > { %3453 = vmatpush1.bf16.msra.mxu1 %v3452_v52  ;;  %3055 = vmatprep.subr.bf16.mxu0 %v3054_v53  ;;  %v2132_v52 = vld [vmem:[%s4298_s2 + $0x40] sm:$0xff]  ;;  %v2133_v53 = vld [vmem:[%s4298_s2 + $0x48] sm:$0xff] }
 0x1f8   : > { %3455 = vmatprep.subr.bf16.mxu1 %v3454_v57  ;;  %v2150_v57 = vld [vmem:[%s4298_s2 + $0xd0] sm:$0xff]  ;;  %v3476_v61 = vpack.c.bf16 %v2133_v53, %v2132_v52  ;;  %v2339_v44 = vsub.s32 1, %v2189_v43  ;;  %v2190_v47 = vsub.s32 0, %v2189_v43 }
 0x1fa   : > { %3057 = vmatpush1.bf16.msra.mxu0 %v3056_v63  ;;  %v3478_v63 = vpack.c.bf16 %v2151_v58, %v2150_v57  ;;  %v2340_v46 = vrot.slane %v312_v45, %v2339_v44 }
 0x1fb   : > { %3457 = vmatpush1.bf16.msra.mxu1 %v3456_v0  ;;  %3459 = vmatprep.subr.bf16.mxu0 %v3458_v1  ;;  %v2134_v0 = vld [vmem:[%s4298_s2 + $0x50] sm:$0xff]  ;;  %v2135_v1 = vld [vmem:[%s4298_s2 + $0x58] sm:$0xff] }
 0x1fc   : > { %3491 = vmatprep.subr.bf16.mxu1 %v3490_v5  ;;  %v2152_v5 = vld [vmem:[%s4298_s2 + $0xe0] sm:$0xff]  ;;  %v3480_v9 = vpack.c.bf16 %v2135_v1, %v2134_v0 }
 0x1fd   : > { %2565 = vmatmul.mubr.msk.f32.vlgmr.msra.gmra.mrb[0].mxu0 %vm1126_vm0, %v325_v11  ;;  %v2418_v0 = vld [vmem:[%s311_s13] sm:$0xff] }
 0x1fe   : > { %2566 = vmatmul.mubr.msk.f32.vlgmr.msra.gmra.mrb[0].mxu1 %vm1126_vm0, %v325_v11  ;;  %3461 = vmatpush3.bf16.msra.mxu0 %v3460_v12  ;;  %v3482_v11 = vpack.c.bf16 %v2153_v6, %v2152_v5  ;;  %v2136_v12 = vld [vmem:[%s4298_s2 + $0x60] sm:$0xff] }
 0x1ff   : > { %3493 = vmatpush3.bf16.msra.mxu1 %v3492_v13  ;;  %3463 = vmatprep.subr.bf16.mxu0 %v3462_v14  ;;  %v2137_v13 = vld [vmem:[%s4298_s2 + $0x68] sm:$0xff]  ;;  %v2168_v14 = vld [vmem:[%s4298_s2 + $0x160] sm:$0xff] }
 0x200   : > { %3495 = vmatprep.subr.bf16.mxu1 %v3494_v18  ;;  %v2155_v18 = vld [vmem:[%s4298_s2 + $0xf8] sm:$0xff]  ;;  %v3484_v21 = vpack.c.bf16 %v2137_v13, %v2136_v12  ;;  %v3516_v22 = vpack.c.bf16 %v2169_v16, %v2168_v14 }
 0x201   : > { %v3486_v23 = vpack.c.bf16 %v2155_v18, %v2154_v17 }
 0x202   : > { %3465 = vmatpush3.bf16.msra.mxu0 %v3464_v24  ;;  %v3518_v24 = vpack.c.bf16 %v2187_v20, %v2186_v19 }
 0x203   : > { %3497 = vmatpush3.bf16.msra.mxu1 %v3496_v25  ;;  %3467 = vmatprep.subr.bf16.mxu0 %v3466_v26  ;;  %v2138_v25 = vld [vmem:[%s4298_s2 + $0x70] sm:$0xff]  ;;  %v2139_v26 = vld [vmem:[%s4298_s2 + $0x78] sm:$0xff] }
 0x204   : > { %3499 = vmatprep.subr.bf16.mxu1 %v3498_v30  ;;  %v3488_v28 = vpack.c.bf16 %v2139_v26, %v2138_v25  ;;  %v3520_v30 = vpack.c.bf16 %v2171_v29, %v2170_v27 }
 0x206   : > { %3469 = vmatpush3.bf16.msra.mxu0 %v3468_v36  ;;  %v2334_v36 = vld [vmem:[%s4299_s3 + $0x8] sm:$0xff] }
 0x207   : > { %3501 = vmatpush3.bf16.msra.mxu1 %v3500_v37  ;;  %3471 = vmatprep.subr.bf16.mxu0 %v3470_v38  ;;  %v3523_v37 = vpack.c.bf16 %v2334_v36, %v2333_v35  ;;  %v3797_v38 = vmov 0.0|0.0  }
 0x208   : > { %3503 = vmatprep.subr.bf16.mxu1 %v3502_v42  ;;  %v3526_v42 = vpack.c.bf16 %v2336_v41, %v2335_v40 }
 0x20a   : > { %3473 = vmatpush3.bf16.msra.mxu0 %v3472_v49 }
 0x20b   : > { %3505 = vmatpush3.bf16.msra.mxu1 %v3504_v50  ;;  %3475 = vmatprep.subr.bf16.mxu0 %v3474_v51  ;;  %v2191_v50 = vrot.slane %v312_v45, %v2190_v47 }
 0x20c   : > { %3507 = vmatprep.subr.bf16.mxu1 %v3506_v55 }
 0x20e   : > { %3477 = vmatpush3.bf16.msra.mxu0 %v3476_v61 }
 0x20f   : > { %3509 = vmatpush3.bf16.msra.mxu1 %v3508_v62  ;;  %3479 = vmatprep.subr.bf16.mxu0 %v3478_v63 }
 0x210   : > { %3511 = vmatprep.subr.bf16.mxu1 %v3510_v3 }
 0x212   : > { %3481 = vmatpush3.bf16.msra.mxu0 %v3480_v9 }
 0x213   : > { %3513 = vmatpush3.bf16.msra.mxu1 %v3512_v10  ;;  %3483 = vmatprep.subr.bf16.mxu0 %v3482_v11 }
 0x214   : > { %3515 = vmatprep.subr.bf16.mxu1 %v3514_v15 }
 0x216   : > { %3485 = vmatpush3.bf16.msra.mxu0 %v3484_v21 }
 0x217   : > { %3517 = vmatpush3.bf16.msra.mxu1 %v3516_v22  ;;  %3487 = vmatprep.subr.bf16.mxu0 %v3486_v23 }
 0x218   : > { %3519 = vmatprep.subr.bf16.mxu1 %v3518_v24 }
 0x21a   : > { %3489 = vmatpush3.bf16.msra.mxu0 %v3488_v28 }
 0x21b   : > { %3521 = vmatpush3.bf16.msra.mxu1 %v3520_v30  ;;  %3522 = vmatprep.subr.bf16.mxu0 %v3797_v38 }
 0x2d0   : > { %v1622_v31 = vpop.f32.mrb[0].mxu0 }
 0x2d1   : > { %v2119_v32 = vpop.f32.mrb[0].mxu1  ;;  %v1624_v33 = vpop.f32.mrb[1].mxu0 }
 0x2d2   : > { %v2121_v34 = vpop.f32.mrb[1].mxu1  ;;  %2256 = vmatprep.mubr.f32.mxu0 %v1624_v33 }
 0x2d3   : > { %2326 = vmatprep.mubr.f32.mxu1 %v2121_v34  ;;  %2257 = vmatmul.mubr.f32.vlgmr.msra.gmra.mrb[2].mxu0 %v1622_v31 }
 0x2d4   : > { %2327 = vmatmul.mubr.f32.vlgmr.msra.gmra.mrb[2].mxu1 %v2119_v32  ;;  %3524 = vmatpush3.bf16.msra.mxu0 %v3523_v37 }
 0x2d5   : > { %3525 = vmatprep.subr.bf16.mxu0 %v3797_v38  ;;  %2655 = vmatprep.mubr.msk.f32.mxu0 %vm3798_vm1, %v3796_v48 }
 0x2d8   : > { %3527 = vmatpush3.bf16.msra.mxu0 %v3526_v42 }
 0x3a6   : > { %v2604_v49 = vpop.f32.mrb[2].mxu0 }
 0x3a7   : > { %v2639_v51 = vpop.f32.mrb[2].mxu1  ;;  %v2605_v52 = vpop.f32.mrb[3].mxu0 }
 0x3a8   : > { %v2606_v53 = vadd.f32 %v2605_v52, %v2604_v49  ;;  %v2640_v54 = vpop.f32.mrb[3].mxu1 }
 0x3a9   : > { %v2641_v55 = vadd.f32 %v2640_v54, %v2639_v51 }
 0x3aa   : > { %v2259_v56 = vadd.f32 %v2606_v53, %v2191_v50 }
 0x3ac   : > { %v2329_v57 = vadd.f32 %v2641_v55, %v2259_v56 }
 0x3ae   : > { %v2332_v58 = vmax.f32 %v2329_v57, 0.0 }
 0x3b0   : > { %2656 = vmatmul.mubr.msk.f32.vlgmr.msra.gmra.mrb[4].mxu0 %vm2341_vm2, %v2332_v58 }
 0x483   : > { %v2411_v59 = vpop.f32.mrb[4].mxu0 }
 0x484   : > { %v2412_v48 = vadd.f32 %v2411_v59, %v2340_v46  ;;  %v2657_v60 = vpop.f32.mrb[5].mxu0 }
 0x486   : > { %3629 = vtanh.f32 %v2412_v48 }
 0x490   : > { %v3630_v61 = vpop.eup %3629 }
 0x491   : > { %v2416_v62 = vmul.f32 1.442695, %v3630_v61 }
 0x493   : > { %3631 = vpow2.f32 %v2416_v62 }
 0x49d   : > { %v3632_v63 = vpop.eup %3631 }
 0x49e   : > { %2429 = vrot.lane.b32.xlu1 %v3632_v63, %s3799_s20  ;;  %2420 = vrot.lane.b32.xlu0 %v3632_v63, %s3800_s10  ;;  %s3801_s10 = smov [#allocation8]  }
 0x49f   : > { %s3723_s27 = sshll.u32 %s3801_s10, 4  ;;  %s3724_s27 = int_to_ptr.vmem [resolvable:$false] %s3723_s27 }
 0x4a0   : > { %s3725_s29 = scalar_lea.vmem %s3724_s27, 256  ;;  %p3726_p9 = scmp.lt.s32.totalorder %s4254_s9, %s3724_s27 }
 0x4a2   : > { %2426 = vrot.lane.b32.xlu0 %v3630_v61, %s3799_s20  ;;  %s3719_s20 = scalar_lea.vmem %s4254_s9, 128 }
 0x4a3   : > { %p3720_p0 = scmp.ne.s32.totalorder %s4254_s9, %s3719_s20  ;;  %p3727_p12 = scmp.lt.s32.totalorder %s3725_s29, %s3719_s20 }
 0x4a5   : > { %p3721_p3 = pnand %p3720_p0, %p4316_p1  ;;  %p3728_p2 = por %p3727_p12, %p3726_p9 }
 0x4a7   : > { %p3722_p7 = pneg %p3721_p3 }
 0x4a9   : > { %p3729_p13 = pnand %p3728_p2, %p3722_p7 }
 0x510   : > { %v2421_v1 = vpop.permute.xlu0 %2420  ;;  %v2430_v5 = vpop.permute.xlu1 %2429 }
 0x511   : > { %v2423_v2 = vmul.f32 %v2421_v1, %v2418_v0 }
 0x513   : > { %v2424_v3 = vadd.f32 %v3630_v61, %v2423_v2 }
 0x514   : > { %v2427_v4 = vpop.permute.xlu0 %2426 }
 0x515   : > { %v2433_v6 = vsel %vm2432_vm3, %v2424_v3, %v2427_v4 }
 0x516   : > { %v2435_v7 = vsel %vm2434_vm4, %v2433_v6, %v2430_v5 }
 0x517   : > { %v2437_v8 = vsel %vm2436_vm5, %v2435_v7, 0.0 }
 0x518   : > { %2438 = vst [vmem:[%s307_s14] sm:$0xff] %v2437_v8 }
 0x519   : > { %3732 = shalt.err (!%p3729_p13)
}
 0x51a   : > { %s3733_s18 = scalar_lea.hbm %s4252_s8, 128  ;;  %s3737_s13 = scalar_lea.hbm %s4302_s6, 256 }
 0x51b   : > { %p3734_p6 = scmp.ne.s32.totalorder %s4252_s8, %s3733_s18  ;;  %p3738_p5 = scmp.lt.u32.totalorder %s4252_s8, %s4302_s6 }
 0x51c   : > { %p3739_p8 = scmp.lt.u32.totalorder %s3737_s13, %s3733_s18  ;;  %p3741_p0 = scmp.lt.u32.totalorder %s3733_s18, %s4252_s8 }
 0x51d   : > { %p3735_p10 = pnand %p3734_p6, %p4316_p1 }
 0x51e   : > { %p3740_p11 = por %p3739_p8, %p3738_p5 }
 0x51f   : > { %p3736_p4 = pneg %p3735_p10 }
 0x520   : > { %p3742_p3 = por %p3741_p0, %p3740_p11 }
 0x522   : > { %p3743_p7 = pnand %p3742_p3, %p3736_p4 }
 0x524   : > { %3746 = shalt.err (!%p3743_p7)
}
 0x525   : > { %3565 = dma.vmem_to_hbm [thread:$0]  (%p4316_p1), %s4254_s9, 128, %s4252_s8, %s2440_s25  }
 0x526 PF: > { %s2465_s14 = sand.u32 1, %s3777_s21   ;;  %p4317_p9 = scmp.ne.s32.totalorder %s4307_s28, 0 }
 0x527   : > { %p4318_p12 = scmp.ge.s32.totalorder %s3789_s24, 2  ;;  %s2466_s11 = scalar_lea.sflag [#allocation4], %s2465_s14 }
 0x529   : > { %p3579_p2 = pnand %p4318_p12, %p4317_p9 }
 0x52b   : > { %3772 = dma.done.wait (!%p3579_p2), %s2466_s11, 128  }
 0x52c   : > { %3774 = vsyncadd (!%p3579_p2), %s2466_s11, 4294967168  ;;  %p20_p13 = scmp.ge.s32.totalorder %s3947_s19, 4   ;;  %s4319_s21 = smov %s3781_s22 }
 0x52d   : > { %s4320_s22 = smov %s3785_s23  ;;  %s4321_s23 = smov %s3963_s30 }
 0x52e   : > { %s4322_s24 = smov %s3947_s19  ;;  %22 = sbr.rel (!%p20_p13) target bundleno = 6 (0x6), region = 100 }
 0x535   :  { %2471 = vsyncpa [#allocation3], 1 }
 0x536   :  { %2473 = vsyncpa [#allocation3 + $0x1], 1 }
 0x537   :  { %2474 = vsyncpa [#allocation6], 1 }
 0x538   :  { %2475 = vsyncpa [#allocation4], 1 }
 0x539   :  { %2477 = vsyncpa [#allocation4 + $0x1], 1 }

</bundles_post_ra>
